<compile_context>
chip_gen: v7x
topology: tpu7x:2x2x1
jax: 0.10.0
libtpu: 0.0.40
codegen_flags: <defaults>
</compile_context>

<pallas_src>
import jax
import jax.numpy as jnp
from jax import lax
from jax.experimental import pallas as pl
from jax.experimental.pallas import tpu as pltpu

CP = 128  # channel padding to the TPU lane width


# --------------------------------------------------------------------------- #
# Kernel A: ConvTranspose2d(2x2, s=2) phase + attention gate + channel concat  #
# --------------------------------------------------------------------------- #
def _up_attn_kernel(x_ref, skip_ref, wup_ref, bup_ref, wg_ref, bg_ref,
                    wx_ref, bx_ref, wpsi_ref, bpsi_ref, o_ref):
    """One (batch, phase) step.

    x_ref:    (S, in_c)    low-res input, S = Hs*Ws
    skip_ref: (S, out_c)   skip connection, deinterleaved for this phase
    wup_ref:  (in_c, out_c) transpose-conv sub-kernel of this phase
    wg/wx:    (out_c, f_int) 1x1 conv weights with BN scale folded
    wpsi:     (f_int, 1)
    o_ref:    (S, CP)      [up | attn | zeros] lane-dense 128-channel slab
    """
    S, cp = o_ref.shape
    out_c = wup_ref.shape[1]

    xs = x_ref[...]
    sk = skip_ref[...]

    up = jnp.dot(xs, wup_ref[...], preferred_element_type=jnp.float32) + bup_ref[...]
    g1 = jnp.dot(up, wg_ref[...], preferred_element_type=jnp.float32) + bg_ref[...]
    x1 = jnp.dot(sk, wx_ref[...], preferred_element_type=jnp.float32) + bx_ref[...]
    pre = jnp.maximum(g1 + x1, 0.0)
    z = jnp.dot(pre, wpsi_ref[...], preferred_element_type=jnp.float32) + bpsi_ref[...]
    psi = 1.0 / (1.0 + jnp.exp(-z))            # sigmoid, (S, 1)
    attn = sk * psi                            # gate the skip connection

    parts = [up, attn]
    if cp > 2 * out_c:
        parts.append(jnp.zeros((S, cp - 2 * out_c), jnp.float32))
    o_ref[...] = jnp.concatenate(parts, axis=1)


def _up_attn_call(x_flat, skip_d, wup, bup, wg_m, bg_m, wx_m, bx_m, wpsi_m, bpsi_m):
    N, S, in_c = x_flat.shape
    out_c = skip_d.shape[3]
    f_int = wg_m.shape[1]
    return pl.pallas_call(
        _up_attn_kernel,
        out_shape=jax.ShapeDtypeStruct((N, 4, S, CP), jnp.float32),
        grid_spec=pltpu.PrefetchScalarGridSpec(
            num_scalar_prefetch=0,
            grid=(N, 4),
            in_specs=[
                pl.BlockSpec((None, S, in_c), lambda n, t: (n, 0, 0)),
                pl.BlockSpec((None, None, S, out_c), lambda n, t: (n, t, 0, 0)),
                pl.BlockSpec((None, in_c, out_c), lambda n, t: (t, 0, 0)),
                pl.BlockSpec((1, out_c), lambda n, t: (0, 0)),
                pl.BlockSpec((out_c, f_int), lambda n, t: (0, 0)),
                pl.BlockSpec((1, f_int), lambda n, t: (0, 0)),
                pl.BlockSpec((out_c, f_int), lambda n, t: (0, 0)),
                pl.BlockSpec((1, f_int), lambda n, t: (0, 0)),
                pl.BlockSpec((f_int, 1), lambda n, t: (0, 0)),
                pl.BlockSpec((1, 1), lambda n, t: (0, 0)),
            ],
            out_specs=pl.BlockSpec((None, None, S, CP), lambda n, t: (n, t, 0, 0)),
        ),
        compiler_params=pltpu.CompilerParams(
            dimension_semantics=("parallel", "parallel")),
    )(x_flat, skip_d, wup, bup, wg_m, bg_m, wx_m, bx_m, wpsi_m, bpsi_m)


# --------------------------------------------------------------------------- #
# Kernel B: fused conv_block (Conv3x3+BN+ReLU, twice) with VMEM intermediate   #
# --------------------------------------------------------------------------- #
def _conv_block_kernel(x_ref, w1_ref, b1_ref, w2_ref, b2_ref, o_ref,
                       xpad_ref, mid_ref):
    """One (batch, H-tile) step.

    x_ref:  (H, W, CP)       full padded-channel image (same block for every h)
    w1/w2:  (9*CP, CP)       tap-major weights with BN scale folded
    b1/b2:  (1, CP)          folded BN biases
    o_ref:  (TH*W, CP)       lane-dense output tile
    xpad_ref: (H+4, W+2, CP) zero-padded image, built once per batch element
    mid_ref:  (TH+2, W+2, CP) intermediate activation tile (never leaves VMEM)
    """
    H, W, cp = x_ref.shape
    TH = o_ref.shape[0] // W
    MH = TH + 2
    h = pl.program_id(1)

    # Build the zero-padded image in VMEM once per batch element (h == 0).
    @pl.when(h == 0)
    def _():
        xpad_ref[...] = jnp.zeros(xpad_ref.shape, xpad_ref.dtype)
        xpad_ref[2:2 + H, 1:1 + W, :] = x_ref[...]

    # ---- layer 1: 3x3 conv (+folded BN) + ReLU over TH+2 intermediate rows ----
    row0 = h * TH
    acc1 = jnp.zeros((MH * W, cp), jnp.float32)
    for dy in range(3):
        slabs = [
            xpad_ref[pl.ds(row0 + dy, MH), pl.ds(dx, W), :].reshape(MH * W, cp)
            for dx in range(3)
        ]
        patch = jnp.concatenate(slabs, axis=1)                 # (MH*W, 3*CP)
        acc1 = acc1 + jnp.dot(patch, w1_ref[dy * 3 * cp:(dy + 1) * 3 * cp, :],
                              preferred_element_type=jnp.float32)
    mid = jnp.maximum(acc1 + b1_ref[...], 0.0).reshape(MH, W, cp)

    # Stage the intermediate in VMEM with one zero column on each side
    # (layer 2's W padding); it never round-trips through HBM.
    mid_ref[:, 0:1, :] = jnp.zeros((MH, 1, cp), jnp.float32)
    mid_ref[:, W + 1:W + 2, :] = jnp.zeros((MH, 1, cp), jnp.float32)
    mid_ref[:, 1:1 + W, :] = mid

    # Halo rows that fall outside the image are layer 2's zero padding.
    @pl.when(h == 0)
    def _():
        mid_ref[0:1, :, :] = jnp.zeros((1, W + 2, cp), jnp.float32)

    @pl.when(h == pl.num_programs(1) - 1)
    def _():
        mid_ref[MH - 1:MH, :, :] = jnp.zeros((1, W + 2, cp), jnp.float32)

    # ---- layer 2: 3x3 conv (+folded BN) + ReLU over the TH output rows ----
    acc2 = jnp.zeros((TH * W, cp), jnp.float32)
    for dy in range(3):
        slabs = [
            mid_ref[dy:dy + TH, dx:dx + W, :].reshape(TH * W, cp)
            for dx in range(3)
        ]
        patch = jnp.concatenate(slabs, axis=1)
        acc2 = acc2 + jnp.dot(patch, w2_ref[dy * 3 * cp:(dy + 1) * 3 * cp, :],
                              preferred_element_type=jnp.float32)
    o_ref[...] = jnp.maximum(acc2 + b2_ref[...], 0.0)


def _conv_block_call(cat, w1_m, b1_m, w2_m, b2_m, th):
    N, H, W, cp = cat.shape
    return pl.pallas_call(
        _conv_block_kernel,
        out_shape=jax.ShapeDtypeStruct((N, H * W, cp), jnp.float32),
        grid_spec=pltpu.PrefetchScalarGridSpec(
            num_scalar_prefetch=0,
            grid=(N, H // th),
            in_specs=[
                pl.BlockSpec((None, H, W, cp), lambda n, h: (n, 0, 0, 0)),
                pl.BlockSpec((9 * cp, cp), lambda n, h: (0, 0)),
                pl.BlockSpec((1, cp), lambda n, h: (0, 0)),
                pl.BlockSpec((9 * cp, cp), lambda n, h: (0, 0)),
                pl.BlockSpec((1, cp), lambda n, h: (0, 0)),
            ],
            out_specs=pl.BlockSpec((None, th * W, cp), lambda n, h: (n, h, 0)),
            scratch_shapes=[
                pltpu.VMEM((H + 4, W + 2, cp), jnp.float32),
                pltpu.VMEM((th + 2, W + 2, cp), jnp.float32),
            ],
        ),
        compiler_params=pltpu.CompilerParams(
            dimension_semantics=("parallel", "arbitrary")),
    )(cat, w1_m, b1_m, w2_m, b2_m)


# --------------------------------------------------------------------------- #
# Parameter folding / layout helpers (one-time, wrapper-side)                  #
# --------------------------------------------------------------------------- #
def _fold_bn(conv_b, bn, eps=1e-5):
    s = bn["gamma"] / jnp.sqrt(bn["var"] + eps)
    return s, bn["beta"] + (conv_b - bn["mean"]) * s


def _conv3_to_mat(w_oihw, scale, cp):
    """(Cout, Cin, 3, 3) -> (9*cp, cp), tap-major, BN scale folded, zero-padded."""
    co, ci = w_oihw.shape[0], w_oihw.shape[1]
    w = jnp.transpose(w_oihw, (2, 3, 1, 0)) * scale[None, None, None, :]  # (3,3,ci,co)
    wp = jnp.zeros((3, 3, cp, cp), jnp.float32).at[:, :, :ci, :co].set(w)
    return wp.reshape(9 * cp, cp)


def decoder_block_forward(x_nchw, skip_nchw, p):
    """Full decoder_block forward.  Inputs/outputs in NCHW (PyTorch convention)."""
    x = jnp.transpose(x_nchw, (0, 2, 3, 1)).astype(jnp.float32)        # (N,Hs,Ws,in_c)
    skip = jnp.transpose(skip_nchw, (0, 2, 3, 1)).astype(jnp.float32)  # (N,H,W,out_c)
    N, Hs, Ws, in_c = x.shape
    _, H, W, out_c = skip.shape
    assert (H, W) == (2 * Hs, 2 * Ws) and in_c == 2 * out_c

    # ----- stage 1: transpose-conv phases + attention gate + concat -----
    S = Hs * Ws
    x_flat = x.reshape(N, S, in_c)
    # deinterleave the skip into the 4 output phases (t = dy*2 + dx); pure XLA layout
    skip_d = (skip.reshape(N, Hs, 2, Ws, 2, out_c)
              .transpose(0, 2, 4, 1, 3, 5).reshape(N, 4, S, out_c))

    wup = jnp.transpose(p["up_w"], (2, 3, 0, 1)).reshape(4, in_c, out_c)
    bup = p["up_b"].reshape(1, out_c)
    sg, bg = _fold_bn(p["wg_b"], p["wg_bn"])
    wg_m = p["wg_w"][:, :, 0, 0].T * sg[None, :]
    sx, bx = _fold_bn(p["wx_b"], p["wx_bn"])
    wx_m = p["wx_w"][:, :, 0, 0].T * sx[None, :]
    sp, bpsi = _fold_bn(p["psi_b"], p["psi_bn"])
    wpsi_m = p["psi_w"][:, :, 0, 0].T * sp[None, :]

    cat_d = _up_attn_call(x_flat, skip_d, wup, bup,
                          wg_m, bg.reshape(1, -1),
                          wx_m, bx.reshape(1, -1),
                          wpsi_m, bpsi.reshape(1, 1))

    # re-interleave phases -> (N, H, W, CP); cheap XLA layout plumbing
    cat = (cat_d.reshape(N, 2, 2, Hs, Ws, CP)
           .transpose(0, 3, 1, 4, 2, 5).reshape(N, H, W, CP))

    # ----- stage 2: fused conv_block -----
    s1, b1 = _fold_bn(p["c1_b"], p["c1_bn"])
    w1_m = _conv3_to_mat(p["c1_w"], s1, CP)
    b1_m = jnp.zeros((1, CP), jnp.float32).at[0, :out_c].set(b1)
    s2, b2 = _fold_bn(p["c2_b"], p["c2_bn"])
    w2_m = _conv3_to_mat(p["c2_w"], s2, CP)
    b2_m = jnp.zeros((1, CP), jnp.float32).at[0, :out_c].set(b2)

    th = 8 if (H % 8 == 0 and H >= 8) else H
    y_flat = _conv_block_call(cat, w1_m, b1_m, w2_m, b2_m, th)
    y = y_flat.reshape(N, H, W, CP)[:, :, :, :out_c]
    return jnp.transpose(y, (0, 3, 1, 2))  # -> NCHW


# --------------------------------------------------------------------------- #
# Plain-JAX reference (eval-mode BN), independent math path                    #
# --------------------------------------------------------------------------- #
def _bn_eval(t, bn, eps=1e-5):
    inv = bn["gamma"] / jnp.sqrt(bn["var"] + eps)
    return ((t - bn["mean"][None, :, None, None]) * inv[None, :, None, None]
            + bn["beta"][None, :, None, None])


def _reference_forward(x_nchw, skip_nchw, p):
    hi = lax.Precision.HIGHEST
    N, in_c, Hs, Ws = x_nchw.shape
    out_c = p["up_b"].shape[0]

    # ConvTranspose2d(k=2, s=2): out[n,o,2r+y,2c+x] = b[o] + sum_i x[n,i,r,c] W[i,o,y,x]
    u = jnp.einsum('nirc,ioyx->norycx', x_nchw, p["up_w"], precision=hi)
    up = u.reshape(N, out_c, 2 * Hs, 2 * Ws) + p["up_b"][None, :, None, None]
    skip = skip_nchw

    def conv1x1(t, w, b):
        return (jnp.einsum('nchw,oc->nohw', t, w[:, :, 0, 0], precision=hi)
                + b[None, :, None, None])

    g1 = _bn_eval(conv1x1(up, p["wg_w"], p["wg_b"]), p["wg_bn"])
    x1 = _bn_eval(conv1x1(skip, p["wx_w"], p["wx_b"]), p["wx_bn"])
    psi = jax.nn.sigmoid(_bn_eval(
        conv1x1(jnp.maximum(g1 + x1, 0.0), p["psi_w"], p["psi_b"]), p["psi_bn"]))
    attn = skip * psi
    cat = jnp.concatenate([up, attn], axis=1)

    def conv3(t, w, b):
        y = lax.conv_general_dilated(t, w, (1, 1), "SAME",
                                     dimension_numbers=("NCHW", "OIHW", "NCHW"),
                                     precision=hi)
        return y + b[None, :, None, None]

    y = jnp.maximum(_bn_eval(conv3(cat, p["c1_w"], p["c1_b"]), p["c1_bn"]), 0.0)
    y = jnp.maximum(_bn_eval(conv3(y, p["c2_w"], p["c2_b"]), p["c2_bn"]), 0.0)
    return y


def make_params(key, in_c, out_c):
    f_int = out_c // 2
    ks = iter(jax.random.split(key, 40))

    def nrm(shape, scale=0.1):
        return scale * jax.random.normal(next(ks), shape, jnp.float32)

    def bn_params(c):
        return {"gamma": 1.0 + nrm((c,)), "beta": nrm((c,)),
                "mean": nrm((c,)), "var": jnp.abs(1.0 + nrm((c,)))}

    return {
        "up_w": nrm((in_c, out_c, 2, 2)), "up_b": nrm((out_c,)),
        "wg_w": nrm((f_int, out_c, 1, 1)), "wg_b": nrm((f_int,)), "wg_bn": bn_params(f_int),
        "wx_w": nrm((f_int, out_c, 1, 1)), "wx_b": nrm((f_int,)), "wx_bn": bn_params(f_int),
        "psi_w": nrm((1, f_int, 1, 1)), "psi_b": nrm((1,)), "psi_bn": bn_params(1),
        "c1_w": nrm((out_c, in_c, 3, 3)), "c1_b": nrm((out_c,)), "c1_bn": bn_params(out_c),
        "c2_w": nrm((out_c, out_c, 3, 3)), "c2_b": nrm((out_c,)), "c2_bn": bn_params(out_c),
    }


if __name__ == "__main__":
    key = jax.random.PRNGKey(0)
    k_x, k_s, k_p = jax.random.split(key, 3)

    N, in_c, out_c = 2, 8, 4
    Hs = Ws = 8                       # low-res input spatial
    H, W = 2 * Hs, 2 * Ws             # skip / output spatial = 16

    x = jax.random.normal(k_x, (N, in_c, Hs, Ws), jnp.float32)     # NCHW like PyTorch
    skip = jax.random.normal(k_s, (N, out_c, H, W), jnp.float32)
    params = make_params(k_p, in_c, out_c)

    out = jax.jit(decoder_block_forward)(x, skip, params)
    out = jax.block_until_ready(out)

    ref = _reference_forward(x, skip, params)
    assert out.shape == (N, out_c, H, W)
    err = float(jnp.max(jnp.abs(out - ref)))
    assert err < 2e-3, f"mismatch vs reference: {err}"

    print("KERNEL_OK")
</pallas_src>

<mosaic_0001>
module attributes {stable_mosaic.version = 11 : i64} {
  func.func @_up_attn_kernel(%arg0: i32, %arg1: i32, %arg2: memref<1x64x8xf32, #tpu.memory_space<vmem>>, %arg3: memref<1x1x64x4xf32, #tpu.memory_space<vmem>>, %arg4: memref<1x8x4xf32, #tpu.memory_space<vmem>>, %arg5: memref<1x4xf32, #tpu.memory_space<vmem>>, %arg6: memref<4x2xf32, #tpu.memory_space<vmem>>, %arg7: memref<1x2xf32, #tpu.memory_space<vmem>>, %arg8: memref<4x2xf32, #tpu.memory_space<vmem>>, %arg9: memref<1x2xf32, #tpu.memory_space<vmem>>, %arg10: memref<2x1xf32, #tpu.memory_space<vmem>>, %arg11: memref<1x1xf32, #tpu.memory_space<vmem>>, %arg12: memref<1x1x64x128xf32, #tpu.memory_space<vmem>>) attributes {dimension_semantics = [#tpu.dimension_semantics<parallel>, #tpu.dimension_semantics<parallel>], iteration_bounds = array<i64: 2, 4>, scalar_prefetch = 0 : i64, scratch_operands = 0 : i64, tpu.core_type = #tpu.core_type<tc>, window_params = [{transform_indices = @transform_0, window_bounds = array<i64: 1, 64, 8>}, {transform_indices = @transform_1, window_bounds = array<i64: 1, 1, 64, 4>}, {transform_indices = @transform_2, window_bounds = array<i64: 1, 8, 4>}, {pipeline_mode = #tpu.pipeline_mode<synchronous>, transform_indices = @transform_3, window_bounds = array<i64: 1, 4>}, {pipeline_mode = #tpu.pipeline_mode<synchronous>, transform_indices = @transform_4, window_bounds = array<i64: 4, 2>}, {pipeline_mode = #tpu.pipeline_mode<synchronous>, transform_indices = @transform_5, window_bounds = array<i64: 1, 2>}, {pipeline_mode = #tpu.pipeline_mode<synchronous>, transform_indices = @transform_6, window_bounds = array<i64: 4, 2>}, {pipeline_mode = #tpu.pipeline_mode<synchronous>, transform_indices = @transform_7, window_bounds = array<i64: 1, 2>}, {pipeline_mode = #tpu.pipeline_mode<synchronous>, transform_indices = @transform_8, window_bounds = array<i64: 2, 1>}, {pipeline_mode = #tpu.pipeline_mode<synchronous>, transform_indices = @transform_9, window_bounds = array<i64: 1, 1>}, {transform_indices = @transform_10, window_bounds = array<i64: 1, 1, 64, 128>}]} {
    %c0 = arith.constant 0 : index
    %c0_0 = arith.constant 0 : index
    %c0_1 = arith.constant 0 : index
    %0 = vector.load %arg2[%c0, %c0_0, %c0_1] : memref<1x64x8xf32, #tpu.memory_space<vmem>>, vector<1x64x8xf32>
    %1 = vector.shape_cast %0 : vector<1x64x8xf32> to vector<64x8xf32>
    %c0_2 = arith.constant 0 : index
    %c0_3 = arith.constant 0 : index
    %c0_4 = arith.constant 0 : index
    %c0_5 = arith.constant 0 : index
    %2 = vector.load %arg3[%c0_2, %c0_3, %c0_4, %c0_5] : memref<1x1x64x4xf32, #tpu.memory_space<vmem>>, vector<1x1x64x4xf32>
    %3 = vector.shape_cast %2 : vector<1x1x64x4xf32> to vector<64x4xf32>
    %c0_6 = arith.constant 0 : index
    %c0_7 = arith.constant 0 : index
    %c0_8 = arith.constant 0 : index
    %4 = vector.load %arg4[%c0_6, %c0_7, %c0_8] : memref<1x8x4xf32, #tpu.memory_space<vmem>>, vector<1x8x4xf32>
    %5 = vector.shape_cast %4 : vector<1x8x4xf32> to vector<8x4xf32>
    %cst = arith.constant dense<0.000000e+00> : vector<64x4xf32>
    %6 = tpu.matmul %1, %5, %cst {dimension_numbers = #tpu.dot_dimension_numbers<[1], [0], [0], [1], [0, 0, 1, 1], [], []>} : vector<64x8xf32>, vector<8x4xf32>, vector<64x4xf32> -> vector<64x4xf32>
    %c0_9 = arith.constant 0 : index
    %c0_10 = arith.constant 0 : index
    %7 = vector.load %arg5[%c0_9, %c0_10] : memref<1x4xf32, #tpu.memory_space<vmem>>, vector<1x4xf32>
    %8 = vector.broadcast %7 : vector<1x4xf32> to vector<64x4xf32>
    %9 = arith.addf %6, %8 : vector<64x4xf32>
    %c0_11 = arith.constant 0 : index
    %c0_12 = arith.constant 0 : index
    %10 = vector.load %arg6[%c0_11, %c0_12] : memref<4x2xf32, #tpu.memory_space<vmem>>, vector<4x2xf32>
    %cst_13 = arith.constant dense<0.000000e+00> : vector<64x2xf32>
    %11 = tpu.matmul %9, %10, %cst_13 {dimension_numbers = #tpu.dot_dimension_numbers<[1], [0], [0], [1], [0, 0, 1, 1], [], []>} : vector<64x4xf32>, vector<4x2xf32>, vector<64x2xf32> -> vector<64x2xf32>
    %c0_14 = arith.constant 0 : index
    %c0_15 = arith.constant 0 : index
    %12 = vector.load %arg7[%c0_14, %c0_15] : memref<1x2xf32, #tpu.memory_space<vmem>>, vector<1x2xf32>
    %13 = vector.broadcast %12 : vector<1x2xf32> to vector<64x2xf32>
    %14 = arith.addf %11, %13 : vector<64x2xf32>
    %c0_16 = arith.constant 0 : index
    %c0_17 = arith.constant 0 : index
    %15 = vector.load %arg8[%c0_16, %c0_17] : memref<4x2xf32, #tpu.memory_space<vmem>>, vector<4x2xf32>
    %cst_18 = arith.constant dense<0.000000e+00> : vector<64x2xf32>
    %16 = tpu.matmul %3, %15, %cst_18 {dimension_numbers = #tpu.dot_dimension_numbers<[1], [0], [0], [1], [0, 0, 1, 1], [], []>} : vector<64x4xf32>, vector<4x2xf32>, vector<64x2xf32> -> vector<64x2xf32>
    %c0_19 = arith.constant 0 : index
    %c0_20 = arith.constant 0 : index
    %17 = vector.load %arg9[%c0_19, %c0_20] : memref<1x2xf32, #tpu.memory_space<vmem>>, vector<1x2xf32>
    %18 = vector.broadcast %17 : vector<1x2xf32> to vector<64x2xf32>
    %19 = arith.addf %16, %18 : vector<64x2xf32>
    %20 = arith.addf %14, %19 : vector<64x2xf32>
    %cst_21 = arith.constant 0.000000e+00 : f32
    %21 = vector.broadcast %cst_21 : f32 to vector<64x2xf32>
    %22 = arith.maximumf %20, %21 : vector<64x2xf32>
    %c0_22 = arith.constant 0 : index
    %c0_23 = arith.constant 0 : index
    %23 = vector.load %arg10[%c0_22, %c0_23] : memref<2x1xf32, #tpu.memory_space<vmem>>, vector<2x1xf32>
    %cst_24 = arith.constant dense<0.000000e+00> : vector<64x1xf32>
    %24 = tpu.matmul %22, %23, %cst_24 {dimension_numbers = #tpu.dot_dimension_numbers<[1], [0], [0], [1], [0, 0, 1, 1], [], []>} : vector<64x2xf32>, vector<2x1xf32>, vector<64x1xf32> -> vector<64x1xf32>
    %c0_25 = arith.constant 0 : index
    %c0_26 = arith.constant 0 : index
    %25 = vector.load %arg11[%c0_25, %c0_26] : memref<1x1xf32, #tpu.memory_space<vmem>>, vector<1x1xf32>
    %26 = vector.broadcast %25 : vector<1x1xf32> to vector<64x1xf32>
    %27 = arith.addf %24, %26 : vector<64x1xf32>
    %cst_27 = arith.constant 0.000000e+00 : f32
    %28 = vector.broadcast %cst_27 : f32 to vector<64x1xf32>
    %29 = arith.subf %28, %27 : vector<64x1xf32>
    %30 = math.exp %29 : vector<64x1xf32>
    %cst_28 = arith.constant 1.000000e+00 : f32
    %31 = vector.broadcast %cst_28 : f32 to vector<64x1xf32>
    %32 = arith.addf %31, %30 : vector<64x1xf32>
    %cst_29 = arith.constant 1.000000e+00 : f32
    %33 = vector.broadcast %cst_29 : f32 to vector<64x1xf32>
    %34 = arith.divf %33, %32 : vector<64x1xf32>
    %35 = vector.broadcast %34 : vector<64x1xf32> to vector<64x4xf32>
    %36 = arith.mulf %3, %35 : vector<64x4xf32>
    %cst_30 = arith.constant 0.000000e+00 : f32
    %37 = vector.broadcast %cst_30 : f32 to vector<64x120xf32>
    %38 = tpu.concatenate %9, %36, %37 in 1 : vector<64x4xf32>, vector<64x4xf32>, vector<64x120xf32> -> vector<64x128xf32>
    %c0_31 = arith.constant 0 : index
    %c0_32 = arith.constant 0 : index
    %c0_33 = arith.constant 0 : index
    %c0_34 = arith.constant 0 : index
    %39 = vector.load %arg12[%c0_31, %c0_32, %c0_33, %c0_34] : memref<1x1x64x128xf32, #tpu.memory_space<vmem>>, vector<1x1x64x128xf32>
    %40 = vector.shape_cast %39 : vector<1x1x64x128xf32> to vector<64x128xf32>
    %41 = vector.shape_cast %38 : vector<64x128xf32> to vector<1x1x64x128xf32>
    tpu.vector_store %arg12[%c0_31, %c0_32, %c0_33, %c0_34], %41 {strides = array<i32>} : memref<1x1x64x128xf32, #tpu.memory_space<vmem>>, vector<1x1x64x128xf32>,
    return
  }
  func.func @transform_0(%arg0: i32, %arg1: i32) -> (i32, i32, i32) {
    %c0_i32 = arith.constant 0 : i32
    %c0_i32_0 = arith.constant 0 : i32
    %c0_i32_1 = arith.constant 0 : i32
    return %arg0, %c0_i32, %c0_i32_0 : i32, i32, i32
  }
  func.func @transform_1(%arg0: i32, %arg1: i32) -> (i32, i32, i32, i32) {
    %c0_i32 = arith.constant 0 : i32
    %c0_i32_0 = arith.constant 0 : i32
    %c0_i32_1 = arith.constant 0 : i32
    return %arg0, %arg1, %c0_i32, %c0_i32_0 : i32, i32, i32, i32
  }
  func.func @transform_2(%arg0: i32, %arg1: i32) -> (i32, i32, i32) {
    %c0_i32 = arith.constant 0 : i32
    %c0_i32_0 = arith.constant 0 : i32
    %c0_i32_1 = arith.constant 0 : i32
    return %arg1, %c0_i32, %c0_i32_0 : i32, i32, i32
  }
  func.func @transform_3(%arg0: i32, %arg1: i32) -> (i32, i32) {
    %c0_i32 = arith.constant 0 : i32
    %c0_i32_0 = arith.constant 0 : i32
    %c0_i32_1 = arith.constant 0 : i32
    return %c0_i32, %c0_i32_0 : i32, i32
  }
  func.func @transform_4(%arg0: i32, %arg1: i32) -> (i32, i32) {
    %c0_i32 = arith.constant 0 : i32
    %c0_i32_0 = arith.constant 0 : i32
    %c0_i32_1 = arith.constant 0 : i32
    return %c0_i32, %c0_i32_0 : i32, i32
  }
  func.func @transform_5(%arg0: i32, %arg1: i32) -> (i32, i32) {
    %c0_i32 = arith.constant 0 : i32
    %c0_i32_0 = arith.constant 0 : i32
    %c0_i32_1 = arith.constant 0 : i32
    return %c0_i32, %c0_i32_0 : i32, i32
  }
  func.func @transform_6(%arg0: i32, %arg1: i32) -> (i32, i32) {
    %c0_i32 = arith.constant 0 : i32
    %c0_i32_0 = arith.constant 0 : i32
    %c0_i32_1 = arith.constant 0 : i32
    return %c0_i32, %c0_i32_0 : i32, i32
  }
  func.func @transform_7(%arg0: i32, %arg1: i32) -> (i32, i32) {
    %c0_i32 = arith.constant 0 : i32
    %c0_i32_0 = arith.constant 0 : i32
    %c0_i32_1 = arith.constant 0 : i32
    return %c0_i32, %c0_i32_0 : i32, i32
  }
  func.func @transform_8(%arg0: i32, %arg1: i32) -> (i32, i32) {
    %c0_i32 = arith.constant 0 : i32
    %c0_i32_0 = arith.constant 0 : i32
    %c0_i32_1 = arith.constant 0 : i32
    return %c0_i32, %c0_i32_0 : i32, i32
  }
  func.func @transform_9(%arg0: i32, %arg1: i32) -> (i32, i32) {
    %c0_i32 = arith.constant 0 : i32
    %c0_i32_0 = arith.constant 0 : i32
    %c0_i32_1 = arith.constant 0 : i32
    return %c0_i32, %c0_i32_0 : i32, i32
  }
  func.func @transform_10(%arg0: i32, %arg1: i32) -> (i32, i32, i32, i32) {
    %c0_i32 = arith.constant 0 : i32
    %c0_i32_0 = arith.constant 0 : i32
    %c0_i32_1 = arith.constant 0 : i32
    return %arg0, %arg1, %c0_i32, %c0_i32_0 : i32, i32, i32, i32
  }
}

module attributes {stable_mosaic.version = 11 : i64} {
  func.func @_conv_block_kernel(%arg0: i32, %arg1: i32, %arg2: memref<1x16x16x128xf32, #tpu.memory_space<vmem>>, %arg3: memref<1152x128xf32, #tpu.memory_space<vmem>>, %arg4: memref<1x128xf32, #tpu.memory_space<vmem>>, %arg5: memref<1152x128xf32, #tpu.memory_space<vmem>>, %arg6: memref<1x128xf32, #tpu.memory_space<vmem>>, %arg7: memref<1x128x128xf32, #tpu.memory_space<vmem>>, %arg8: memref<20x18x128xf32, #tpu.memory_space<vmem>>, %arg9: memref<10x18x128xf32, #tpu.memory_space<vmem>>) attributes {dimension_semantics = [#tpu.dimension_semantics<parallel>, #tpu.dimension_semantics<arbitrary>], iteration_bounds = array<i64: 2, 2>, scalar_prefetch = 0 : i64, scratch_operands = 2 : i64, tpu.core_type = #tpu.core_type<tc>, window_params = [{transform_indices = @transform_0, window_bounds = array<i64: 1, 16, 16, 128>}, {pipeline_mode = #tpu.pipeline_mode<synchronous>, transform_indices = @transform_1, window_bounds = array<i64: 1152, 128>}, {pipeline_mode = #tpu.pipeline_mode<synchronous>, transform_indices = @transform_2, window_bounds = array<i64: 1, 128>}, {pipeline_mode = #tpu.pipeline_mode<synchronous>, transform_indices = @transform_3, window_bounds = array<i64: 1152, 128>}, {pipeline_mode = #tpu.pipeline_mode<synchronous>, transform_indices = @transform_4, window_bounds = array<i64: 1, 128>}, {transform_indices = @transform_5, window_bounds = array<i64: 1, 128, 128>}]} {
    %c0_i32 = arith.constant 0 : i32
    %0 = arith.cmpi eq, %arg1, %c0_i32 : i32
    %1 = arith.extui %0 : i1 to i32
    %c0_i32_0 = arith.constant 0 : i32
    %2 = arith.cmpi ne, %1, %c0_i32_0 : i32
    scf.if %2 {
      %cst_90 = arith.constant 0.000000e+00 : f32
      %109 = vector.broadcast %cst_90 : f32 to vector<20x18x128xf32>
      %c0_91 = arith.constant 0 : index
      %c0_92 = arith.constant 0 : index
      %c0_93 = arith.constant 0 : index
      %110 = vector.load %arg8[%c0_91, %c0_92, %c0_93] : memref<20x18x128xf32, #tpu.memory_space<vmem>>, vector<20x18x128xf32>
      tpu.vector_store %arg8[%c0_91, %c0_92, %c0_93], %109 {strides = array<i32>} : memref<20x18x128xf32, #tpu.memory_space<vmem>>, vector<20x18x128xf32>,
      %c0_94 = arith.constant 0 : index
      %c0_95 = arith.constant 0 : index
      %c0_96 = arith.constant 0 : index
      %c0_97 = arith.constant 0 : index
      %111 = vector.load %arg2[%c0_94, %c0_95, %c0_96, %c0_97] : memref<1x16x16x128xf32, #tpu.memory_space<vmem>>, vector<1x16x16x128xf32>
      %112 = vector.shape_cast %111 : vector<1x16x16x128xf32> to vector<16x16x128xf32>
      %c2_98 = arith.constant 2 : index
      %c1_99 = arith.constant 1 : index
      %c0_100 = arith.constant 0 : index
      %113 = vector.load %arg8[%c2_98, %c1_99, %c0_100] : memref<20x18x128xf32, #tpu.memory_space<vmem>>, vector<16x16x128xf32>
      tpu.vector_store %arg8[%c2_98, %c1_99, %c0_100], %112 {strides = array<i32>} : memref<20x18x128xf32, #tpu.memory_space<vmem>>, vector<16x16x128xf32>,
    } else {
    }
    %c8_i32 = arith.constant 8 : i32
    %3 = arith.muli %arg1, %c8_i32 : i32
    %cst = arith.constant 0.000000e+00 : f32
    %4 = vector.broadcast %cst : f32 to vector<160x128xf32>
    %c0_i32_1 = arith.constant 0 : i32
    %5 = arith.addi %3, %c0_i32_1 : i32
    %6 = arith.index_cast %5 : i32 to index
    %c0 = arith.constant 0 : index
    %c0_2 = arith.constant 0 : index
    %7 = vector.load %arg8[%6, %c0, %c0_2] : memref<20x18x128xf32, #tpu.memory_space<vmem>>, vector<10x16x128xf32>
    %8 = vector.shape_cast %7 : vector<10x16x128xf32> to vector<160x128xf32>
    %c0_i32_3 = arith.constant 0 : i32
    %9 = arith.addi %3, %c0_i32_3 : i32
    %10 = arith.index_cast %9 : i32 to index
    %c1 = arith.constant 1 : index
    %c0_4 = arith.constant 0 : index
    %11 = vector.load %arg8[%10, %c1, %c0_4] : memref<20x18x128xf32, #tpu.memory_space<vmem>>, vector<10x16x128xf32>
    %12 = vector.shape_cast %11 : vector<10x16x128xf32> to vector<160x128xf32>
    %c0_i32_5 = arith.constant 0 : i32
    %13 = arith.addi %3, %c0_i32_5 : i32
    %14 = arith.index_cast %13 : i32 to index
    %c2 = arith.constant 2 : index
    %c0_6 = arith.constant 0 : index
    %15 = vector.load %arg8[%14, %c2, %c0_6] : memref<20x18x128xf32, #tpu.memory_space<vmem>>, vector<10x16x128xf32>
    %16 = vector.shape_cast %15 : vector<10x16x128xf32> to vector<160x128xf32>
    %17 = tpu.concatenate %8, %12, %16 in 1 : vector<160x128xf32>, vector<160x128xf32>, vector<160x128xf32> -> vector<160x384xf32>
    %c0_7 = arith.constant 0 : index
    %c0_8 = arith.constant 0 : index
    %18 = vector.load %arg3[%c0_7, %c0_8] : memref<1152x128xf32, #tpu.memory_space<vmem>>, vector<384x128xf32>
    %cst_9 = arith.constant dense<0.000000e+00> : vector<160x128xf32>
    %19 = tpu.matmul %17, %18, %cst_9 {dimension_numbers = #tpu.dot_dimension_numbers<[1], [0], [0], [1], [0, 0, 1, 1], [], []>} : vector<160x384xf32>, vector<384x128xf32>, vector<160x128xf32> -> vector<160x128xf32>
    %20 = arith.addf %4, %19 : vector<160x128xf32>
    %c1_i32 = arith.constant 1 : i32
    %21 = arith.addi %3, %c1_i32 : i32
    %22 = arith.index_cast %21 : i32 to index
    %c0_10 = arith.constant 0 : index
    %c0_11 = arith.constant 0 : index
    %23 = vector.load %arg8[%22, %c0_10, %c0_11] : memref<20x18x128xf32, #tpu.memory_space<vmem>>, vector<10x16x128xf32>
    %24 = vector.shape_cast %23 : vector<10x16x128xf32> to vector<160x128xf32>
    %c1_i32_12 = arith.constant 1 : i32
    %25 = arith.addi %3, %c1_i32_12 : i32
    %26 = arith.index_cast %25 : i32 to index
    %c1_13 = arith.constant 1 : index
    %c0_14 = arith.constant 0 : index
    %27 = vector.load %arg8[%26, %c1_13, %c0_14] : memref<20x18x128xf32, #tpu.memory_space<vmem>>, vector<10x16x128xf32>
    %28 = vector.shape_cast %27 : vector<10x16x128xf32> to vector<160x128xf32>
    %c1_i32_15 = arith.constant 1 : i32
    %29 = arith.addi %3, %c1_i32_15 : i32
    %30 = arith.index_cast %29 : i32 to index
    %c2_16 = arith.constant 2 : index
    %c0_17 = arith.constant 0 : index
    %31 = vector.load %arg8[%30, %c2_16, %c0_17] : memref<20x18x128xf32, #tpu.memory_space<vmem>>, vector<10x16x128xf32>
    %32 = vector.shape_cast %31 : vector<10x16x128xf32> to vector<160x128xf32>
    %33 = tpu.concatenate %24, %28, %32 in 1 : vector<160x128xf32>, vector<160x128xf32>, vector<160x128xf32> -> vector<160x384xf32>
    %c384 = arith.constant 384 : index
    %c0_18 = arith.constant 0 : index
    %34 = vector.load %arg3[%c384, %c0_18] : memref<1152x128xf32, #tpu.memory_space<vmem>>, vector<384x128xf32>
    %cst_19 = arith.constant dense<0.000000e+00> : vector<160x128xf32>
    %35 = tpu.matmul %33, %34, %cst_19 {dimension_numbers = #tpu.dot_dimension_numbers<[1], [0], [0], [1], [0, 0, 1, 1], [], []>} : vector<160x384xf32>, vector<384x128xf32>, vector<160x128xf32> -> vector<160x128xf32>
    %36 = arith.addf %20, %35 : vector<160x128xf32>
    %c2_i32 = arith.constant 2 : i32
    %37 = arith.addi %3, %c2_i32 : i32
    %38 = arith.index_cast %37 : i32 to index
    %c0_20 = arith.constant 0 : index
    %c0_21 = arith.constant 0 : index
    %39 = vector.load %arg8[%38, %c0_20, %c0_21] : memref<20x18x128xf32, #tpu.memory_space<vmem>>, vector<10x16x128xf32>
    %40 = vector.shape_cast %39 : vector<10x16x128xf32> to vector<160x128xf32>
    %c2_i32_22 = arith.constant 2 : i32
    %41 = arith.addi %3, %c2_i32_22 : i32
    %42 = arith.index_cast %41 : i32 to index
    %c1_23 = arith.constant 1 : index
    %c0_24 = arith.constant 0 : index
    %43 = vector.load %arg8[%42, %c1_23, %c0_24] : memref<20x18x128xf32, #tpu.memory_space<vmem>>, vector<10x16x128xf32>
    %44 = vector.shape_cast %43 : vector<10x16x128xf32> to vector<160x128xf32>
    %c2_i32_25 = arith.constant 2 : i32
    %45 = arith.addi %3, %c2_i32_25 : i32
    %46 = arith.index_cast %45 : i32 to index
    %c2_26 = arith.constant 2 : index
    %c0_27 = arith.constant 0 : index
    %47 = vector.load %arg8[%46, %c2_26, %c0_27] : memref<20x18x128xf32, #tpu.memory_space<vmem>>, vector<10x16x128xf32>
    %48 = vector.shape_cast %47 : vector<10x16x128xf32> to vector<160x128xf32>
    %49 = tpu.concatenate %40, %44, %48 in 1 : vector<160x128xf32>, vector<160x128xf32>, vector<160x128xf32> -> vector<160x384xf32>
    %c768 = arith.constant 768 : index
    %c0_28 = arith.constant 0 : index
    %50 = vector.load %arg3[%c768, %c0_28] : memref<1152x128xf32, #tpu.memory_space<vmem>>, vector<384x128xf32>
    %cst_29 = arith.constant dense<0.000000e+00> : vector<160x128xf32>
    %51 = tpu.matmul %49, %50, %cst_29 {dimension_numbers = #tpu.dot_dimension_numbers<[1], [0], [0], [1], [0, 0, 1, 1], [], []>} : vector<160x384xf32>, vector<384x128xf32>, vector<160x128xf32> -> vector<160x128xf32>
    %52 = arith.addf %36, %51 : vector<160x128xf32>
    %c0_30 = arith.constant 0 : index
    %c0_31 = arith.constant 0 : index
    %53 = vector.load %arg4[%c0_30, %c0_31] : memref<1x128xf32, #tpu.memory_space<vmem>>, vector<1x128xf32>
    %54 = vector.broadcast %53 : vector<1x128xf32> to vector<160x128xf32>
    %55 = arith.addf %52, %54 : vector<160x128xf32>
    %cst_32 = arith.constant 0.000000e+00 : f32
    %56 = vector.broadcast %cst_32 : f32 to vector<160x128xf32>
    %57 = arith.maximumf %55, %56 : vector<160x128xf32>
    %58 = vector.shape_cast %57 : vector<160x128xf32> to vector<10x16x128xf32>
    %cst_33 = arith.constant 0.000000e+00 : f32
    %59 = vector.broadcast %cst_33 : f32 to vector<10x1x128xf32>
    %c0_34 = arith.constant 0 : index
    %c0_35 = arith.constant 0 : index
    %c0_36 = arith.constant 0 : index
    %60 = vector.load %arg9[%c0_34, %c0_35, %c0_36] : memref<10x18x128xf32, #tpu.memory_space<vmem>>, vector<10x1x128xf32>
    tpu.vector_store %arg9[%c0_34, %c0_35, %c0_36], %59 {strides = array<i32>} : memref<10x18x128xf32, #tpu.memory_space<vmem>>, vector<10x1x128xf32>,
    %cst_37 = arith.constant 0.000000e+00 : f32
    %61 = vector.broadcast %cst_37 : f32 to vector<10x1x128xf32>
    %c0_38 = arith.constant 0 : index
    %c17 = arith.constant 17 : index
    %c0_39 = arith.constant 0 : index
    %62 = vector.load %arg9[%c0_38, %c17, %c0_39] : memref<10x18x128xf32, #tpu.memory_space<vmem>>, vector<10x1x128xf32>
    tpu.vector_store %arg9[%c0_38, %c17, %c0_39], %61 {strides = array<i32>} : memref<10x18x128xf32, #tpu.memory_space<vmem>>, vector<10x1x128xf32>,
    %c0_40 = arith.constant 0 : index
    %c1_41 = arith.constant 1 : index
    %c0_42 = arith.constant 0 : index
    %63 = vector.load %arg9[%c0_40, %c1_41, %c0_42] : memref<10x18x128xf32, #tpu.memory_space<vmem>>, vector<10x16x128xf32>
    tpu.vector_store %arg9[%c0_40, %c1_41, %c0_42], %58 {strides = array<i32>} : memref<10x18x128xf32, #tpu.memory_space<vmem>>, vector<10x16x128xf32>,
    %c0_i32_43 = arith.constant 0 : i32
    %64 = arith.cmpi eq, %arg1, %c0_i32_43 : i32
    %65 = arith.extui %64 : i1 to i32
    %c0_i32_44 = arith.constant 0 : i32
    %66 = arith.cmpi ne, %65, %c0_i32_44 : i32
    scf.if %66 {
      %cst_90 = arith.constant 0.000000e+00 : f32
      %109 = vector.broadcast %cst_90 : f32 to vector<1x18x128xf32>
      %c0_91 = arith.constant 0 : index
      %c0_92 = arith.constant 0 : index
      %c0_93 = arith.constant 0 : index
      %110 = vector.load %arg9[%c0_91, %c0_92, %c0_93] : memref<10x18x128xf32, #tpu.memory_space<vmem>>, vector<1x18x128xf32>
      tpu.vector_store %arg9[%c0_91, %c0_92, %c0_93], %109 {strides = array<i32>} : memref<10x18x128xf32, #tpu.memory_space<vmem>>, vector<1x18x128xf32>,
    } else {
    }
    %c1_i32_45 = arith.constant 1 : i32
    %67 = arith.cmpi eq, %arg1, %c1_i32_45 : i32
    %68 = arith.extui %67 : i1 to i32
    %c0_i32_46 = arith.constant 0 : i32
    %69 = arith.cmpi ne, %68, %c0_i32_46 : i32
    scf.if %69 {
      %cst_90 = arith.constant 0.000000e+00 : f32
      %109 = vector.broadcast %cst_90 : f32 to vector<1x18x128xf32>
      %c9 = arith.constant 9 : index
      %c0_91 = arith.constant 0 : index
      %c0_92 = arith.constant 0 : index
      %110 = vector.load %arg9[%c9, %c0_91, %c0_92] : memref<10x18x128xf32, #tpu.memory_space<vmem>>, vector<1x18x128xf32>
      tpu.vector_store %arg9[%c9, %c0_91, %c0_92], %109 {strides = array<i32>} : memref<10x18x128xf32, #tpu.memory_space<vmem>>, vector<1x18x128xf32>,
    } else {
    }
    %cst_47 = arith.constant 0.000000e+00 : f32
    %70 = vector.broadcast %cst_47 : f32 to vector<128x128xf32>
    %c0_48 = arith.constant 0 : index
    %c0_49 = arith.constant 0 : index
    %c0_50 = arith.constant 0 : index
    %71 = vector.load %arg9[%c0_48, %c0_49, %c0_50] : memref<10x18x128xf32, #tpu.memory_space<vmem>>, vector<8x16x128xf32>
    %72 = vector.shape_cast %71 : vector<8x16x128xf32> to vector<128x128xf32>
    %c0_51 = arith.constant 0 : index
    %c1_52 = arith.constant 1 : index
    %c0_53 = arith.constant 0 : index
    %73 = vector.load %arg9[%c0_51, %c1_52, %c0_53] : memref<10x18x128xf32, #tpu.memory_space<vmem>>, vector<8x16x128xf32>
    %74 = vector.shape_cast %73 : vector<8x16x128xf32> to vector<128x128xf32>
    %c0_54 = arith.constant 0 : index
    %c2_55 = arith.constant 2 : index
    %c0_56 = arith.constant 0 : index
    %75 = vector.load %arg9[%c0_54, %c2_55, %c0_56] : memref<10x18x128xf32, #tpu.memory_space<vmem>>, vector<8x16x128xf32>
    %76 = vector.shape_cast %75 : vector<8x16x128xf32> to vector<128x128xf32>
    %77 = tpu.concatenate %72, %74, %76 in 1 : vector<128x128xf32>, vector<128x128xf32>, vector<128x128xf32> -> vector<128x384xf32>
    %c0_57 = arith.constant 0 : index
    %c0_58 = arith.constant 0 : index
    %78 = vector.load %arg5[%c0_57, %c0_58] : memref<1152x128xf32, #tpu.memory_space<vmem>>, vector<384x128xf32>
    %cst_59 = arith.constant dense<0.000000e+00> : vector<128x128xf32>
    %79 = tpu.matmul %77, %78, %cst_59 {dimension_numbers = #tpu.dot_dimension_numbers<[1], [0], [0], [1], [0, 0, 1, 1], [], []>} : vector<128x384xf32>, vector<384x128xf32>, vector<128x128xf32> -> vector<128x128xf32>
    %80 = arith.addf %70, %79 : vector<128x128xf32>
    %c1_60 = arith.constant 1 : index
    %c0_61 = arith.constant 0 : index
    %c0_62 = arith.constant 0 : index
    %81 = vector.load %arg9[%c1_60, %c0_61, %c0_62] : memref<10x18x128xf32, #tpu.memory_space<vmem>>, vector<8x16x128xf32>
    %82 = vector.shape_cast %81 : vector<8x16x128xf32> to vector<128x128xf32>
    %c1_63 = arith.constant 1 : index
    %c1_64 = arith.constant 1 : index
    %c0_65 = arith.constant 0 : index
    %83 = vector.load %arg9[%c1_63, %c1_64, %c0_65] : memref<10x18x128xf32, #tpu.memory_space<vmem>>, vector<8x16x128xf32>
    %84 = vector.shape_cast %83 : vector<8x16x128xf32> to vector<128x128xf32>
    %c1_66 = arith.constant 1 : index
    %c2_67 = arith.constant 2 : index
    %c0_68 = arith.constant 0 : index
    %85 = vector.load %arg9[%c1_66, %c2_67, %c0_68] : memref<10x18x128xf32, #tpu.memory_space<vmem>>, vector<8x16x128xf32>
    %86 = vector.shape_cast %85 : vector<8x16x128xf32> to vector<128x128xf32>
    %87 = tpu.concatenate %82, %84, %86 in 1 : vector<128x128xf32>, vector<128x128xf32>, vector<128x128xf32> -> vector<128x384xf32>
    %c384_69 = arith.constant 384 : index
    %c0_70 = arith.constant 0 : index
    %88 = vector.load %arg5[%c384_69, %c0_70] : memref<1152x128xf32, #tpu.memory_space<vmem>>, vector<384x128xf32>
    %cst_71 = arith.constant dense<0.000000e+00> : vector<128x128xf32>
    %89 = tpu.matmul %87, %88, %cst_71 {dimension_numbers = #tpu.dot_dimension_numbers<[1], [0], [0], [1], [0, 0, 1, 1], [], []>} : vector<128x384xf32>, vector<384x128xf32>, vector<128x128xf32> -> vector<128x128xf32>
    %90 = arith.addf %80, %89 : vector<128x128xf32>
    %c2_72 = arith.constant 2 : index
    %c0_73 = arith.constant 0 : index
    %c0_74 = arith.constant 0 : index
    %91 = vector.load %arg9[%c2_72, %c0_73, %c0_74] : memref<10x18x128xf32, #tpu.memory_space<vmem>>, vector<8x16x128xf32>
    %92 = vector.shape_cast %91 : vector<8x16x128xf32> to vector<128x128xf32>
    %c2_75 = arith.constant 2 : index
    %c1_76 = arith.constant 1 : index
    %c0_77 = arith.constant 0 : index
    %93 = vector.load %arg9[%c2_75, %c1_76, %c0_77] : memref<10x18x128xf32, #tpu.memory_space<vmem>>, vector<8x16x128xf32>
    %94 = vector.shape_cast %93 : vector<8x16x128xf32> to vector<128x128xf32>
    %c2_78 = arith.constant 2 : index
    %c2_79 = arith.constant 2 : index
    %c0_80 = arith.constant 0 : index
    %95 = vector.load %arg9[%c2_78, %c2_79, %c0_80] : memref<10x18x128xf32, #tpu.memory_space<vmem>>, vector<8x16x128xf32>
    %96 = vector.shape_cast %95 : vector<8x16x128xf32> to vector<128x128xf32>
    %97 = tpu.concatenate %92, %94, %96 in 1 : vector<128x128xf32>, vector<128x128xf32>, vector<128x128xf32> -> vector<128x384xf32>
    %c768_81 = arith.constant 768 : index
    %c0_82 = arith.constant 0 : index
    %98 = vector.load %arg5[%c768_81, %c0_82] : memref<1152x128xf32, #tpu.memory_space<vmem>>, vector<384x128xf32>
    %cst_83 = arith.constant dense<0.000000e+00> : vector<128x128xf32>
    %99 = tpu.matmul %97, %98, %cst_83 {dimension_numbers = #tpu.dot_dimension_numbers<[1], [0], [0], [1], [0, 0, 1, 1], [], []>} : vector<128x384xf32>, vector<384x128xf32>, vector<128x128xf32> -> vector<128x128xf32>
    %100 = arith.addf %90, %99 : vector<128x128xf32>
    %c0_84 = arith.constant 0 : index
    %c0_85 = arith.constant 0 : index
    %101 = vector.load %arg6[%c0_84, %c0_85] : memref<1x128xf32, #tpu.memory_space<vmem>>, vector<1x128xf32>
    %102 = vector.broadcast %101 : vector<1x128xf32> to vector<128x128xf32>
    %103 = arith.addf %100, %102 : vector<128x128xf32>
    %cst_86 = arith.constant 0.000000e+00 : f32
    %104 = vector.broadcast %cst_86 : f32 to vector<128x128xf32>
    %105 = arith.maximumf %103, %104 : vector<128x128xf32>
    %c0_87 = arith.constant 0 : index
    %c0_88 = arith.constant 0 : index
    %c0_89 = arith.constant 0 : index
    %106 = vector.load %arg7[%c0_87, %c0_88, %c0_89] : memref<1x128x128xf32, #tpu.memory_space<vmem>>, vector<1x128x128xf32>
    %107 = vector.shape_cast %106 : vector<1x128x128xf32> to vector<128x128xf32>
    %108 = vector.shape_cast %105 : vector<128x128xf32> to vector<1x128x128xf32>
    tpu.vector_store %arg7[%c0_87, %c0_88, %c0_89], %108 {strides = array<i32>} : memref<1x128x128xf32, #tpu.memory_space<vmem>>, vector<1x128x128xf32>,
    return
  }
  func.func @transform_0(%arg0: i32, %arg1: i32) -> (i32, i32, i32, i32) {
    %c0_i32 = arith.constant 0 : i32
    %c0_i32_0 = arith.constant 0 : i32
    %c0_i32_1 = arith.constant 0 : i32
    %c0_i32_2 = arith.constant 0 : i32
    return %arg0, %c0_i32, %c0_i32_0, %c0_i32_1 : i32, i32, i32, i32
  }
  func.func @transform_1(%arg0: i32, %arg1: i32) -> (i32, i32) {
    %c0_i32 = arith.constant 0 : i32
    %c0_i32_0 = arith.constant 0 : i32
    %c0_i32_1 = arith.constant 0 : i32
    return %c0_i32, %c0_i32_0 : i32, i32
  }
  func.func @transform_2(%arg0: i32, %arg1: i32) -> (i32, i32) {
    %c0_i32 = arith.constant 0 : i32
    %c0_i32_0 = arith.constant 0 : i32
    %c0_i32_1 = arith.constant 0 : i32
    return %c0_i32, %c0_i32_0 : i32, i32
  }
  func.func @transform_3(%arg0: i32, %arg1: i32) -> (i32, i32) {
    %c0_i32 = arith.constant 0 : i32
    %c0_i32_0 = arith.constant 0 : i32
    %c0_i32_1 = arith.constant 0 : i32
    return %c0_i32, %c0_i32_0 : i32, i32
  }
  func.func @transform_4(%arg0: i32, %arg1: i32) -> (i32, i32) {
    %c0_i32 = arith.constant 0 : i32
    %c0_i32_0 = arith.constant 0 : i32
    %c0_i32_1 = arith.constant 0 : i32
    return %c0_i32, %c0_i32_0 : i32, i32
  }
  func.func @transform_5(%arg0: i32, %arg1: i32) -> (i32, i32, i32) {
    %c0_i32 = arith.constant 0 : i32
    %c0_i32_0 = arith.constant 0 : i32
    return %arg0, %arg1, %c0_i32 : i32, i32, i32
  }
}

</mosaic_0001>

<bundles_post_ra>
// kernel: decoder_block_forward.2
= control target key start
LH: loop header
LB: loop body
LE: loop exit
PB: predicated region body
PF: predicated region fallthrough
CT: control target
= control target key end

     0   :  { %s1648_s15 = smov 0   ;;  %s1650_s16 = smov 0   ;;  %s1856_s0 = inlined_call_operand.vmem [shape: f32[2,64,8], index: 0, kind: input, shape index: {}]   ;;  %s1857_s1 = inlined_call_operand.vmem [shape: f32[2,4,64,4], index: 1, kind: input, shape index: {}]   ;;  %s1858_s2 = inlined_call_operand.vmem [shape: f32[4,8,4], index: 2, kind: input, shape index: {}]   ;;  %s1859_s3 = inlined_call_operand.vmem [shape: f32[1,4], index: 3, kind: input, shape index: {}]   ;;  %s1860_s4 = inlined_call_operand.vmem [shape: f32[4,2], index: 4, kind: input, shape index: {}]   ;;  %s1861_s5 = inlined_call_operand.vmem [shape: f32[1,2], index: 5, kind: input, shape index: {}]   ;;  %s1862_s6 = inlined_call_operand.vmem [shape: f32[4,2], index: 6, kind: input, shape index: {}]   ;;  %s1863_s7 = inlined_call_operand.vmem [shape: f32[1,2], index: 7, kind: input, shape index: {}]   ;;  %s1864_s8 = inlined_call_operand.vmem [shape: f32[2,1], index: 8, kind: input, shape index: {}]   ;;  %s1865_s9 = inlined_call_operand.<no memory space> [shape: f32[1,1], index: 9, kind: input, shape index: {}]   ;;  %s1866_s10 = inlined_call_operand.vmem [shape: f32[2,4,64,128], index: 10, kind: output, shape index: {}]  }
   0x1   :  { %v15_v0 = vstv %s1865_s9  ;;  %s1652_s17 = smov 0   ;;  %s1654_s18 = smov 0  }
   0x2   :  { %16 = vst [vmem:[#allocation2] sm:$0x1] %v15_v0  ;;  %s1656_s19 = smov 0  }
   0x3 LB: > { %s31_s9 = sadd.s32 1, %s1578_s17  ;;  %s34_s20 = sadd.s32 1, %s1582_s18  ;;  %s1586_s19 = sphi %s1656_s19, %s22_s19   ;;  %s1582_s18 = sphi %s1654_s18, %s1870_s18   ;;  %s1578_s17 = sphi %s1652_s17, %s1869_s17   ;;  %s1574_s16 = sphi %s1650_s16, %s1868_s16   ;;  %s1570_s15 = sphi %s1648_s15, %s1867_s15  }
   0x4   : > { %p32_p0 = scmp.ge.s32.totalorder %s31_s9, 4  ;;  %p1304_p1 = scmp.ge.s32.totalorder %s1586_s19, 1 }
   0x5   : > { %p353_p2 = scmp.lt.s32.totalorder %s1586_s19, 9 }
   0x6   : > { %s1872_s9 = smov (%p32_p0, %s31_s9), 0  ;;  %s1874_s20 = smov (!%p32_p0, %s34_s20), %s1582_s18 }
   0x7   : > { %p354_p3 = pnand %p1304_p1, %p353_p2  ;;  %p36_p4 = scmp.ge.s32.totalorder %s1874_s20, 2 }
   0x8   : > { %p408_p5 = scmp.lt.s32.totalorder (!%p354_p3), %s1574_s16, 1  ;;  %p415_p6 = scmp.lt.s32.totalorder (!%p354_p3), %s1570_s15, 3  ;;  %vm459_vm0 = vcmask (!%p354_p3), 64512   ;;  %v589_v10 = vld [vmem:[%s1860_s4] sm:$0xf] (!%p354_p3)  ;;  %vm622_vm1 = vcmask (!%p354_p3), 1043456  }
   0x9   : > { %s1876_s20 = smov (%p36_p4, %s1874_s20), 0  ;;  %357 = sbr.rel (%p354_p3) target bundleno = 981 (0x3d5), region = 60 }
   0xa   : > { %1406 = vmatprep.subr.msk.mxu1 (!%p354_p3), %vm622_vm1, %v589_v10  ;;  %v731_v11 = vld [vmem:[%s1862_s6] sm:$0xf] (!%p354_p3)  ;;  %vm920_vm2 = vcmask (!%p354_p3), 1041408   ;;  %vm597_vm3 = vcmask (!%p354_p3), 31744   ;;  %vm895_vm4 = vcmask (!%p354_p3), 15360   ;;  %s1589_s12 = smov (!%p354_p3), 4  }
   0xb   : > { %1407 = vmatpush3.msk.msra.mxu1 (!%p354_p3), %vm622_vm1, %v589_v10  ;;  %v887_v12 = vld [vmem:[%s1864_s8] sm:$0x3] (!%p354_p3) }
   0xc   : > { %1420 = vmatprep.subr.msk.mxu1 (!%p354_p3), %vm622_vm1, %v731_v11  ;;  %v1314_v13 = vld [vmem:[%s1859_s3] ss:$0 sm:$0xff] (!%p354_p3) }
   0xd   : > { %v1323_v38 = vld [vmem:[%s1861_s5] ss:$0 sm:$0xff] (!%p354_p3) }
   0xe   : > { %v1333_v39 = vld [vmem:[%s1863_s7] ss:$0 sm:$0xff] (!%p354_p3) }
   0xf   : > { %v1454_v43 = vadd.f32 (!%p354_p3), %v1333_v39, %v1323_v38 }
  0x10   : > { %s1878_s16 = smov (!%p408_p5, %s1574_s16), 1  ;;  %s1880_s15 = smov (!%p415_p6, %s1570_s15), 3 }
  0x11   : > { %s1355_s21 = sshll.u32 %s1878_s16, 6  ;;  %s1308_s22 = sshll.u32 %s1878_s16, 5 }
  0x12   : > { %s412_s25 = scalar_lea.vmem %s1856_s0, %s1355_s21  ;;  %s1307_s26 = sshll.u32 %s1880_s15, 3 }
  0x13   : > { %s1681_s27 = sadd.s32 %s1308_s22, %s1307_s26  ;;  %s425_s30 = scalar_lea.vmem %s1858_s2, %s1307_s26  ;;  %v435_v1 = vld [vmem:[%s412_s25] sm:$0xff]  ;;  %v436_v3 = vld [vmem:[%s412_s25 + $0x8] sm:$0xff]  ;;  %v437_v4 = vld [vmem:[%s412_s25 + $0x10] sm:$0xff] }
  0x14   : > { %v451_v2 = vld [vmem:[%s425_s30] sm:$0xff]  ;;  %1394 = vmatprep.mubr.msk.f32.mxu0 %vm459_vm0, %v435_v1  ;;  %v438_v5 = vld [vmem:[%s412_s25 + $0x18] sm:$0xff]  ;;  %v440_v7 = vld [vmem:[%s412_s25 + $0x28] sm:$0xff]  ;;  %s1309_s23 = sshll.u32 %s1681_s27, 3 }
  0x15   : > { %1392 = vmatprep.subr.mxu0 %v451_v2  ;;  %v439_v6 = vld [vmem:[%s412_s25 + $0x20] sm:$0xff]  ;;  %v441_v8 = vld [vmem:[%s412_s25 + $0x30] sm:$0xff]  ;;  %v442_v9 = vld [vmem:[%s412_s25 + $0x38] sm:$0xff]  ;;  %s421_s26 = scalar_lea.vmem %s1857_s1, %s1309_s23  ;;  %s1807_s15 = scalar_lea.vmem %s1866_s10, %s1309_s23 }
  0x16   : > { %1393 = vmatpush3.msra.mxu0 %v451_v2  ;;  %v1744_v30 = vld [vmem:[%s421_s26] sm:$0xff]  ;;  %v1752_v31 = vld [vmem:[%s421_s26 + $0x8] sm:$0xff]  ;;  %v1754_v32 = vld [vmem:[%s421_s26 + $0x10] sm:$0xff] }
  0x17   : > { %1395 = vmatmul.mubr.msk.f32.vlgmr.msra.gmra.mrb[0].mxu0 %vm459_vm0, %v436_v3  ;;  %1434 = vmatprep.subr.msk.mxu0 %vm920_vm2, %v887_v12  ;;  %v1760_v33 = vld [vmem:[%s421_s26 + $0x18] sm:$0xff]  ;;  %v1762_v34 = vld [vmem:[%s421_s26 + $0x20] sm:$0xff]  ;;  %v1768_v35 = vld [vmem:[%s421_s26 + $0x28] sm:$0xff]  ;;  %v1588_v3 = vmov 0  }
  0x18   : > { %1397 = vmatprep.mubr.msk.f32.mxu0 %vm459_vm0, %v437_v4  ;;  %1435 = vmatpush3.msk.msra.mxu0 %vm920_vm2, %v887_v12  ;;  %v1770_v36 = vld [vmem:[%s421_s26 + $0x30] sm:$0xff]  ;;  %v1776_v37 = vld [vmem:[%s421_s26 + $0x38] sm:$0xff]  ;;  %v1343_v4 = vld [vmem:[#allocation2] ss:$0 sm:$0xff] }
  0x19   : > { %1514 = vset.pattern.permute.xlu0 %v1588_v3  ;;  %1515 = vset.pattern.permute.xlu1 %v1588_v3 }
  0x1b   : > { %1398 = vmatmul.mubr.msk.f32.gmra.mrb[2].mxu0 %vm459_vm0, %v438_v5 }
  0x1c   : > { %1400 = vmatprep.mubr.msk.f32.mxu0 %vm459_vm0, %v439_v6 }
  0x1f   : > { %1401 = vmatmul.mubr.msk.f32.gmra.mrb[4].mxu0 %vm459_vm0, %v440_v7 }
  0x20   : > { %1403 = vmatprep.mubr.msk.f32.mxu0 %vm459_vm0, %v441_v8 }
  0x23   : > { %1404 = vmatmul.mubr.msk.f32.gmra.mrb[6].mxu0 %vm459_vm0, %v442_v9 }
  0xea   : > { %v1396_v14 = vpop.f32.mrb[0].mxu0 }
  0xeb   : > { %v550_v15 = vpop.f32.mrb[1].mxu0  ;;  %v1711_v17 = vadd.f32 %v1396_v14, %v1314_v13 }
  0xec   : > { %v1709_v16 = vadd.f32 %v1314_v13, %v550_v15 }
  0xee   : > { %v1399_v18 = vpop.f32.mrb[2].mxu0  ;;  %1408 = vmatprep.mubr.msk.f32.mxu1 %vm597_vm3, %v1709_v16 }
  0xef   : > { %v560_v19 = vpop.f32.mrb[3].mxu0  ;;  %1409 = vmatmul.mubr.msk.f32.vlgmr.msra.gmra.mrb[0].mxu1 %vm597_vm3, %v1711_v17  ;;  %v1720_v21 = vadd.f32 %v1399_v18, %v1314_v13 }
  0xf0   : > { %v1717_v20 = vadd.f32 %v1314_v13, %v560_v19  ;;  %1421 = vmatpush3.msk.msra.mxu1 %vm622_vm1, %v731_v11 }
  0xf2   : > { %v1402_v22 = vpop.f32.mrb[4].mxu0  ;;  %1411 = vmatprep.mubr.msk.f32.mxu1 %vm597_vm3, %v1717_v20 }
  0xf3   : > { %v570_v23 = vpop.f32.mrb[5].mxu0  ;;  %1412 = vmatmul.mubr.msk.f32.gmra.mrb[2].mxu1 %vm597_vm3, %v1720_v21  ;;  %v1729_v25 = vadd.f32 %v1402_v22, %v1314_v13 }
  0xf4   : > { %v1727_v24 = vadd.f32 %v1314_v13, %v570_v23 }
  0xf6   : > { %v1405_v26 = vpop.f32.mrb[6].mxu0  ;;  %1414 = vmatprep.mubr.msk.f32.mxu1 %vm597_vm3, %v1727_v24 }
  0xf7   : > { %v580_v27 = vpop.f32.mrb[7].mxu0  ;;  %1415 = vmatmul.mubr.msk.f32.gmra.mrb[4].mxu1 %vm597_vm3, %v1729_v25  ;;  %v1742_v29 = vadd.f32 %v1405_v26, %v1314_v13 }
  0xf8   : > { %v1740_v28 = vadd.f32 %v1314_v13, %v580_v27 }
  0xfa   : > { %1417 = vmatprep.mubr.msk.f32.mxu1 %vm597_vm3, %v1740_v28 }
  0xfb   : > { %1418 = vmatmul.mubr.msk.f32.gmra.mrb[6].mxu1 %vm597_vm3, %v1742_v29 }
  0xfc   : > { %1422 = vmatprep.mubr.msk.f32.mxu1 %vm597_vm3, %v1744_v30 }
  0xff   : > { %1423 = vmatmul.mubr.msk.f32.vlgmr.msra.gmra.mrb[0].mxu1 %vm597_vm3, %v1752_v31 }
 0x100   : > { %1425 = vmatprep.mubr.msk.f32.mxu1 %vm597_vm3, %v1754_v32 }
 0x103   : > { %1426 = vmatmul.mubr.msk.f32.gmra.mrb[2].mxu1 %vm597_vm3, %v1760_v33 }
 0x104   : > { %1428 = vmatprep.mubr.msk.f32.mxu1 %vm597_vm3, %v1762_v34 }
 0x107   : > { %1429 = vmatmul.mubr.msk.f32.gmra.mrb[4].mxu1 %vm597_vm3, %v1768_v35 }
 0x108   : > { %1431 = vmatprep.mubr.msk.f32.mxu1 %vm597_vm3, %v1770_v36 }
 0x10b   : > { %1432 = vmatmul.mubr.msk.f32.gmra.mrb[6].mxu1 %vm597_vm3, %v1776_v37 }
 0x1d2   : > { %v1424_v40 = vpop.f32.mrb[0].mxu1 }
 0x1d3   : > { %v1448_v41 = vadd.f32 %v1424_v40, %v1323_v38  ;;  %v832_v42 = vpop.f32.mrb[1].mxu1 }
 0x1d4   : > { %v1450_v44 = vadd.f32 %v1323_v38, %v832_v42 }
 0x1d5   : > { %v1449_v45 = vadd.f32 %v1448_v41, %v1333_v39 }
 0x1d6   : > { %v1451_v46 = vadd.f32 %v1450_v44, %v1333_v39  ;;  %v1427_v47 = vpop.f32.mrb[2].mxu1 }
 0x1d7   : > { %v842_v48 = vpop.f32.mrb[3].mxu1  ;;  %v880_v51 = vmax.f32 %v1449_v45, 0.0  ;;  %v1453_v52 = vadd.f32 %v1454_v43, %v1427_v47 }
 0x1d8   : > { %v879_v49 = vmax.f32 %v1451_v46, 0.0  ;;  %v1455_v50 = vadd.f32 %v1454_v43, %v842_v48 }
 0x1d9   : > { %v882_v57 = vmax.f32 %v1453_v52, 0.0 }
 0x1da   : > { %v881_v53 = vmax.f32 %v1455_v50, 0.0  ;;  %v1430_v54 = vpop.f32.mrb[4].mxu1  ;;  %1436 = vmatprep.mubr.msk.f32.mxu0 %vm895_vm4, %v879_v49 }
 0x1db   : > { %v852_v55 = vpop.f32.mrb[5].mxu1  ;;  %1437 = vmatmul.mubr.msk.f32.vlgmr.msra.gmra.mrb[8].mxu0 %vm895_vm4, %v880_v51  ;;  %v1457_v58 = vadd.f32 %v1454_v43, %v1430_v54 }
 0x1dc   : > { %v1459_v56 = vadd.f32 %v1454_v43, %v852_v55  ;;  %1439 = vmatprep.mubr.msk.f32.mxu0 %vm895_vm4, %v881_v53 }
 0x1dd   : > { %v884_v63 = vmax.f32 %v1457_v58, 0.0 }
 0x1de   : > { %v883_v59 = vmax.f32 %v1459_v56, 0.0  ;;  %v1433_v60 = vpop.f32.mrb[6].mxu1 }
 0x1df   : > { %v862_v61 = vpop.f32.mrb[7].mxu1  ;;  %1440 = vmatmul.mubr.msk.f32.gmra.mrb[10].mxu0 %vm895_vm4, %v882_v57  ;;  %v1461_v0 = vadd.f32 %v1454_v43, %v1433_v60 }
 0x1e0   : > { %v1463_v62 = vadd.f32 %v1454_v43, %v862_v61  ;;  %1442 = vmatprep.mubr.msk.f32.mxu0 %vm895_vm4, %v883_v59 }
 0x1e1   : > { %v886_v2 = vmax.f32 %v1461_v0, 0.0 }
 0x1e2   : > { %v885_v1 = vmax.f32 %v1463_v62, 0.0 }
 0x1e3   : > { %1443 = vmatmul.mubr.msk.f32.gmra.mrb[12].mxu0 %vm895_vm4, %v884_v63 }
 0x1e4   : > { %1445 = vmatprep.mubr.msk.f32.mxu0 %vm895_vm4, %v885_v1 }
 0x1e7   : > { %1446 = vmatmul.mubr.msk.f32.gmra.mrb[14].mxu0 %vm895_vm4, %v886_v2 }
 0x2ae   : > { %v1438_v5 = vpop.f32.mrb[8].mxu0 }
 0x2af   : > { %v996_v6 = vadd.f32 %v1438_v5, %v1343_v4  ;;  %v990_v7 = vpop.f32.mrb[9].mxu0 }
 0x2b0   : > { %v991_v8 = vadd.f32 %v1343_v4, %v990_v7 }
 0x2b1   : > { %v1030_v9 = vsub.f32 0.0, %v996_v6 }
 0x2b2   : > { %v1029_v10 = vsub.f32 0.0, %v991_v8  ;;  %v1441_v11 = vpop.f32.mrb[10].mxu0 }
 0x2b3   : > { %v1039_v12 = vmul.f32 1.442695, %v1030_v9  ;;  %v1006_v13 = vadd.f32 %v1441_v11, %v1343_v4  ;;  %v1000_v14 = vpop.f32.mrb[11].mxu0 }
 0x2b4   : > { %v1037_v15 = vmul.f32 1.442695, %v1029_v10  ;;  %v1001_v18 = vadd.f32 %v1343_v4, %v1000_v14 }
 0x2b5   : > { %1516 = vpow2.f32 %v1039_v12  ;;  %v1032_v19 = vsub.f32 0.0, %v1006_v13 }
 0x2b6   : > { %1518 = vpow2.f32 %v1037_v15  ;;  %v1031_v22 = vsub.f32 0.0, %v1001_v18  ;;  %v1444_v23 = vpop.f32.mrb[12].mxu0 }
 0x2b7   : > { %v1043_v26 = vmul.f32 1.442695, %v1032_v19  ;;  %v1016_v27 = vadd.f32 %v1444_v23, %v1343_v4  ;;  %v1010_v38 = vpop.f32.mrb[13].mxu0 }
 0x2b8   : > { %v1041_v39 = vmul.f32 1.442695, %v1031_v22  ;;  %v1011_v40 = vadd.f32 %v1343_v4, %v1010_v38 }
 0x2b9   : > { %1520 = vpow2.f32 %v1043_v26  ;;  %v1034_v41 = vsub.f32 0.0, %v1016_v27 }
 0x2ba   : > { %1522 = vpow2.f32 %v1041_v39  ;;  %v1033_v42 = vsub.f32 0.0, %v1011_v40  ;;  %v1447_v43 = vpop.f32.mrb[14].mxu0 }
 0x2bb   : > { %v1047_v44 = vmul.f32 1.442695, %v1034_v41  ;;  %v1026_v45 = vadd.f32 %v1447_v43, %v1343_v4  ;;  %v1020_v46 = vpop.f32.mrb[15].mxu0 }
 0x2bc   : > { %v1045_v47 = vmul.f32 1.442695, %v1033_v42  ;;  %v1021_v48 = vadd.f32 %v1343_v4, %v1020_v46 }
 0x2bd   : > { %1524 = vpow2.f32 %v1047_v44  ;;  %v1036_v49 = vsub.f32 0.0, %v1026_v45 }
 0x2be   : > { %1526 = vpow2.f32 %v1045_v47  ;;  %v1035_v50 = vsub.f32 0.0, %v1021_v48 }
 0x2bf   : > { %v1517_v51 = vpop.eup %1516  ;;  %v1051_v52 = vmul.f32 1.442695, %v1036_v49 }
 0x2c0   : > { %v1519_v53 = vpop.eup %1518  ;;  %v1054_v54 = vadd.f32 1.0, %v1517_v51  ;;  %v1049_v55 = vmul.f32 1.442695, %v1035_v50 }
 0x2c1   : > { %v1053_v56 = vadd.f32 1.0, %v1519_v53  ;;  %1528 = vpow2.f32 %v1051_v52 }
 0x2c2   : > { %1530 = vrcp.f32 %v1054_v54 }
 0x2c3   : > { %v1521_v57 = vpop.eup %1520  ;;  %1532 = vpow2.f32 %v1049_v55 }
 0x2c4   : > { %v1523_v58 = vpop.eup %1522  ;;  %v1056_v59 = vadd.f32 1.0, %v1521_v57  ;;  %1534 = vrcp.f32 %v1053_v56 }
 0x2c5   : > { %v1055_v60 = vadd.f32 1.0, %v1523_v58 }
 0x2c6   : > { %1536 = vrcp.f32 %v1056_v59 }
 0x2c7   : > { %v1525_v61 = vpop.eup %1524  ;;  %1538 = vrcp.f32 %v1055_v60 }
 0x2c8   : > { %v1527_v62 = vpop.eup %1526  ;;  %v1058_v0 = vadd.f32 1.0, %v1525_v61 }
 0x2c9   : > { %v1057_v63 = vadd.f32 1.0, %v1527_v62 }
 0x2cb   : > { %v1529_v1 = vpop.eup %1528  ;;  %1540 = vrcp.f32 %v1057_v63 }
 0x2cc   : > { %v1531_v2 = vpop.eup %1530  ;;  %1542 = vrcp.f32 %v1058_v0  ;;  %v1060_v4 = vadd.f32 1.0, %v1529_v1 }
 0x2cd   : > { %1084 = vperm.xlu0 %1514, %v1531_v2   ;;  %v1533_v3 = vpop.eup %1532 }
 0x2ce   : > { %v1535_v5 = vpop.eup %1534  ;;  %v1059_v6 = vadd.f32 1.0, %v1533_v3 }
 0x2d0   : > { %v1537_v7 = vpop.eup %1536  ;;  %1544 = vrcp.f32 %v1059_v6 }
 0x2d1   : > { %1079 = vperm.xlu0 %1514, %v1535_v5   ;;  %1094 = vperm.xlu1 %1515, %v1537_v7   ;;  %1546 = vrcp.f32 %v1060_v4  ;;  %v1539_v8 = vpop.eup %1538 }
 0x2d5   : > { %v1541_v9 = vpop.eup %1540  ;;  %1089 = vperm.xlu1 %1515, %v1539_v8  }
 0x2d6   : > { %1099 = vperm.xlu0 %1514, %v1541_v9   ;;  %v1543_v10 = vpop.eup %1542 }
 0x2d9   : > { %1104 = vperm.xlu1 %1515, %v1543_v10  }
 0x2da   : > { %v1545_v11 = vpop.eup %1544 }
 0x2db   : > { %v1547_v12 = vpop.eup %1546  ;;  %1109 = vperm.xlu0 %1514, %v1545_v11  }
 0x2dd   : > { %1114 = vperm.xlu1 %1515, %v1547_v12  }
 0x34c   : > { %v1085_v13 = vpop.permute.xlu0 %1084 }
 0x34d   : > { %v1118_v14 = vmul.f32 %v1085_v13, %v1752_v31 }
 0x34f   : > { %1135 = vrot.lane.b32.xlu1 %v1118_v14, %s1589_s12 }
 0x350   : > { %v1080_v15 = vpop.permute.xlu0 %1079  ;;  %v1095_v18 = vpop.permute.xlu1 %1094 }
 0x351   : > { %v1117_v19 = vmul.f32 %v1080_v15, %v1744_v30  ;;  %v1120_v22 = vmul.f32 %v1095_v18, %v1760_v33 }
 0x353   : > { %1139 = vrot.lane.b32.xlu1 %v1120_v22, %s1589_s12  ;;  %1133 = vrot.lane.b32.xlu0 %v1117_v19, %s1589_s12 }
 0x354   : > { %v1090_v23 = vpop.permute.xlu1 %1089 }
 0x355   : > { %v1119_v26 = vmul.f32 %v1090_v23, %v1754_v32  ;;  %v1100_v27 = vpop.permute.xlu0 %1099 }
 0x356   : > { %v1121_v39 = vmul.f32 %v1100_v27, %v1762_v34 }
 0x357   : > { %1137 = vrot.lane.b32.xlu0 %v1119_v26, %s1589_s12 }
 0x358   : > { %v1105_v38 = vpop.permute.xlu1 %1104 }
 0x359   : > { %v1122_v31 = vmul.f32 %v1105_v38, %v1768_v35 }
 0x35a   : > { %v1110_v40 = vpop.permute.xlu0 %1109 }
 0x35b   : > { %1143 = vrot.lane.b32.xlu1 %v1122_v31, %s1589_s12  ;;  %1141 = vrot.lane.b32.xlu0 %v1121_v39, %s1589_s12  ;;  %v1123_v30 = vmul.f32 %v1110_v40, %v1770_v36 }
 0x35c   : > { %v1115_v41 = vpop.permute.xlu1 %1114 }
 0x35d   : > { %v1124_v33 = vmul.f32 %v1115_v41, %v1776_v37 }
 0x35f   : > { %1147 = vrot.lane.b32.xlu1 %v1124_v33, %s1589_s12  ;;  %1145 = vrot.lane.b32.xlu0 %v1123_v30, %s1589_s12 }
 0x3c1   : > { %v1136_v32 = vpop.permute.xlu1 %1135 }
 0x3c2   : > { %v1158_v34 = vsel %vm597_vm3, %v1711_v17, %v1136_v32 }
 0x3c3   : > { %v1166_v35 = vsel %vm459_vm0, %v1158_v34, 0.0 }
 0x3c4   : > { %1174 = vst [vmem:[%s1807_s15 + $0x8] sm:$0xff] %v1166_v35 }
 0x3c5   : > { %v1140_v36 = vpop.permute.xlu1 %1139  ;;  %v1134_v37 = vpop.permute.xlu0 %1133 }
 0x3c6   : > { %v1160_v42 = vsel %vm597_vm3, %v1720_v21, %v1140_v36  ;;  %v1157_v43 = vsel %vm597_vm3, %v1709_v16, %v1134_v37 }
 0x3c7   : > { %v1168_v44 = vsel %vm459_vm0, %v1160_v42, 0.0  ;;  %v1165_v45 = vsel %vm459_vm0, %v1157_v43, 0.0 }
 0x3c8   : > { %1176 = vst [vmem:[%s1807_s15 + $0x18] sm:$0xff] %v1168_v44  ;;  %1173 = vst [vmem:[%s1807_s15] sm:$0xff] %v1165_v45 }
 0x3c9   : > { %v1138_v17 = vpop.permute.xlu0 %1137 }
 0x3ca   : > { %v1159_v46 = vsel %vm597_vm3, %v1717_v20, %v1138_v17 }
 0x3cb   : > { %v1167_v47 = vsel %vm459_vm0, %v1159_v46, 0.0 }
 0x3cc   : > { %1175 = vst [vmem:[%s1807_s15 + $0x10] sm:$0xff] %v1167_v47 }
 0x3cd   : > { %v1144_v21 = vpop.permute.xlu1 %1143  ;;  %v1142_v48 = vpop.permute.xlu0 %1141 }
 0x3ce   : > { %v1162_v16 = vsel %vm597_vm3, %v1729_v25, %v1144_v21  ;;  %v1161_v49 = vsel %vm597_vm3, %v1727_v24, %v1142_v48 }
 0x3cf   : > { %v1170_v50 = vsel %vm459_vm0, %v1162_v16, 0.0  ;;  %v1169_v51 = vsel %vm459_vm0, %v1161_v49, 0.0 }
 0x3d0   : > { %1178 = vst [vmem:[%s1807_s15 + $0x28] sm:$0xff] %v1170_v50  ;;  %1177 = vst [vmem:[%s1807_s15 + $0x20] sm:$0xff] %v1169_v51 }
 0x3d1   : > { %v1148_v20 = vpop.permute.xlu1 %1147  ;;  %v1146_v52 = vpop.permute.xlu0 %1145 }
 0x3d2   : > { %v1164_v53 = vsel %vm597_vm3, %v1742_v29, %v1148_v20  ;;  %v1163_v54 = vsel %vm597_vm3, %v1740_v28, %v1146_v52 }
 0x3d3   : > { %v1172_v55 = vsel %vm459_vm0, %v1164_v53, 0.0  ;;  %v1171_v25 = vsel %vm459_vm0, %v1163_v54, 0.0 }
 0x3d4   : > { %1180 = vst [vmem:[%s1807_s15 + $0x38] sm:$0xff] %v1172_v55  ;;  %1179 = vst [vmem:[%s1807_s15 + $0x30] sm:$0xff] %v1171_v25 }
 0x3d5 PF: > { %s22_s19 = sadd.s32 1, %s1586_s19   ;;  %s1867_s15 = smov %s1578_s17 }
 0x3d6   : > { %p19_p7 = scmp.ge.s32.totalorder %s22_s19, 10   ;;  %s1868_s16 = smov %s1582_s18 }
 0x3d7   : > { %s1869_s17 = smov %s1872_s9  ;;  %s1870_s18 = smov %s1876_s20 }
 0x3d8   :  { %21 = sbr.rel (!%p19_p7) target bundleno = 3 (0x3), region = 96 }

// kernel: decoder_block_forward.3
= control target key start
LH: loop header
LB: loop body
LE: loop exit
PB: predicated region body
PF: predicated region fallthrough
CT: control target
= control target key end

     0   :  { %s4720_s18 = smov 0   ;;  %s4722_s19 = smov 0   ;;  %s6674_s0 = inlined_call_operand.vmem [shape: f32[2,16,16,128], index: 0, kind: input, shape index: {}]   ;;  %s6675_s1 = inlined_call_operand.vmem [shape: f32[1152,128], index: 1, kind: input, shape index: {}]   ;;  %s6676_s2 = inlined_call_operand.vmem [shape: f32[1,128], index: 2, kind: input, shape index: {}]   ;;  %s6677_s3 = inlined_call_operand.vmem [shape: f32[1152,128], index: 3, kind: input, shape index: {}]   ;;  %s6678_s4 = inlined_call_operand.vmem [shape: f32[1,128], index: 4, kind: input, shape index: {}]   ;;  %s6679_s5 = inlined_call_operand.vmem [shape: f32[2,256,128], index: 5, kind: output, shape index: {}]  }
   0x1   :  { %s4724_s20 = smov 0   ;;  %s4726_s21 = smov 0  }
   0x2   :  { %s4728_s22 = smov 0  }
   0x3 LB: > { %s24_s23 = sadd.s32 1, %s4675_s20  ;;  %s27_s24 = sadd.s32 1, %s4679_s21  ;;  %s4683_s22 = sphi %s4728_s22, %s15_s22   ;;  %s4679_s21 = sphi %s4726_s21, %s6701_s21   ;;  %s4675_s20 = sphi %s4724_s20, %s6700_s20   ;;  %s4671_s19 = sphi %s4722_s19, %s6699_s19   ;;  %s4667_s18 = sphi %s4720_s18, %s6698_s18  }
   0x4   : > { %p25_p0 = scmp.ge.s32.totalorder %s24_s23, 2  ;;  %p3150_p1 = scmp.ge.s32.totalorder %s4683_s22, 1 }
   0x5   : > { %p201_p2 = scmp.lt.s32.totalorder %s4683_s22, 5 }
   0x6   : > { %s6703_s23 = smov (%p25_p0, %s24_s23), 0  ;;  %s6705_s24 = smov (!%p25_p0, %s27_s24), %s4679_s21 }
   0x7   : > { %p202_p3 = pnand %p3150_p1, %p201_p2  ;;  %p29_p4 = scmp.ge.s32.totalorder %s6705_s24, 2 }
   0x9   : > { %s6707_s24 = smov (%p29_p4, %s6705_s24), 0  ;;  %205 = sbr.rel (%p202_p3) target bundleno = 970 (0x3ca), region = 40 }
  0x10   : > { %p233_p5 = scmp.lt.s32.totalorder %s4671_s19, 1  ;;  %s3153_s25 = sshll.u32 %s4667_s18, 4 }
  0x11   : > { %p241_p6 = scmp.lt.s32.totalorder %s3153_s25, 31  ;;  %p3156_p7 = scmp.ne.s32.totalorder %s4667_s18, 0 }
  0x12   : > { %s6709_s19 = smov (!%p233_p5, %s4671_s19), 1  ;;  %v4685_v3 = vmov (!%p3156_p7), 0.0  }
  0x13   : > { %s6711_s25 = smov (!%p241_p6, %s3153_s25), 31  ;;  %s3289_s26 = sshll.u32 %s6709_s19, 8  ;;  %258 = vst [vmem:[#allocation2 + $0x30] sm:$0xff] (!%p3156_p7), %v4685_v3  ;;  %252 = vst [vmem:[#allocation2] sm:$0xff] (!%p3156_p7), %v4685_v3 }
  0x14   : > { %s3154_s27 = sshll.u32 %s6709_s19, 5  ;;  %s4756_s30 = scalar_lea.vmem %s6674_s0, %s3289_s26  ;;  %253 = vst [vmem:[#allocation2 + $0x8] sm:$0xff] (!%p3156_p7), %v4685_v3  ;;  %254 = vst [vmem:[#allocation2 + $0x10] sm:$0x3] (!%p3156_p7), %v4685_v3 }
  0x15   : > { %s244_s6 = sadd.s32 %s3154_s27, %s6711_s25  ;;  %251 = sbr.rel (%p3156_p7) target bundleno = 66 (0x42), region = 44  ;;  %v4767_v0 = vld [vmem:[%s4756_s30] sm:$0xff] (!%p3156_p7)  ;;  %v4770_v1 = vld [vmem:[%s4756_s30 + $0x8] sm:$0xff] (!%p3156_p7)  ;;  %v4773_v2 = vld [vmem:[%s4756_s30 + $0x10] sm:$0xff] (!%p3156_p7)  ;;  %255 = vst [vmem:[#allocation2 + $0x18] sm:$0xff] (!%p3156_p7), %v4685_v3 }
  0x16   : > { %s3155_s7 = sshll.u32 %s244_s6, 3  ;;  %256 = vst [vmem:[#allocation2 + $0x20] sm:$0xff] (!%p3156_p7), %v4685_v3  ;;  %257 = vst [vmem:[#allocation2 + $0x28] sm:$0x3] (!%p3156_p7), %v4685_v3  ;;  %v315_v4 = vld [vmem:[%s4756_s30 + $0x18] sm:$0xff] (!%p3156_p7)  ;;  %v316_v5 = vld [vmem:[%s4756_s30 + $0x20] sm:$0xff] (!%p3156_p7) }
  0x17   : > { %s4761_s10 = scalar_lea.vmem %s6679_s5, %s3155_s7  ;;  %259 = vst [vmem:[#allocation2 + $0x38] sm:$0xff] (!%p3156_p7), %v4685_v3  ;;  %260 = vst [vmem:[#allocation2 + $0x40] sm:$0x3] (!%p3156_p7), %v4685_v3  ;;  %v317_v6 = vld [vmem:[%s4756_s30 + $0x28] sm:$0xff] (!%p3156_p7)  ;;  %v318_v7 = vld [vmem:[%s4756_s30 + $0x30] sm:$0xff] (!%p3156_p7) }
  0x18   : > { %261 = vst [vmem:[#allocation2 + $0x48] sm:$0xff] (!%p3156_p7), %v4685_v3  ;;  %262 = vst [vmem:[#allocation2 + $0x50] sm:$0xff] (!%p3156_p7), %v4685_v3  ;;  %v319_v8 = vld [vmem:[%s4756_s30 + $0x38] sm:$0xff] (!%p3156_p7)  ;;  %v320_v9 = vld [vmem:[%s4756_s30 + $0x40] sm:$0xff] (!%p3156_p7) }
  0x19   : > { %263 = vst [vmem:[#allocation2 + $0x58] sm:$0x3] (!%p3156_p7), %v4685_v3  ;;  %264 = vst [vmem:[#allocation2 + $0x60] sm:$0xff] (!%p3156_p7), %v4685_v3  ;;  %v321_v10 = vld [vmem:[%s4756_s30 + $0x48] sm:$0xff] (!%p3156_p7)  ;;  %v322_v11 = vld [vmem:[%s4756_s30 + $0x50] sm:$0xff] (!%p3156_p7) }
  0x1a   : > { %265 = vst [vmem:[#allocation2 + $0x68] sm:$0xff] (!%p3156_p7), %v4685_v3  ;;  %266 = vst [vmem:[#allocation2 + $0x70] sm:$0x3] (!%p3156_p7), %v4685_v3  ;;  %v323_v12 = vld [vmem:[%s4756_s30 + $0x58] sm:$0xff] (!%p3156_p7)  ;;  %v324_v13 = vld [vmem:[%s4756_s30 + $0x60] sm:$0xff] (!%p3156_p7) }
  0x1b   : > { %267 = vst [vmem:[#allocation2 + $0x78] sm:$0xff] (!%p3156_p7), %v4685_v3  ;;  %268 = vst [vmem:[#allocation2 + $0x80] sm:$0xff] (!%p3156_p7), %v4685_v3  ;;  %v325_v14 = vld [vmem:[%s4756_s30 + $0x68] sm:$0xff] (!%p3156_p7)  ;;  %v326_v15 = vld [vmem:[%s4756_s30 + $0x70] sm:$0xff] (!%p3156_p7) }
  0x1c   : > { %269 = vst [vmem:[#allocation2 + $0x88] sm:$0x3] %v4685_v3  ;;  %270 = vst [vmem:[#allocation2 + $0x90] sm:$0xff] %v4685_v3  ;;  %v327_v16 = vld [vmem:[%s4756_s30 + $0x78] sm:$0xff]  ;;  %v328_v17 = vld [vmem:[%s4756_s30 + $0x80] sm:$0xff] }
  0x1d   : > { %271 = vst [vmem:[#allocation2 + $0x98] sm:$0xff] %v4685_v3  ;;  %272 = vst [vmem:[#allocation2 + $0xa0] sm:$0x3] %v4685_v3  ;;  %v329_v18 = vld [vmem:[%s4756_s30 + $0x88] sm:$0xff]  ;;  %v330_v19 = vld [vmem:[%s4756_s30 + $0x90] sm:$0xff] }
  0x1e   : > { %273 = vst [vmem:[#allocation2 + $0xa8] sm:$0xff] %v4685_v3  ;;  %274 = vst [vmem:[#allocation2 + $0xb0] sm:$0xff] %v4685_v3  ;;  %v331_v20 = vld [vmem:[%s4756_s30 + $0x98] sm:$0xff]  ;;  %v332_v21 = vld [vmem:[%s4756_s30 + $0xa0] sm:$0xff] }
  0x1f   : > { %275 = vst [vmem:[#allocation2 + $0xb8] sm:$0x3] %v4685_v3  ;;  %276 = vst [vmem:[#allocation2 + $0xc0] sm:$0xff] %v4685_v3  ;;  %v333_v22 = vld [vmem:[%s4756_s30 + $0xa8] sm:$0xff]  ;;  %v334_v23 = vld [vmem:[%s4756_s30 + $0xb0] sm:$0xff] }
  0x20   : > { %277 = vst [vmem:[#allocation2 + $0xc8] sm:$0xff] %v4685_v3  ;;  %278 = vst [vmem:[#allocation2 + $0xd0] sm:$0x3] %v4685_v3  ;;  %v335_v24 = vld [vmem:[%s4756_s30 + $0xb8] sm:$0xff]  ;;  %v336_v25 = vld [vmem:[%s4756_s30 + $0xc0] sm:$0xff] }
  0x21   : > { %279 = vst [vmem:[#allocation2 + $0xd8] sm:$0xff] %v4685_v3  ;;  %280 = vst [vmem:[#allocation2 + $0xe0] sm:$0xff] %v4685_v3  ;;  %v337_v26 = vld [vmem:[%s4756_s30 + $0xc8] sm:$0xff]  ;;  %v338_v27 = vld [vmem:[%s4756_s30 + $0xd0] sm:$0xff] }
  0x22   : > { %281 = vst [vmem:[#allocation2 + $0xe8] sm:$0x3] %v4685_v3  ;;  %282 = vst [vmem:[#allocation2 + $0xf0] sm:$0xff] %v4685_v3  ;;  %v339_v28 = vld [vmem:[%s4756_s30 + $0xd8] sm:$0xff]  ;;  %v340_v29 = vld [vmem:[%s4756_s30 + $0xe0] sm:$0xff] }
  0x23   : > { %283 = vst [vmem:[#allocation2 + $0xf8] sm:$0xff] %v4685_v3  ;;  %284 = vst [vmem:[#allocation2 + $0x100] sm:$0x3] %v4685_v3  ;;  %v341_v30 = vld [vmem:[%s4756_s30 + $0xe8] sm:$0xff]  ;;  %v342_v31 = vld [vmem:[%s4756_s30 + $0xf0] sm:$0xff] }
  0x24   : > { %285 = vst [vmem:[#allocation2 + $0x108] sm:$0xff] %v4685_v3  ;;  %286 = vst [vmem:[#allocation2 + $0x110] sm:$0xff] %v4685_v3  ;;  %v343_v32 = vld [vmem:[%s4756_s30 + $0xf8] sm:$0xff] }
  0x25   : > { %287 = vst [vmem:[#allocation2 + $0x118] sm:$0x3] %v4685_v3  ;;  %288 = vst [vmem:[#allocation2 + $0x120] sm:$0xff] %v4685_v3 }
  0x26   : > { %289 = vst [vmem:[#allocation2 + $0x128] sm:$0xff] %v4685_v3  ;;  %290 = vst [vmem:[#allocation2 + $0x130] sm:$0x3] %v4685_v3 }
  0x27   : > { %291 = vst [vmem:[#allocation2 + $0x138] sm:$0xff] %v4685_v3  ;;  %292 = vst [vmem:[#allocation2 + $0x140] sm:$0xff] %v4685_v3 }
  0x28   : > { %293 = vst [vmem:[#allocation2 + $0x148] sm:$0x3] %v4685_v3  ;;  %294 = vst [vmem:[#allocation2 + $0x150] sm:$0xff] %v4685_v3 }
  0x29   : > { %295 = vst [vmem:[#allocation2 + $0x158] sm:$0xff] %v4685_v3  ;;  %296 = vst [vmem:[#allocation2 + $0x160] sm:$0x3] %v4685_v3 }
  0x2a   : > { %297 = vst [vmem:[#allocation2 + $0x168] sm:$0xff] %v4685_v3  ;;  %298 = vst [vmem:[#allocation2 + $0x170] sm:$0xff] %v4685_v3 }
  0x2b   : > { %299 = vst [vmem:[#allocation2 + $0x178] sm:$0x3] %v4685_v3  ;;  %300 = vst [vmem:[#allocation2 + $0x180] sm:$0xff] %v4685_v3 }
  0x2c   : > { %301 = vst [vmem:[#allocation2 + $0x188] sm:$0xff] %v4685_v3  ;;  %302 = vst [vmem:[#allocation2 + $0x190] sm:$0x3] %v4685_v3 }
  0x2d   : > { %303 = vst [vmem:[#allocation2 + $0x198] sm:$0xff] %v4685_v3  ;;  %304 = vst [vmem:[#allocation2 + $0x1a0] sm:$0xff] %v4685_v3 }
  0x2e   : > { %305 = vst [vmem:[#allocation2 + $0x1a8] sm:$0x3] %v4685_v3  ;;  %306 = vst [vmem:[#allocation2 + $0x1b0] sm:$0xff] %v4685_v3 }
  0x2f   : > { %307 = vst [vmem:[#allocation2 + $0x1b8] sm:$0xff] %v4685_v3  ;;  %308 = vst [vmem:[#allocation2 + $0x1c0] sm:$0x3] %v4685_v3 }
  0x30   : > { %309 = vst [vmem:[#allocation2 + $0x1c8] sm:$0xff] %v4685_v3  ;;  %310 = vst [vmem:[#allocation2 + $0x1d0] sm:$0xff] %v4685_v3 }
  0x31   : > { %311 = vst [vmem:[#allocation2 + $0x1d8] sm:$0x3] %v4685_v3  ;;  %345 = vst [vmem:[#allocation2 + $0x31] sm:$0xff] %v4767_v0 }
  0x32   : > { %346 = vst [vmem:[#allocation2 + $0x39] sm:$0xff] %v4770_v1  ;;  %347 = vst [vmem:[#allocation2 + $0x49] sm:$0xff] %v4773_v2 }
  0x33   : > { %348 = vst [vmem:[#allocation2 + $0x51] sm:$0xff] %v315_v4  ;;  %349 = vst [vmem:[#allocation2 + $0x61] sm:$0xff] %v316_v5 }
  0x34   : > { %350 = vst [vmem:[#allocation2 + $0x69] sm:$0xff] %v317_v6  ;;  %351 = vst [vmem:[#allocation2 + $0x79] sm:$0xff] %v318_v7 }
  0x35   : > { %352 = vst [vmem:[#allocation2 + $0x81] sm:$0xff] %v319_v8  ;;  %353 = vst [vmem:[#allocation2 + $0x91] sm:$0xff] %v320_v9 }
  0x36   : > { %354 = vst [vmem:[#allocation2 + $0x99] sm:$0xff] %v321_v10  ;;  %355 = vst [vmem:[#allocation2 + $0xa9] sm:$0xff] %v322_v11 }
  0x37   : > { %356 = vst [vmem:[#allocation2 + $0xb1] sm:$0xff] %v323_v12  ;;  %357 = vst [vmem:[#allocation2 + $0xc1] sm:$0xff] %v324_v13 }
  0x38   : > { %358 = vst [vmem:[#allocation2 + $0xc9] sm:$0xff] %v325_v14  ;;  %359 = vst [vmem:[#allocation2 + $0xd9] sm:$0xff] %v326_v15 }
  0x39   : > { %360 = vst [vmem:[#allocation2 + $0xe1] sm:$0xff] %v327_v16  ;;  %361 = vst [vmem:[#allocation2 + $0xf1] sm:$0xff] %v328_v17 }
  0x3a   : > { %362 = vst [vmem:[#allocation2 + $0xf9] sm:$0xff] %v329_v18  ;;  %363 = vst [vmem:[#allocation2 + $0x109] sm:$0xff] %v330_v19 }
  0x3b   : > { %364 = vst [vmem:[#allocation2 + $0x111] sm:$0xff] %v331_v20  ;;  %365 = vst [vmem:[#allocation2 + $0x121] sm:$0xff] %v332_v21 }
  0x3c   : > { %366 = vst [vmem:[#allocation2 + $0x129] sm:$0xff] %v333_v22  ;;  %367 = vst [vmem:[#allocation2 + $0x139] sm:$0xff] %v334_v23 }
  0x3d   : > { %368 = vst [vmem:[#allocation2 + $0x141] sm:$0xff] %v335_v24  ;;  %369 = vst [vmem:[#allocation2 + $0x151] sm:$0xff] %v336_v25 }
  0x3e   : > { %370 = vst [vmem:[#allocation2 + $0x159] sm:$0xff] %v337_v26  ;;  %371 = vst [vmem:[#allocation2 + $0x169] sm:$0xff] %v338_v27 }
  0x3f   : > { %372 = vst [vmem:[#allocation2 + $0x171] sm:$0xff] %v339_v28  ;;  %373 = vst [vmem:[#allocation2 + $0x181] sm:$0xff] %v340_v29 }
  0x40   : > { %374 = vst [vmem:[#allocation2 + $0x189] sm:$0xff] %v341_v30  ;;  %375 = vst [vmem:[#allocation2 + $0x199] sm:$0xff] %v342_v31 }
  0x41   : > { %376 = vst [vmem:[#allocation2 + $0x1a1] sm:$0xff] %v343_v32 }
  0x42 PF: > { %v551_v33 = vld [vmem:[%s6675_s1 + $0x180] sm:$0xff]  ;;  %v552_v34 = vld [vmem:[%s6675_s1 + $0x188] sm:$0xff]  ;;  %v6680_v36 = vmov 0.0|0.0   ;;  %v553_v39 = vld [vmem:[%s6675_s1 + $0x190] sm:$0xff]  ;;  %s3158_s13 = smul.u32 192, %s4667_s18 }
  0x43   : > { %v583_v35 = vld [vmem:[%s6675_s1 + $0x280] sm:$0xff]  ;;  %4088 = vmatprep.subr.bf16.mxu0 %v6680_v36  ;;  %v4089_v37 = vpack.c.bf16 %v552_v34, %v551_v33  ;;  %v584_v38 = vld [vmem:[%s6675_s1 + $0x288] sm:$0xff]  ;;  %v554_v40 = vld [vmem:[%s6675_s1 + $0x198] sm:$0xff] }
  0x44   : > { %v4136_v41 = vpack.c.bf16 %v584_v38, %v583_v35  ;;  %v585_v42 = vld [vmem:[%s6675_s1 + $0x290] sm:$0xff]  ;;  %v586_v43 = vld [vmem:[%s6675_s1 + $0x298] sm:$0xff]  ;;  %v4092_v44 = vpack.c.bf16 %v554_v40, %v553_v39  ;;  %v587_v46 = vld [vmem:[%s6675_s1 + $0x2a0] sm:$0xff]  ;;  %s4859_s7 = scalar_lea.vmem [#allocation2], %s3158_s13 }
  0x45   : > { %4090 = vmatpush1.bf16.msra.mxu0 %v4089_v37  ;;  %v4140_v45 = vpack.c.bf16 %v586_v43, %v585_v42  ;;  %v588_v47 = vld [vmem:[%s6675_s1 + $0x2a8] sm:$0xff]  ;;  %v555_v48 = vld [vmem:[%s6675_s1 + $0x1a0] sm:$0xff]  ;;  %v589_v52 = vld [vmem:[%s6675_s1 + $0x2b0] sm:$0xff] }
  0x46   : > { %4137 = vmatprep.subr.bf16.mxu1 %v4136_v41  ;;  %4091 = vmatprep.subr.bf16.mxu0 %v6680_v36  ;;  %v556_v49 = vld [vmem:[%s6675_s1 + $0x1a8] sm:$0xff]  ;;  %v4144_v50 = vpack.c.bf16 %v588_v47, %v587_v46  ;;  %v590_v53 = vld [vmem:[%s6675_s1 + $0x2b8] sm:$0xff]  ;;  %v557_v54 = vld [vmem:[%s6675_s1 + $0x1b0] sm:$0xff] }
  0x47   : > { %4139 = vmatpush3.bf16.msra.mxu1 %v4136_v41  ;;  %v4095_v51 = vpack.c.bf16 %v556_v49, %v555_v48  ;;  %v558_v55 = vld [vmem:[%s6675_s1 + $0x1b8] sm:$0xff]  ;;  %v4148_v56 = vpack.c.bf16 %v590_v53, %v589_v52  ;;  %v591_v59 = vld [vmem:[%s6675_s1 + $0x2c0] sm:$0xff]  ;;  %v592_v60 = vld [vmem:[%s6675_s1 + $0x2c8] sm:$0xff] }
  0x48   : > { %4141 = vmatprep.subr.bf16.mxu1 %v4140_v45  ;;  %v4862_v57 = vld [vmem:[%s4859_s7 + $0x1a] sm:$0xff]  ;;  %v4098_v58 = vpack.c.bf16 %v558_v55, %v557_v54  ;;  %v560_v62 = vld [vmem:[%s6675_s1 + $0x1c8] sm:$0xff]  ;;  %v4152_v63 = vpack.c.bf16 %v592_v60, %v591_v59  ;;  %v593_v1 = vld [vmem:[%s6675_s1 + $0x2d0] sm:$0xff] }
  0x49   : > { %4093 = vmatpush1.bf16.msra.mxu0 %v4092_v44  ;;  %3766 = vmatprep.mubr.f32.mxu1 %v4862_v57  ;;  %v559_v61 = vld [vmem:[%s6675_s1 + $0x1c0] sm:$0xff]  ;;  %v594_v2 = vld [vmem:[%s6675_s1 + $0x2d8] sm:$0xff]  ;;  %v561_v3 = vld [vmem:[%s6675_s1 + $0x1d0] sm:$0xff] }
  0x4a   : > { %4094 = vmatprep.subr.bf16.mxu0 %v6680_v36  ;;  %v4101_v0 = vpack.c.bf16 %v560_v62, %v559_v61  ;;  %v562_v4 = vld [vmem:[%s6675_s1 + $0x1d8] sm:$0xff]  ;;  %v4156_v5 = vpack.c.bf16 %v594_v2, %v593_v1  ;;  %v595_v7 = vld [vmem:[%s6675_s1 + $0x2e0] sm:$0xff]  ;;  %v596_v8 = vld [vmem:[%s6675_s1 + $0x2e8] sm:$0xff] }
  0x4b   : > { %4143 = vmatpush3.bf16.msra.mxu1 %v4140_v45  ;;  %v4104_v6 = vpack.c.bf16 %v562_v4, %v561_v3  ;;  %v563_v9 = vld [vmem:[%s6675_s1 + $0x1e0] sm:$0xff]  ;;  %v564_v10 = vld [vmem:[%s6675_s1 + $0x1e8] sm:$0xff]  ;;  %v4160_v11 = vpack.c.bf16 %v596_v8, %v595_v7  ;;  %v597_v14 = vld [vmem:[%s6675_s1 + $0x2f0] sm:$0xff] }
  0x4c   : > { %4145 = vmatprep.subr.bf16.mxu1 %v4144_v50  ;;  %v4905_v12 = vld [vmem:[%s4859_s7 + $0x19] sm:$0xff]  ;;  %v4107_v13 = vpack.c.bf16 %v564_v10, %v563_v9  ;;  %v565_v16 = vld [vmem:[%s6675_s1 + $0x1f0] sm:$0xff]  ;;  %v568_v21 = vld [vmem:[%s6675_s1 + $0x208] sm:$0xff] }
  0x4d   : > { %4096 = vmatpush1.bf16.msra.mxu0 %v4095_v51  ;;  %v598_v15 = vld [vmem:[%s6675_s1 + $0x2f8] sm:$0xff]  ;;  %663 = vmatprep.mubr.f32.mxu0 %v4905_v12  ;;  %v567_v20 = vld [vmem:[%s6675_s1 + $0x200] sm:$0xff]  ;;  %v441_v23 = vld [vmem:[%s6675_s1 + $0x8] sm:$0xff] }
  0x4e   : > { %4097 = vmatprep.subr.bf16.mxu0 %v6680_v36  ;;  %v566_v17 = vld [vmem:[%s6675_s1 + $0x1f8] sm:$0xff]  ;;  %v4164_v18 = vpack.c.bf16 %v598_v15, %v597_v14  ;;  %v440_v22 = vld [vmem:[%s6675_s1] sm:$0xff]  ;;  %v4113_v24 = vpack.c.bf16 %v568_v21, %v567_v20  ;;  %v569_v25 = vld [vmem:[%s6675_s1 + $0x210] sm:$0xff] }
  0x4f   : > { %4147 = vmatpush3.bf16.msra.mxu1 %v4144_v50  ;;  %v4110_v19 = vpack.c.bf16 %v566_v17, %v565_v16  ;;  %v570_v26 = vld [vmem:[%s6675_s1 + $0x218] sm:$0xff]  ;;  %v4942_v27 = vld [vmem:[%s4859_s7 + $0x22] sm:$0xff]  ;;  %v4169_v28 = vpack.c.bf16 %v441_v23, %v440_v22  ;;  %v442_v29 = vld [vmem:[%s6675_s1 + $0x10] sm:$0xff] }
  0x50   : > { %4149 = vmatprep.subr.bf16.mxu1 %v4148_v56  ;;  %v443_v30 = vld [vmem:[%s6675_s1 + $0x18] sm:$0xff]  ;;  %v4116_v32 = vpack.c.bf16 %v570_v26, %v569_v25  ;;  %v571_v33 = vld [vmem:[%s6675_s1 + $0x220] sm:$0xff]  ;;  %v572_v34 = vld [vmem:[%s6675_s1 + $0x228] sm:$0xff] }
  0x51   : > { %4099 = vmatpush1.bf16.msra.mxu0 %v4098_v58  ;;  %v4952_v31 = vld [vmem:[%s4859_s7 + $0x32] sm:$0xff]  ;;  %v4172_v35 = vpack.c.bf16 %v443_v30, %v442_v29  ;;  %v4964_v37 = vld [vmem:[%s4859_s7 + $0x3a] sm:$0xff]  ;;  %v445_v39 = vld [vmem:[%s6675_s1 + $0x28] sm:$0xff]  ;;  %v4119_v41 = vpack.c.bf16 %v572_v34, %v571_v33 }
  0x52   : > { %4100 = vmatprep.subr.bf16.mxu0 %v6680_v36  ;;  %v444_v38 = vld [vmem:[%s6675_s1 + $0x20] sm:$0xff]  ;;  %v4974_v40 = vld [vmem:[%s4859_s7 + $0x4a] sm:$0xff]  ;;  %v574_v43 = vld [vmem:[%s6675_s1 + $0x238] sm:$0xff] }
  0x53   : > { %4151 = vmatpush3.bf16.msra.mxu1 %v4148_v56  ;;  %v573_v42 = vld [vmem:[%s6675_s1 + $0x230] sm:$0xff]  ;;  %v4175_v44 = vpack.c.bf16 %v445_v39, %v444_v38  ;;  %v447_v47 = vld [vmem:[%s6675_s1 + $0x38] sm:$0xff]  ;;  %v4996_v48 = vld [vmem:[%s4859_s7 + $0x62] sm:$0xff] }
  0x54   : > { %4153 = vmatprep.subr.bf16.mxu1 %v4152_v63  ;;  %v4986_v45 = vld [vmem:[%s4859_s7 + $0x52] sm:$0xff]  ;;  %v4122_v49 = vpack.c.bf16 %v574_v43, %v573_v42  ;;  %v575_v50 = vld [vmem:[%s6675_s1 + $0x240] sm:$0xff]  ;;  %v576_v51 = vld [vmem:[%s6675_s1 + $0x248] sm:$0xff] }
  0x55   : > { %4102 = vmatpush1.bf16.msra.mxu0 %v4101_v0  ;;  %v446_v46 = vld [vmem:[%s6675_s1 + $0x30] sm:$0xff]  ;;  %v448_v54 = vld [vmem:[%s6675_s1 + $0x40] sm:$0xff]  ;;  %v449_v55 = vld [vmem:[%s6675_s1 + $0x48] sm:$0xff]  ;;  %v4125_v58 = vpack.c.bf16 %v576_v51, %v575_v50 }
  0x56   : > { %4103 = vmatprep.subr.bf16.mxu0 %v6680_v36  ;;  %v4178_v52 = vpack.c.bf16 %v447_v47, %v446_v46  ;;  %v5008_v53 = vld [vmem:[%s4859_s7 + $0x6a] sm:$0xff]  ;;  %v5018_v56 = vld [vmem:[%s4859_s7 + $0x7a] sm:$0xff]  ;;  %v4181_v61 = vpack.c.bf16 %v449_v55, %v448_v54  ;;  %v5030_v62 = vld [vmem:[%s4859_s7 + $0x82] sm:$0xff] }
  0x57   : > { %4155 = vmatpush3.bf16.msra.mxu1 %v4152_v63  ;;  %v577_v59 = vld [vmem:[%s6675_s1 + $0x250] sm:$0xff]  ;;  %v578_v60 = vld [vmem:[%s6675_s1 + $0x258] sm:$0xff]  ;;  %v579_v3 = vld [vmem:[%s6675_s1 + $0x260] sm:$0xff] }
  0x58   : > { %4157 = vmatprep.subr.bf16.mxu1 %v4156_v5  ;;  %v450_v63 = vld [vmem:[%s6675_s1 + $0x50] sm:$0xff]  ;;  %v451_v0 = vld [vmem:[%s6675_s1 + $0x58] sm:$0xff]  ;;  %v4128_v2 = vpack.c.bf16 %v578_v60, %v577_v59  ;;  %v580_v4 = vld [vmem:[%s6675_s1 + $0x268] sm:$0xff] }
  0x59   : > { %4105 = vmatpush1.bf16.msra.mxu0 %v4104_v6  ;;  %v5040_v1 = vld [vmem:[%s4859_s7 + $0x92] sm:$0xff]  ;;  %v5052_v6 = vld [vmem:[%s4859_s7 + $0x9a] sm:$0xff]  ;;  %v453_v8 = vld [vmem:[%s6675_s1 + $0x68] sm:$0xff]  ;;  %v4131_v10 = vpack.c.bf16 %v580_v4, %v579_v3 }
  0x5a   : > { %4106 = vmatprep.subr.bf16.mxu0 %v6680_v36  ;;  %v452_v7 = vld [vmem:[%s6675_s1 + $0x60] sm:$0xff]  ;;  %v5062_v9 = vld [vmem:[%s4859_s7 + $0xaa] sm:$0xff]  ;;  %v5074_v15 = vld [vmem:[%s4859_s7 + $0xb2] sm:$0xff] }
  0x5b   : > { %4159 = vmatpush3.bf16.msra.mxu1 %v4156_v5  ;;  %v4184_v5 = vpack.c.bf16 %v451_v0, %v450_v63  ;;  %v4187_v14 = vpack.c.bf16 %v453_v8, %v452_v7  ;;  %v472_v16 = vld [vmem:[%s6675_s1 + $0x100] sm:$0xff]  ;;  %v473_v17 = vld [vmem:[%s6675_s1 + $0x108] sm:$0xff]  ;;  %v474_v25 = vld [vmem:[%s6675_s1 + $0x110] sm:$0xff] }
  0x5c   : > { %4161 = vmatprep.subr.bf16.mxu1 %v4160_v11  ;;  %v5090_v20 = vld [vmem:[%s4859_s7 + $0xc2] sm:$0xff]  ;;  %v4216_v22 = vpack.c.bf16 %v473_v17, %v472_v16  ;;  %v475_v26 = vld [vmem:[%s6675_s1 + $0x118] sm:$0xff]  ;;  %v458_v42 = vld [vmem:[%s6675_s1 + $0x90] sm:$0xff] }
  0x5d   : > { %4108 = vmatpush1.bf16.msra.mxu0 %v4107_v13  ;;  %v582_v13 = vld [vmem:[%s6675_s1 + $0x278] sm:$0xff]  ;;  %v457_v29 = vld [vmem:[%s6675_s1 + $0x88] sm:$0xff]  ;;  %v4220_v34 = vpack.c.bf16 %v475_v26, %v474_v25  ;;  %v476_v39 = vld [vmem:[%s6675_s1 + $0x120] sm:$0xff] }
  0x5e   : > { %4109 = vmatprep.subr.bf16.mxu0 %v6680_v36  ;;  %v5112_v30 = vld [vmem:[%s4859_s7 + $0xda] sm:$0xff]  ;;  %v5123_v38 = vld [vmem:[%s4859_s7 + $0xe2] sm:$0xff]  ;;  %v5147_v47 = vld [vmem:[%s4859_s7 + $0x31] sm:$0xff] }
  0x5f   : > { %4163 = vmatpush3.bf16.msra.mxu1 %v4160_v11  ;;  %v581_v11 = vld [vmem:[%s6675_s1 + $0x270] sm:$0xff]  ;;  %v5118_v33 = vld [vmem:[%s4859_s7 + $0x21] sm:$0xff]  ;;  %v459_v43 = vld [vmem:[%s6675_s1 + $0x98] sm:$0xff] }
  0x60   : > { %4165 = vmatprep.subr.bf16.mxu1 %v4164_v18  ;;  %v4134_v21 = vpack.c.bf16 %v582_v13, %v581_v11  ;;  %v5144_v46 = vld [vmem:[%s4859_s7 + $0x20] sm:$0xff]  ;;  %v4196_v50 = vpack.c.bf16 %v459_v43, %v458_v42  ;;  %v479_v54 = vld [vmem:[%s6675_s1 + $0x138] sm:$0xff]  ;;  %v5171_v60 = vld [vmem:[%s4859_s7 + $0x30] sm:$0xff] }
  0x61   : > { %4111 = vmatpush1.bf16.msra.mxu0 %v4110_v19  ;;  %v455_v19 = vld [vmem:[%s6675_s1 + $0x78] sm:$0xff]  ;;  %v460_v55 = vld [vmem:[%s6675_s1 + $0xa0] sm:$0xff]  ;;  %v481_v3 = vld [vmem:[%s6675_s1 + $0x148] sm:$0xff] }
  0x62   : > { %4112 = vmatprep.subr.bf16.mxu0 %v6680_v36  ;;  %v5152_v51 = vld [vmem:[%s4859_s7 + $0xfa] sm:$0xff]  ;;  %v462_v4 = vld [vmem:[%s6675_s1 + $0xb0] sm:$0xff]  ;;  %v465_v17 = vld [vmem:[%s6675_s1 + $0xc8] sm:$0xff] }
  0x63   : > { %4167 = vmatpush3.bf16.msra.mxu1 %v4164_v18  ;;  %v454_v18 = vld [vmem:[%s6675_s1 + $0x70] sm:$0xff]  ;;  %6687 = vst [vmem:[#allocation4_spill] sm:$0xff] %v5152_v51  ;;  %v400_v59 = vld [vmem:[%s4859_s7 + $0x1] sm:$0xff]  ;;  %v5193_v7 = vld [vmem:[%s4859_s7 + $0x38] sm:$0xff] }
  0x64   : > { %4168 = vmatprep.subr.bf16.mxu1 %v6680_v36  ;;  %v4190_v23 = vpack.c.bf16 %v455_v19, %v454_v18  ;;  %v5196_v8 = vld [vmem:[%s4859_s7 + $0x49] sm:$0xff]  ;;  %v464_v16 = vld [vmem:[%s6675_s1 + $0xc0] sm:$0xff]  ;;  %v5217_v19 = vld [vmem:[%s4859_s7 + $0x51] sm:$0xff] }
  0x65   : > { %4114 = vmatpush1.bf16.msra.mxu0 %v4113_v24  ;;  %v5096_v24 = vld [vmem:[%s4859_s7 + $0xca] sm:$0xff]  ;;  %v487_v42 = vld [vmem:[%s6675_s1 + $0x178] sm:$0xff]  ;;  %v468_v43 = vld [vmem:[%s6675_s1 + $0xe0] sm:$0xff] }
  0x66   : > { %3767 = vmatmul.mubr.f32.vlgmr.msra.gmra.mrb[0].mxu1 %v4942_v27  ;;  %4115 = vmatprep.subr.bf16.mxu0 %v6680_v36  ;;  %v482_v13 = vld [vmem:[%s6675_s1 + $0x150] sm:$0xff]  ;;  %v5214_v18 = vld [vmem:[%s4859_s7 + $0x48] sm:$0xff] }
  0x67   : > { %4170 = vmatpush1.bf16.msra.mxu1 %v4169_v28  ;;  %3769 = vmatprep.mubr.f32.mxu1 %v4952_v31  ;;  %v456_v28 = vld [vmem:[%s6675_s1 + $0x80] sm:$0xff]  ;;  %v485_v25 = vld [vmem:[%s6675_s1 + $0x168] sm:$0xff]  ;;  %v466_v26 = vld [vmem:[%s6675_s1 + $0xd0] sm:$0xff] }
  0x68   : > { %4171 = vmatprep.subr.bf16.mxu1 %v6680_v36 }
  0x69   : > { %4117 = vmatpush1.bf16.msra.mxu0 %v4116_v32  ;;  %v5115_v32 = vld [vmem:[%s4859_s7 + $0x18] sm:$0xff] }
  0x6a   : > { %4118 = vmatprep.subr.bf16.mxu0 %v6680_v36  ;;  %3770 = vmatmul.mubr.f32.gmra.mrb[2].mxu1 %v4964_v37 }
  0x6b   : > { %4173 = vmatpush1.bf16.msra.mxu1 %v4172_v35  ;;  %3772 = vmatprep.mubr.f32.mxu1 %v4974_v40  ;;  %v4193_v35 = vpack.c.bf16 %v457_v29, %v456_v28  ;;  %v467_v28 = vld [vmem:[%s6675_s1 + $0xd8] sm:$0xff]  ;;  %v5235_v29 = vld [vmem:[%s4859_s7 + $0x50] sm:$0xff] }
  0x6c   : > { %4174 = vmatprep.subr.bf16.mxu1 %v6680_v36 }
  0x6d   : > { %4120 = vmatpush1.bf16.msra.mxu0 %v4119_v41  ;;  %v477_v41 = vld [vmem:[%s6675_s1 + $0x128] sm:$0xff] }
  0x6e   : > { %4121 = vmatprep.subr.bf16.mxu0 %v6680_v36  ;;  %3773 = vmatmul.mubr.f32.gmra.mrb[4].mxu1 %v4986_v45 }
  0x6f   : > { %4176 = vmatpush1.bf16.msra.mxu1 %v4175_v44  ;;  %3775 = vmatprep.mubr.f32.mxu1 %v4996_v48  ;;  %v5140_v44 = vld [vmem:[%s4859_s7 + $0xf2] sm:$0xff] }
  0x70   : > { %4177 = vmatprep.subr.bf16.mxu1 %v6680_v36 }
  0x71   : > { %4123 = vmatpush1.bf16.msra.mxu0 %v4122_v49  ;;  %v4224_v49 = vpack.c.bf16 %v477_v41, %v476_v39  ;;  %v4208_v39 = vpack.c.bf16 %v467_v28, %v466_v26  ;;  %v486_v41 = vld [vmem:[%s6675_s1 + $0x170] sm:$0xff]  ;;  %v381_v28 = vld [vmem:[%s4859_s7 + $0x8] sm:$0xff] }
  0x72   : > { %4124 = vmatprep.subr.bf16.mxu0 %v6680_v36  ;;  %3776 = vmatmul.mubr.f32.gmra.mrb[6].mxu1 %v5008_v53  ;;  %v5315_v26 = vld [vmem:[%s4859_s7 + $0x91] sm:$0xff] }
  0x73   : > { %4179 = vmatpush1.bf16.msra.mxu1 %v4178_v52  ;;  %3778 = vmatprep.mubr.f32.mxu1 %v5018_v56  ;;  %v478_v52 = vld [vmem:[%s6675_s1 + $0x130] sm:$0xff] }
  0x74   : > { %4180 = vmatprep.subr.bf16.mxu1 %v6680_v36  ;;  %v4228_v63 = vpack.c.bf16 %v479_v54, %v478_v52  ;;  %v5259_v52 = vld [vmem:[%s4859_s7 + $0x69] sm:$0xff]  ;;  %v4244_v54 = vpack.c.bf16 %v487_v42, %v486_v41 }
  0x75   : > { %4126 = vmatpush1.bf16.msra.mxu0 %v4125_v58  ;;  %v461_v58 = vld [vmem:[%s6675_s1 + $0xa8] sm:$0xff]  ;;  %v5328_v42 = vld [vmem:[%s4859_s7 + $0x90] sm:$0xff] }
  0x76   : > { %4127 = vmatprep.subr.bf16.mxu0 %v6680_v36  ;;  %3779 = vmatmul.mubr.f32.gmra.mrb[8].mxu1 %v5030_v62  ;;  %v4199_v0 = vpack.c.bf16 %v461_v58, %v460_v55  ;;  %v1354_v58 = vld [vmem:[%s6675_s1 + $0x400] sm:$0xff]  ;;  %v1327_v41 = vld [vmem:[%s6675_s1 + $0x328] sm:$0xff] }
  0x77   : > { %4182 = vmatpush1.bf16.msra.mxu1 %v4181_v61  ;;  %3781 = vmatprep.mubr.f32.mxu1 %v5040_v1  ;;  %v5174_v61 = vld [vmem:[%s4859_s7 + $0x39] sm:$0xff] }
  0x78   : > { %4183 = vmatprep.subr.bf16.mxu1 %v6680_v36 }
  0x79   : > { %4129 = vmatpush1.bf16.msra.mxu0 %v4128_v2  ;;  %v480_v2 = vld [vmem:[%s6675_s1 + $0x140] sm:$0xff] }
  0x7a   : > { %4130 = vmatprep.subr.bf16.mxu0 %v6680_v36  ;;  %3782 = vmatmul.mubr.f32.gmra.mrb[10].mxu1 %v5052_v6 }
  0x7b   : > { %4185 = vmatpush1.bf16.msra.mxu1 %v4184_v5  ;;  %3784 = vmatprep.mubr.f32.mxu1 %v5062_v9  ;;  %v463_v5 = vld [vmem:[%s6675_s1 + $0xb8] sm:$0xff] }
  0x7c   : > { %4186 = vmatprep.subr.bf16.mxu1 %v6680_v36  ;;  %v4202_v11 = vpack.c.bf16 %v463_v5, %v462_v4 }
  0x7d   : > { %4132 = vmatpush1.bf16.msra.mxu0 %v4131_v10  ;;  %v4232_v10 = vpack.c.bf16 %v481_v3, %v480_v2  ;;  %v5277_v2 = vld [vmem:[%s4859_s7 + $0x68] sm:$0xff]  ;;  %v5280_v3 = vld [vmem:[%s4859_s7 + $0x79] sm:$0xff] }
  0x7e   : > { %4133 = vmatprep.subr.bf16.mxu0 %v6680_v36  ;;  %3785 = vmatmul.mubr.f32.gmra.mrb[12].mxu1 %v5074_v15 }
  0x7f   : > { %4188 = vmatpush1.bf16.msra.mxu1 %v4187_v14  ;;  %3787 = vmatprep.mubr.f32.mxu1 %v5090_v20  ;;  %v483_v14 = vld [vmem:[%s6675_s1 + $0x158] sm:$0xff] }
  0x80   : > { %4189 = vmatprep.subr.bf16.mxu1 %v6680_v36 }
  0x81   : > { %4135 = vmatpush1.bf16.msra.mxu0 %v4134_v21  ;;  %v4236_v21 = vpack.c.bf16 %v483_v14, %v482_v13  ;;  %v5294_v13 = vld [vmem:[%s4859_s7 + $0x78] sm:$0xff]  ;;  %v5297_v14 = vld [vmem:[%s4859_s7 + $0x81] sm:$0xff] }
  0x82   : > { %3788 = vmatmul.mubr.f32.gmra.mrb[14].mxu1 %v5096_v24  ;;  %4217 = vmatprep.subr.bf16.mxu0 %v4216_v22 }
  0x83   : > { %4191 = vmatpush1.bf16.msra.mxu1 %v4190_v23  ;;  %3790 = vmatprep.mubr.f32.mxu1 %v5112_v30  ;;  %v484_v23 = vld [vmem:[%s6675_s1 + $0x160] sm:$0xff] }
  0x84   : > { %664 = vmatmul.mubr.f32.vlgmr.msra.gmra.mrb[0].mxu0 %v5115_v32  ;;  %4192 = vmatprep.subr.bf16.mxu1 %v6680_v36 }
  0x85   : > { %668 = vmatprep.mubr.f32.mxu0 %v5118_v33  ;;  %4219 = vmatpush3.bf16.msra.mxu0 %v4216_v22  ;;  %v4205_v22 = vpack.c.bf16 %v465_v17, %v464_v16  ;;  %v380_v16 = vld [vmem:[%s4859_s7] sm:$0xff] }
  0x86   : > { %3791 = vmatmul.mubr.f32.gmra.mrb[16].mxu1 %v5123_v38  ;;  %4221 = vmatprep.subr.bf16.mxu0 %v4220_v34 }
  0x87   : > { %4194 = vmatpush1.bf16.msra.mxu1 %v4193_v35  ;;  %3793 = vmatprep.mubr.f32.mxu1 %v5140_v44  ;;  %v4240_v35 = vpack.c.bf16 %v485_v25, %v484_v23  ;;  %v1325_v23 = vld [vmem:[%s6675_s1 + $0x318] sm:$0xff]  ;;  %v5312_v25 = vld [vmem:[%s4859_s7 + $0x80] sm:$0xff] }
  0x88   : > { %669 = vmatmul.mubr.f32.gmra.mrb[2].mxu0 %v5144_v46  ;;  %4195 = vmatprep.subr.bf16.mxu1 %v6680_v36 }
  0x89   : > { %673 = vmatprep.mubr.f32.mxu0 %v5147_v47  ;;  %4223 = vmatpush3.bf16.msra.mxu0 %v4220_v34  ;;  %v5238_v34 = vld [vmem:[%s4859_s7 + $0x61] sm:$0xff] }
  0x8a   : > { %3794 = vmatmul.mubr.f32.gmra.mrb[18].mxu1 %v5152_v51  ;;  %4225 = vmatprep.subr.bf16.mxu0 %v4224_v49  ;;  %v1359_v51 = vld [vmem:[%s6675_s1 + $0x428] sm:$0xff] }
  0x8b   : > { %4197 = vmatpush1.bf16.msra.mxu1 %v4196_v50  ;;  %993 = vmatprep.mubr.f32.mxu1 %v400_v59  ;;  %v5256_v50 = vld [vmem:[%s4859_s7 + $0x60] sm:$0xff]  ;;  %v1355_v59 = vld [vmem:[%s6675_s1 + $0x408] sm:$0xff] }
  0x8c   : > { %674 = vmatmul.mubr.f32.gmra.mrb[4].mxu0 %v5171_v60  ;;  %4198 = vmatprep.subr.bf16.mxu1 %v6680_v36  ;;  %v5282_v4 = vpack.c.bf16 %v1355_v59, %v1354_v58  ;;  %v5344_v58 = vld [vmem:[%s4859_s7 + $0x98] sm:$0xff] }
  0x8d   : > { %678 = vmatprep.mubr.f32.mxu0 %v5174_v61  ;;  %4227 = vmatpush3.bf16.msra.mxu0 %v4224_v49  ;;  %v469_v49 = vld [vmem:[%s6675_s1 + $0xe8] sm:$0xff] }
  0x8e   : > { %4229 = vmatprep.subr.bf16.mxu0 %v4228_v63  ;;  %v4211_v55 = vpack.c.bf16 %v469_v49, %v468_v43  ;;  %v5331_v43 = vld [vmem:[%s4859_s7 + $0x99] sm:$0xff] }
  0x8f   : > { %4200 = vmatpush1.bf16.msra.mxu1 %v4199_v0  ;;  %v471_v0 = vld [vmem:[%s6675_s1 + $0xf8] sm:$0xff] }
  0x90   : > { %679 = vmatmul.mubr.f32.gmra.mrb[6].mxu0 %v5193_v7  ;;  %4201 = vmatprep.subr.bf16.mxu1 %v6680_v36 }
  0x91   : > { %683 = vmatprep.mubr.f32.mxu0 %v5196_v8  ;;  %4231 = vmatpush3.bf16.msra.mxu0 %v4228_v63  ;;  %v470_v63 = vld [vmem:[%s6675_s1 + $0xf0] sm:$0xff] }
  0x92   : > { %4233 = vmatprep.subr.bf16.mxu0 %v4232_v10  ;;  %v4214_v5 = vpack.c.bf16 %v471_v0, %v470_v63  ;;  %v1330_v63 = vld [vmem:[%s6675_s1 + $0x340] sm:$0xff]  ;;  %v5361_v0 = vld [vmem:[%s4859_s7 + $0xa8] sm:$0xff] }
  0x93   : > { %4203 = vmatpush1.bf16.msra.mxu1 %v4202_v11  ;;  %v1323_v11 = vld [vmem:[%s6675_s1 + $0x308] sm:$0xff] }
  0x94   : > { %684 = vmatmul.mubr.f32.gmra.mrb[8].mxu0 %v5214_v18  ;;  %4204 = vmatprep.subr.bf16.mxu1 %v6680_v36 }
  0x95   : > { %688 = vmatprep.mubr.f32.mxu0 %v5217_v19  ;;  %4235 = vmatpush3.bf16.msra.mxu0 %v4232_v10  ;;  %v1322_v10 = vld [vmem:[%s6675_s1 + $0x300] sm:$0xff] }
  0x96   : > { %4237 = vmatprep.subr.bf16.mxu0 %v4236_v21  ;;  %v4249_v17 = vpack.c.bf16 %v1323_v11, %v1322_v10  ;;  %v1332_v10 = vld [vmem:[%s6675_s1 + $0x350] sm:$0xff] }
  0x97   : > { %4206 = vmatpush1.bf16.msra.mxu1 %v4205_v22  ;;  %v1324_v22 = vld [vmem:[%s6675_s1 + $0x310] sm:$0xff] }
  0x98   : > { %689 = vmatmul.mubr.f32.gmra.mrb[10].mxu0 %v5235_v29  ;;  %4207 = vmatprep.subr.bf16.mxu1 %v6680_v36  ;;  %v5378_v11 = vld [vmem:[%s4859_s7 + $0xb0] sm:$0xff] }
  0x99   : > { %693 = vmatprep.mubr.f32.mxu0 %v5238_v34  ;;  %4239 = vmatpush3.bf16.msra.mxu0 %v4236_v21  ;;  %v401_v21 = vld [vmem:[%s4859_s7 + $0x9] sm:$0xff] }
  0x9a   : > { %4241 = vmatprep.subr.bf16.mxu0 %v4240_v35 }
  0x9b   : > { %4209 = vmatpush1.bf16.msra.mxu1 %v4208_v39  ;;  %v1326_v39 = vld [vmem:[%s6675_s1 + $0x320] sm:$0xff] }
  0x9c   : > { %694 = vmatmul.mubr.f32.gmra.mrb[12].mxu0 %v5256_v50  ;;  %4210 = vmatprep.subr.bf16.mxu1 %v6680_v36  ;;  %v4255_v49 = vpack.c.bf16 %v1327_v41, %v1326_v39  ;;  %v1336_v39 = vld [vmem:[%s6675_s1 + $0x370] sm:$0xff]  ;;  %v1337_v41 = vld [vmem:[%s6675_s1 + $0x378] sm:$0xff] }
  0x9d   : > { %698 = vmatprep.mubr.f32.mxu0 %v5259_v52  ;;  %4243 = vmatpush3.bf16.msra.mxu0 %v4240_v35  ;;  %v4252_v35 = vpack.c.bf16 %v1325_v23, %v1324_v22  ;;  %v1335_v22 = vld [vmem:[%s6675_s1 + $0x368] sm:$0xff]  ;;  %v5395_v23 = vld [vmem:[%s4859_s7 + $0xc0] sm:$0xff] }
  0x9e   : > { %4245 = vmatprep.subr.bf16.mxu0 %v4244_v54 }
  0x9f   : > { %4212 = vmatpush1.bf16.msra.mxu1 %v4211_v55  ;;  %v1329_v55 = vld [vmem:[%s6675_s1 + $0x338] sm:$0xff] }
  0xa0   : > { %699 = vmatmul.mubr.f32.gmra.mrb[14].mxu0 %v5277_v2  ;;  %4213 = vmatprep.subr.bf16.mxu1 %v6680_v36 }
  0xa1   : > { %703 = vmatprep.mubr.f32.mxu0 %v5280_v3  ;;  %4247 = vmatpush3.bf16.msra.mxu0 %v4244_v54  ;;  %v1328_v54 = vld [vmem:[%s6675_s1 + $0x330] sm:$0xff] }
  0xa2   : > { %4297 = vmatprep.subr.bf16.mxu0 %v5282_v4  ;;  %v4258_v59 = vpack.c.bf16 %v1329_v55, %v1328_v54  ;;  %v5416_v54 = vld [vmem:[%s4859_s7 + $0xd9] sm:$0xff]  ;;  %v4270_v55 = vpack.c.bf16 %v1337_v41, %v1336_v39  ;;  %v1343_v41 = vld [vmem:[%s6675_s1 + $0x3a8] sm:$0xff] }
  0xa3   : > { %4215 = vmatpush1.bf16.msra.mxu1 %v4214_v5  ;;  %v1342_v39 = vld [vmem:[%s6675_s1 + $0x3a0] sm:$0xff] }
  0xa4   : > { %704 = vmatmul.mubr.f32.gmra.mrb[16].mxu0 %v5294_v13  ;;  %4248 = vmatprep.subr.bf16.mxu1 %v6680_v36 }
  0xa5   : > { %708 = vmatprep.mubr.f32.mxu0 %v5297_v14 }
  0xa6   : > { %994 = vmatmul.mubr.f32.vlgmr.msra.gmra.mrb[20].mxu1 %v380_v16  ;;  %v5382_v16 = vld [vmem:[%s4859_s7 + $0xc1] sm:$0xff] }
  0xa7   : > { %4250 = vmatpush1.bf16.msra.mxu1 %v4249_v17  ;;  %998 = vmatprep.mubr.f32.mxu1 %v401_v21  ;;  %v1334_v21 = vld [vmem:[%s6675_s1 + $0x360] sm:$0xff] }
  0xa8   : > { %709 = vmatmul.mubr.f32.gmra.mrb[18].mxu0 %v5312_v25  ;;  %4251 = vmatprep.subr.bf16.mxu1 %v6680_v36 }
  0xa9   : > { %713 = vmatprep.mubr.f32.mxu0 %v5315_v26 }
  0xaa   : > { %999 = vmatmul.mubr.f32.gmra.mrb[22].mxu1 %v381_v28  ;;  %v5399_v28 = vld [vmem:[%s4859_s7 + $0xc9] sm:$0xff] }
  0xab   : > { %4253 = vmatpush1.bf16.msra.mxu1 %v4252_v35  ;;  %1003 = vmatprep.mubr.f32.mxu1 %v4905_v12  ;;  %v5348_v12 = vld [vmem:[%s4859_s7 + $0xa9] sm:$0xff]  ;;  %v4267_v35 = vpack.c.bf16 %v1335_v22, %v1334_v21  ;;  %v5446_v21 = vld [vmem:[%s4859_s7 + $0xe0] sm:$0xff]  ;;  %v5450_v22 = vld [vmem:[%s4859_s7 + $0xf1] sm:$0xff] }
  0xac   : > { %714 = vmatmul.mubr.f32.gmra.mrb[20].mxu0 %v5328_v42  ;;  %4254 = vmatprep.subr.bf16.mxu1 %v6680_v36  ;;  %6688 = vst [vmem:[#allocation5_spill] sm:$0xff] %v5450_v22 }
  0xad   : > { %718 = vmatprep.mubr.f32.mxu0 %v5331_v43 }
  0xae   : > { %1004 = vmatmul.mubr.f32.gmra.mrb[24].mxu1 %v5115_v32  ;;  %v1331_v32 = vld [vmem:[%s6675_s1 + $0x348] sm:$0xff] }
  0xaf   : > { %1008 = vmatprep.mubr.f32.mxu1 %v5118_v33  ;;  %4256 = vmatpush1.bf16.msra.mxu1 %v4255_v49  ;;  %v5365_v33 = vld [vmem:[%s4859_s7 + $0xb1] sm:$0xff]  ;;  %v4261_v5 = vpack.c.bf16 %v1331_v32, %v1330_v63  ;;  %v5412_v49 = vld [vmem:[%s4859_s7 + $0xc8] sm:$0xff] }
  0xb0   : > { %719 = vmatmul.mubr.f32.gmra.mrb[22].mxu0 %v5344_v58  ;;  %4257 = vmatprep.subr.bf16.mxu1 %v6680_v36  ;;  %v1339_v63 = vld [vmem:[%s6675_s1 + $0x388] sm:$0xff]  ;;  %v5429_v32 = vld [vmem:[%s4859_s7 + $0xd8] sm:$0xff] }
  0xb1   : > { %723 = vmatprep.mubr.f32.mxu0 %v5348_v12 }
  0xb2   : > { %1009 = vmatmul.mubr.f32.gmra.mrb[26].mxu1 %v5144_v46  ;;  %v1333_v46 = vld [vmem:[%s6675_s1 + $0x358] sm:$0xff] }
  0xb3   : > { %1013 = vmatprep.mubr.f32.mxu1 %v5147_v47  ;;  %4259 = vmatpush1.bf16.msra.mxu1 %v4258_v59  ;;  %v4264_v17 = vpack.c.bf16 %v1333_v46, %v1332_v10  ;;  %v1338_v59 = vld [vmem:[%s6675_s1 + $0x380] sm:$0xff]  ;;  %v1340_v46 = vld [vmem:[%s6675_s1 + $0x390] sm:$0xff] }
  0xb4   : > { %724 = vmatmul.mubr.f32.gmra.mrb[24].mxu0 %v5361_v0  ;;  %4260 = vmatprep.subr.bf16.mxu1 %v6680_v36  ;;  %v4273_v10 = vpack.c.bf16 %v1339_v63, %v1338_v59  ;;  %v5467_v59 = vld [vmem:[%s4859_s7 + $0xf9] sm:$0xff]  ;;  %v4279_v63 = vpack.c.bf16 %v1343_v41, %v1342_v39  ;;  %v1356_v41 = vld [vmem:[%s6675_s1 + $0x410] sm:$0xff] }
  0xb5   : > { %728 = vmatprep.mubr.f32.mxu0 %v5365_v33  ;;  %6690 = vst [vmem:[#allocation7_spill] sm:$0xff] %v5467_v59 }
  0xb6   : > { %1014 = vmatmul.mubr.f32.gmra.mrb[28].mxu1 %v5171_v60 }
  0xb7   : > { %1018 = vmatprep.mubr.f32.mxu1 %v5174_v61  ;;  %4262 = vmatpush1.bf16.msra.mxu1 %v4261_v5  ;;  %v5433_v5 = vld [vmem:[%s4859_s7 + $0xe1] sm:$0xff] }
  0xb8   : > { %729 = vmatmul.mubr.f32.gmra.mrb[26].mxu0 %v5378_v11  ;;  %4263 = vmatprep.subr.bf16.mxu1 %v6680_v36 }
  0xb9   : > { %733 = vmatprep.mubr.f32.mxu0 %v5382_v16 }
  0xba   : > { %1019 = vmatmul.mubr.f32.gmra.mrb[30].mxu1 %v5193_v7 }
  0xbb   : > { %1023 = vmatprep.mubr.f32.mxu1 %v5196_v8  ;;  %4265 = vmatpush1.bf16.msra.mxu1 %v4264_v17  ;;  %v1341_v17 = vld [vmem:[%s6675_s1 + $0x398] sm:$0xff] }
  0xbc   : > { %734 = vmatmul.mubr.f32.gmra.mrb[28].mxu0 %v5395_v23  ;;  %4266 = vmatprep.subr.bf16.mxu1 %v6680_v36 }
  0xbd   : > { %738 = vmatprep.mubr.f32.mxu0 %v5399_v28 }
  0xbe   : > { %1024 = vmatmul.mubr.f32.gmra.mrb[32].mxu1 %v5214_v18 }
  0xbf   : > { %1028 = vmatprep.mubr.f32.mxu1 %v5217_v19  ;;  %4268 = vmatpush1.bf16.msra.mxu1 %v4267_v35  ;;  %v4276_v35 = vpack.c.bf16 %v1341_v17, %v1340_v46  ;;  %v1345_v46 = vld [vmem:[%s6675_s1 + $0x3b8] sm:$0xff] }
  0xc0   : > { %739 = vmatmul.mubr.f32.gmra.mrb[30].mxu0 %v5412_v49  ;;  %4269 = vmatprep.subr.bf16.mxu1 %v6680_v36  ;;  %v5480_v17 = vld [vmem:[%s4859_s7 + $0xf8] sm:$0xff] }
  0xc1   : > { %743 = vmatprep.mubr.f32.mxu0 %v5416_v54  ;;  %6691 = vst [vmem:[#allocation8_spill] sm:$0xff] %v5480_v17 }
  0xc2   : > { %1029 = vmatmul.mubr.f32.gmra.mrb[34].mxu1 %v5235_v29 }
  0xc3   : > { %1033 = vmatprep.mubr.f32.mxu1 %v5238_v34  ;;  %4271 = vmatpush1.bf16.msra.mxu1 %v4270_v55  ;;  %v5463_v55 = vld [vmem:[%s4859_s7 + $0xf0] sm:$0xff] }
  0xc4   : > { %744 = vmatmul.mubr.f32.gmra.mrb[32].mxu0 %v5429_v32  ;;  %4272 = vmatprep.subr.bf16.mxu1 %v6680_v36  ;;  %6689 = vst [vmem:[#allocation6_spill] sm:$0xff] %v5463_v55 }
  0xc5   : > { %748 = vmatprep.mubr.f32.mxu0 %v5433_v5 }
  0xc6   : > { %1034 = vmatmul.mubr.f32.gmra.mrb[36].mxu1 %v5256_v50 }
  0xc7   : > { %1038 = vmatprep.mubr.f32.mxu1 %v5259_v52  ;;  %4274 = vmatpush1.bf16.msra.mxu1 %v4273_v10  ;;  %v1344_v10 = vld [vmem:[%s6675_s1 + $0x3b0] sm:$0xff] }
  0xc8   : > { %749 = vmatmul.mubr.f32.gmra.mrb[34].mxu0 %v5446_v21  ;;  %4275 = vmatprep.subr.bf16.mxu1 %v6680_v36  ;;  %v4282_v39 = vpack.c.bf16 %v1345_v46, %v1344_v10  ;;  %v421_v10 = vld [vmem:[%s4859_s7 + $0xa] sm:$0xff] }
  0xc9   : > { %753 = vmatprep.mubr.f32.mxu0 %v5450_v22 }
  0xca   : > { %1039 = vmatmul.mubr.f32.gmra.mrb[38].mxu1 %v5277_v2 }
  0xcb   : > { %1043 = vmatprep.mubr.f32.mxu1 %v5280_v3  ;;  %4277 = vmatpush1.bf16.msra.mxu1 %v4276_v35  ;;  %v420_v35 = vld [vmem:[%s4859_s7 + $0x2] sm:$0xff] }
  0xcc   : > { %754 = vmatmul.mubr.f32.gmra.mrb[36].mxu0 %v5463_v55  ;;  %4278 = vmatprep.subr.bf16.mxu1 %v6680_v36  ;;  %v1357_v36 = vld [vmem:[%s6675_s1 + $0x418] sm:$0xff]  ;;  %v1346_v55 = vld [vmem:[%s6675_s1 + $0x3c0] sm:$0xff] }
  0xcd   : > { %758 = vmatprep.mubr.f32.mxu0 %v5467_v59  ;;  %v6692_v59 = vmov 0.0|0.0   ;;  %v4300_v46 = vpack.c.bf16 %v1357_v36, %v1356_v41  ;;  %v1349_v36 = vld [vmem:[%s6675_s1 + $0x3d8] sm:$0xff]  ;;  %v1360_v41 = vld [vmem:[%s6675_s1 + $0x430] sm:$0xff] }
  0xce   : > { %1044 = vmatmul.mubr.f32.gmra.mrb[40].mxu1 %v5294_v13 }
  0xcf   : > { %1048 = vmatprep.mubr.f32.mxu1 %v5297_v14  ;;  %4280 = vmatpush1.bf16.msra.mxu1 %v4279_v63  ;;  %v1347_v63 = vld [vmem:[%s6675_s1 + $0x3c8] sm:$0xff] }
  0xd0   : > { %759 = vmatmul.mubr.f32.gmra.mrb[38].mxu0 %v5480_v17  ;;  %4281 = vmatprep.subr.bf16.mxu1 %v6692_v59  ;;  %v4285_v22 = vpack.c.bf16 %v1347_v63, %v1346_v55  ;;  %v1358_v17 = vld [vmem:[%s6675_s1 + $0x420] sm:$0xff]  ;;  %v1361_v63 = vld [vmem:[%s6675_s1 + $0x438] sm:$0xff] }
  0xd1   : > { %3828 = vmatprep.mubr.f32.mxu0 %v420_v35  ;;  %v1348_v35 = vld [vmem:[%s6675_s1 + $0x3d0] sm:$0xff]  ;;  %v4304_v55 = vpack.c.bf16 %v1359_v51, %v1358_v17  ;;  %v1351_v51 = vld [vmem:[%s6675_s1 + $0x3e8] sm:$0xff] }
  0xd2   : > { %1049 = vmatmul.mubr.f32.gmra.mrb[42].mxu1 %v5312_v25  ;;  %v1363_v17 = vld [vmem:[%s6675_s1 + $0x448] sm:$0xff] }
  0xd3   : > { %1053 = vmatprep.mubr.f32.mxu1 %v5315_v26  ;;  %4283 = vmatpush1.bf16.msra.mxu1 %v4282_v39  ;;  %v4288_v39 = vpack.c.bf16 %v1349_v36, %v1348_v35  ;;  %v1364_v36 = vld [vmem:[%s6675_s1 + $0x450] sm:$0xff] }
  0xd4   : > { %3829 = vmatmul.mubr.f32.vlgmr.msra.gmra.mrb[40].mxu0 %v421_v10  ;;  %4284 = vmatprep.subr.bf16.mxu1 %v6692_v59  ;;  %v1352_v10 = vld [vmem:[%s6675_s1 + $0x3f0] sm:$0xff] }
  0xd5   : > { %3831 = vmatprep.mubr.f32.mxu0 %v4862_v57  ;;  %4299 = vmatpush3.bf16.msra.mxu0 %v5282_v4  ;;  %v1350_v57 = vld [vmem:[%s6675_s1 + $0x3e0] sm:$0xff]  ;;  %v4308_v4 = vpack.c.bf16 %v1361_v63, %v1360_v41 }
  0xd6   : > { %1054 = vmatmul.mubr.f32.gmra.mrb[44].mxu1 %v5328_v42  ;;  %4301 = vmatprep.subr.bf16.mxu0 %v4300_v46  ;;  %v1366_v63 = vld [vmem:[%s6675_s1 + $0x460] sm:$0xff] }
  0xd7   : > { %1058 = vmatprep.mubr.f32.mxu1 %v5331_v43  ;;  %4286 = vmatpush1.bf16.msra.mxu1 %v4285_v22  ;;  %v1362_v22 = vld [vmem:[%s6675_s1 + $0x440] sm:$0xff] }
  0xd8   : > { %3832 = vmatmul.mubr.f32.gmra.mrb[42].mxu0 %v4942_v27  ;;  %4287 = vmatprep.subr.bf16.mxu1 %v6692_v59  ;;  %v4291_v27 = vpack.c.bf16 %v1351_v51, %v1350_v57  ;;  %v4312_v35 = vpack.c.bf16 %v1363_v17, %v1362_v22  ;;  %v1367_v57 = vld [vmem:[%s6675_s1 + $0x468] sm:$0xff]  ;;  %v1368_v51 = vld [vmem:[%s6675_s1 + $0x470] sm:$0xff] }
  0xd9   : > { %3834 = vmatprep.mubr.f32.mxu0 %v4952_v31  ;;  %4303 = vmatpush3.bf16.msra.mxu0 %v4300_v46  ;;  %v1353_v46 = vld [vmem:[%s6675_s1 + $0x3f8] sm:$0xff] }
  0xda   : > { %1059 = vmatmul.mubr.f32.gmra.mrb[46].mxu1 %v5344_v58  ;;  %4305 = vmatprep.subr.bf16.mxu0 %v4304_v55  ;;  %v4294_v41 = vpack.c.bf16 %v1353_v46, %v1352_v10 }
  0xdb   : > { %1063 = vmatprep.mubr.f32.mxu1 %v5348_v12  ;;  %4289 = vmatpush1.bf16.msra.mxu1 %v4288_v39  ;;  %v1365_v39 = vld [vmem:[%s6675_s1 + $0x458] sm:$0xff] }
  0xdc   : > { %3835 = vmatmul.mubr.f32.gmra.mrb[44].mxu0 %v4964_v37  ;;  %4290 = vmatprep.subr.bf16.mxu1 %v6692_v59 }
  0xdd   : > { %3837 = vmatprep.mubr.f32.mxu0 %v4974_v40  ;;  %4307 = vmatpush3.bf16.msra.mxu0 %v4304_v55  ;;  %v4316_v55 = vpack.c.bf16 %v1365_v39, %v1364_v36 }
  0xde   : > { %1064 = vmatmul.mubr.f32.gmra.mrb[48].mxu1 %v5361_v0  ;;  %4309 = vmatprep.subr.bf16.mxu0 %v4308_v4 }
  0xdf   : > { %1068 = vmatprep.mubr.f32.mxu1 %v5365_v33  ;;  %4292 = vmatpush1.bf16.msra.mxu1 %v4291_v27 }
  0xe0   : > { %3838 = vmatmul.mubr.f32.gmra.mrb[46].mxu0 %v4986_v45  ;;  %4293 = vmatprep.subr.bf16.mxu1 %v6692_v59  ;;  %v4320_v59 = vpack.c.bf16 %v1367_v57, %v1366_v63 }
  0xe1   : > { %3840 = vmatprep.mubr.f32.mxu0 %v4996_v48  ;;  %4311 = vmatpush3.bf16.msra.mxu0 %v4308_v4  ;;  %v1369_v4 = vld [vmem:[%s6675_s1 + $0x478] sm:$0xff] }
  0xe2   : > { %1069 = vmatmul.mubr.f32.gmra.mrb[50].mxu1 %v5378_v11  ;;  %4313 = vmatprep.subr.bf16.mxu0 %v4312_v35  ;;  %v4324_v27 = vpack.c.bf16 %v1369_v4, %v1368_v51 }
  0xe3   : > { %1073 = vmatprep.mubr.f32.mxu1 %v5382_v16  ;;  %4295 = vmatpush1.bf16.msra.mxu1 %v4294_v41 }
  0xe4   : > { %3841 = vmatmul.mubr.f32.gmra.mrb[48].mxu0 %v5008_v53 }
  0xe5   : > { %3843 = vmatprep.mubr.f32.mxu0 %v5018_v56  ;;  %4315 = vmatpush3.bf16.msra.mxu0 %v4312_v35 }
  0xe6   : > { %1074 = vmatmul.mubr.f32.gmra.mrb[52].mxu1 %v5395_v23  ;;  %4317 = vmatprep.subr.bf16.mxu0 %v4316_v55 }
  0xe7   : > { %1078 = vmatprep.mubr.f32.mxu1 %v5399_v28 }
  0xe8   : > { %3844 = vmatmul.mubr.f32.gmra.mrb[50].mxu0 %v5030_v62 }
  0xe9   : > { %3846 = vmatprep.mubr.f32.mxu0 %v5040_v1  ;;  %4319 = vmatpush3.bf16.msra.mxu0 %v4316_v55 }
  0xea   : > { %1079 = vmatmul.mubr.f32.gmra.mrb[54].mxu1 %v5412_v49  ;;  %4321 = vmatprep.subr.bf16.mxu0 %v4320_v59 }
  0xeb   : > { %1083 = vmatprep.mubr.f32.mxu1 %v5416_v54 }
  0xec   : > { %3847 = vmatmul.mubr.f32.gmra.mrb[52].mxu0 %v5052_v6 }
  0xed   : > { %3849 = vmatprep.mubr.f32.mxu0 %v5062_v9  ;;  %4323 = vmatpush3.bf16.msra.mxu0 %v4320_v59 }
  0xee   : > { %1084 = vmatmul.mubr.f32.gmra.mrb[56].mxu1 %v5429_v32  ;;  %4325 = vmatprep.subr.bf16.mxu0 %v4324_v27 }
  0xef   : > { %1088 = vmatprep.mubr.f32.mxu1 %v5433_v5 }
  0xf0   : > { %3850 = vmatmul.mubr.f32.gmra.mrb[54].mxu0 %v5074_v15 }
  0xf1   : > { %3852 = vmatprep.mubr.f32.mxu0 %v5090_v20  ;;  %4327 = vmatpush3.bf16.msra.mxu0 %v4324_v27 }
  0xf2   : > { %1089 = vmatmul.mubr.f32.gmra.mrb[58].mxu1 %v5446_v21 }
  0xf3   : > { %1434 = vmatprep.mubr.f32.mxu1 %v5147_v47 }
  0xf4   : > { %3853 = vmatmul.mubr.f32.gmra.mrb[56].mxu0 %v5096_v24 }
  0xf5   : > { %3855 = vmatprep.mubr.f32.mxu0 %v5112_v30 }
  0xf6   : > { %1435 = vmatmul.mubr.f32.vlgmr.msra.gmra.mrb[60].mxu1 %v5171_v60 }
  0xf7   : > { %1439 = vmatprep.mubr.f32.mxu1 %v5174_v61 }
  0xf8   : > { %3856 = vmatmul.mubr.f32.gmra.mrb[58].mxu0 %v5123_v38 }
  0xf9   : > { %3890 = vmatprep.mubr.f32.mxu0 %v4952_v31  ;;  %v3281_v31 = vld [vmem:[%s4859_s7 + $0x10a] sm:$0xff] }
  0xfa   : > { %1440 = vmatmul.mubr.f32.gmra.mrb[62].mxu1 %v5193_v7 }
  0xfb   : > { %1444 = vmatprep.mubr.f32.mxu1 %v5196_v8 }
  0xfc   : > { %3891 = vmatmul.mubr.f32.vlgmr.msra.gmra.mrb[60].mxu0 %v4964_v37  ;;  %v6693_v37 = vld [vmem:[#allocation4_spill] sm:$0xff] }
  0xfd   : > { %3893 = vmatprep.mubr.f32.mxu0 %v4974_v40  ;;  %v3282_v40 = vld [vmem:[%s4859_s7 + $0x112] sm:$0xff] }
  0xfe   : > { %1445 = vmatmul.mubr.f32.gmra.mrb[64].mxu1 %v5214_v18 }
  0xff   : > { %1449 = vmatprep.mubr.f32.mxu1 %v5217_v19 }
 0x100   : > { %3894 = vmatmul.mubr.f32.gmra.mrb[62].mxu0 %v4986_v45  ;;  %v6694_v45 = vld [vmem:[#allocation5_spill] sm:$0xff] }
 0x101   : > { %3896 = vmatprep.mubr.f32.mxu0 %v4996_v48  ;;  %v6695_v48 = vld [vmem:[#allocation6_spill] sm:$0xff] }
 0x102   : > { %1450 = vmatmul.mubr.f32.gmra.mrb[66].mxu1 %v5235_v29 }
 0x103   : > { %1454 = vmatprep.mubr.f32.mxu1 %v5238_v34 }
 0x104   : > { %3897 = vmatmul.mubr.f32.gmra.mrb[64].mxu0 %v5008_v53  ;;  %v6696_v53 = vld [vmem:[#allocation7_spill] sm:$0xff] }
 0x105   : > { %3899 = vmatprep.mubr.f32.mxu0 %v5018_v56  ;;  %v3261_v56 = vld [vmem:[%s4859_s7 + $0x109] sm:$0xff] }
 0x106   : > { %1455 = vmatmul.mubr.f32.gmra.mrb[68].mxu1 %v5256_v50 }
 0x107   : > { %1459 = vmatprep.mubr.f32.mxu1 %v5259_v52 }
 0x108   : > { %3900 = vmatmul.mubr.f32.gmra.mrb[66].mxu0 %v5030_v62 }
 0x109   : > { %3902 = vmatprep.mubr.f32.mxu0 %v5040_v1 }
 0x10a   : > { %1460 = vmatmul.mubr.f32.gmra.mrb[70].mxu1 %v5277_v2 }
 0x10b   : > { %1464 = vmatprep.mubr.f32.mxu1 %v5280_v3 }
 0x10c   : > { %3903 = vmatmul.mubr.f32.gmra.mrb[68].mxu0 %v5052_v6  ;;  %v6697_v6 = vld [vmem:[#allocation8_spill] sm:$0xff] }
 0x10d   : > { %3905 = vmatprep.mubr.f32.mxu0 %v5062_v9  ;;  %v3241_v9 = vld [vmem:[%s4859_s7 + $0x108] sm:$0xff] }
 0x10e   : > { %1465 = vmatmul.mubr.f32.gmra.mrb[72].mxu1 %v5294_v13 }
 0x10f   : > { %1469 = vmatprep.mubr.f32.mxu1 %v5297_v14 }
 0x110   : > { %3906 = vmatmul.mubr.f32.gmra.mrb[70].mxu0 %v5074_v15  ;;  %v3262_v15 = vld [vmem:[%s4859_s7 + $0x111] sm:$0xff] }
 0x111   : > { %3908 = vmatprep.mubr.f32.mxu0 %v5090_v20 }
 0x112   : > { %1470 = vmatmul.mubr.f32.gmra.mrb[74].mxu1 %v5312_v25 }
 0x113   : > { %1474 = vmatprep.mubr.f32.mxu1 %v5315_v26 }
 0x114   : > { %3909 = vmatmul.mubr.f32.gmra.mrb[72].mxu0 %v5096_v24 }
 0x115   : > { %3911 = vmatprep.mubr.f32.mxu0 %v5112_v30  ;;  %v3242_v30 = vld [vmem:[%s4859_s7 + $0x110] sm:$0xff] }
 0x116   : > { %1475 = vmatmul.mubr.f32.gmra.mrb[76].mxu1 %v5328_v42 }
 0x117   : > { %1479 = vmatprep.mubr.f32.mxu1 %v5331_v43 }
 0x118   : > { %3912 = vmatmul.mubr.f32.gmra.mrb[74].mxu0 %v5123_v38 }
 0x119   : > { %3914 = vmatprep.mubr.f32.mxu0 %v5140_v44 }
 0x11a   : > { %1480 = vmatmul.mubr.f32.gmra.mrb[78].mxu1 %v5344_v58 }
 0x11b   : > { %1484 = vmatprep.mubr.f32.mxu1 %v5348_v12 }
 0x11c   : > { %3915 = vmatmul.mubr.f32.gmra.mrb[76].mxu0 %v6693_v37 }
 0x11d   : > { %3917 = vmatprep.mubr.f32.mxu0 %v3281_v31 }
 0x11e   : > { %1485 = vmatmul.mubr.f32.gmra.mrb[80].mxu1 %v5361_v0 }
 0x11f   : > { %1489 = vmatprep.mubr.f32.mxu1 %v5365_v33 }
 0x120   : > { %3918 = vmatmul.mubr.f32.gmra.mrb[78].mxu0 %v3282_v40 }
 0x122   : > { %1490 = vmatmul.mubr.f32.gmra.mrb[82].mxu1 %v5378_v11 }
 0x123   : > { %1494 = vmatprep.mubr.f32.mxu1 %v5382_v16 }
 0x126   : > { %1495 = vmatmul.mubr.f32.gmra.mrb[84].mxu1 %v5395_v23 }
 0x127   : > { %1499 = vmatprep.mubr.f32.mxu1 %v5399_v28 }
 0x12a   : > { %1500 = vmatmul.mubr.f32.gmra.mrb[86].mxu1 %v5412_v49 }
 0x12b   : > { %1504 = vmatprep.mubr.f32.mxu1 %v5416_v54 }
 0x12e   : > { %1505 = vmatmul.mubr.f32.gmra.mrb[88].mxu1 %v5429_v32 }
 0x12f   : > { %1509 = vmatprep.mubr.f32.mxu1 %v5433_v5 }
 0x132   : > { %1510 = vmatmul.mubr.f32.gmra.mrb[90].mxu1 %v5446_v21 }
 0x133   : > { %1514 = vmatprep.mubr.f32.mxu1 %v6694_v45 }
 0x136   : > { %1515 = vmatmul.mubr.f32.gmra.mrb[92].mxu1 %v6695_v48 }
 0x137   : > { %1519 = vmatprep.mubr.f32.mxu1 %v6696_v53 }
 0x139   : > { %v3768_v62 = vpop.f32.mrb[0].mxu1 }
 0x13a   : > { %v830_v1 = vpop.f32.mrb[1].mxu1  ;;  %1520 = vmatmul.mubr.f32.gmra.mrb[94].mxu1 %v6697_v6 }
 0x13b   : > { %1524 = vmatprep.mubr.f32.mxu1 %v3261_v56 }
 0x13d   : > { %v3771_v20 = vpop.f32.mrb[2].mxu1 }
 0x13e   : > { %1525 = vmatmul.mubr.f32.gmra.mrb[96].mxu1 %v3241_v9  ;;  %v840_v24 = vpop.f32.mrb[3].mxu1 }
 0x13f   : > { %1529 = vmatprep.mubr.f32.mxu1 %v3262_v15 }
 0x141   : > { %v3774_v38 = vpop.f32.mrb[4].mxu1 }
 0x142   : > { %1530 = vmatmul.mubr.f32.gmra.mrb[98].mxu1 %v3242_v30  ;;  %v850_v44 = vpop.f32.mrb[5].mxu1 }
 0x145   : > { %v3777_v47 = vpop.f32.mrb[6].mxu1 }
 0x146   : > { %v860_v60 = vpop.f32.mrb[7].mxu1 }
 0x149   : > { %v3780_v61 = vpop.f32.mrb[8].mxu1 }
 0x14a   : > { %v870_v7 = vpop.f32.mrb[9].mxu1 }
 0x14d   : > { %v3783_v8 = vpop.f32.mrb[10].mxu1 }
 0x14e   : > { %v880_v18 = vpop.f32.mrb[11].mxu1 }
 0x151   : > { %v5654_v19 = vpop.f32.mrb[12].mxu1 }
 0x152   : > { %v890_v29 = vpop.f32.mrb[13].mxu1 }
 0x155   : > { %v5656_v34 = vpop.f32.mrb[14].mxu1 }
 0x156   : > { %v5658_v50 = vpop.f32.mrb[15].mxu1 }
 0x157   : > { %v665_v52 = vpop.f32.mrb[0].mxu0 }
 0x158   : > { %v831_v2 = vadd.f32 %v830_v1, %v665_v52  ;;  %v667_v3 = vpop.f32.mrb[1].mxu0 }
 0x159   : > { %v5660_v13 = vpop.f32.mrb[16].mxu1 }
 0x15a   : > { %v5662_v14 = vpop.f32.mrb[17].mxu1 }
 0x15b   : > { %v670_v25 = vpop.f32.mrb[2].mxu0 }
 0x15c   : > { %v836_v26 = vadd.f32 %v3768_v62, %v670_v25  ;;  %v672_v42 = vpop.f32.mrb[3].mxu0 }
 0x15d   : > { %v5664_v43 = vpop.f32.mrb[18].mxu1 }
 0x15e   : > { %v5666_v58 = vpop.f32.mrb[19].mxu1 }
 0x15f   : > { %v675_v12 = vpop.f32.mrb[4].mxu0 }
 0x160   : > { %v841_v0 = vadd.f32 %v840_v24, %v675_v12  ;;  %v677_v33 = vpop.f32.mrb[5].mxu0 }
 0x163   : > { %v680_v11 = vpop.f32.mrb[6].mxu0 }
 0x164   : > { %v846_v16 = vadd.f32 %v3771_v20, %v680_v11  ;;  %v682_v23 = vpop.f32.mrb[7].mxu0 }
 0x167   : > { %v685_v28 = vpop.f32.mrb[8].mxu0 }
 0x168   : > { %v851_v49 = vadd.f32 %v850_v44, %v685_v28  ;;  %v687_v54 = vpop.f32.mrb[9].mxu0 }
 0x16b   : > { %v690_v32 = vpop.f32.mrb[10].mxu0 }
 0x16c   : > { %v856_v5 = vadd.f32 %v3774_v38, %v690_v32  ;;  %v692_v21 = vpop.f32.mrb[11].mxu0 }
 0x16f   : > { %v695_v22 = vpop.f32.mrb[12].mxu0 }
 0x170   : > { %v861_v17 = vadd.f32 %v860_v60, %v695_v22  ;;  %v697_v10 = vpop.f32.mrb[13].mxu0 }
 0x173   : > { %v700_v46 = vpop.f32.mrb[14].mxu0 }
 0x174   : > { %v866_v35 = vadd.f32 %v3777_v47, %v700_v46  ;;  %v702_v36 = vpop.f32.mrb[15].mxu0 }
 0x177   : > { %v705_v39 = vpop.f32.mrb[16].mxu0 }
 0x178   : > { %v871_v41 = vadd.f32 %v870_v7, %v705_v39  ;;  %v707_v55 = vpop.f32.mrb[17].mxu0  ;;  %v4687_v39 = vmov 0.0  }
 0x179   : > { %v995_v63 = vpop.f32.mrb[20].mxu1  ;;  %1767 = vst [vmem:[#allocation3] sm:$0x1] %v4687_v39  ;;  %1768 = vst [vmem:[#allocation3 + $0x18] sm:$0x1] %v4687_v39 }
 0x17a   : > { %v5668_v57 = vadd.f32 %v995_v63, %v831_v2  ;;  %v997_v59 = vpop.f32.mrb[21].mxu1  ;;  %1769 = vst [vmem:[#allocation3 + $0x30] sm:$0x1] %v4687_v39  ;;  %1770 = vst [vmem:[#allocation3 + $0x48] sm:$0x1] %v4687_v39 }
 0x17b   : > { %v710_v51 = vpop.f32.mrb[18].mxu0  ;;  %1771 = vst [vmem:[#allocation3 + $0x60] sm:$0x1] %v4687_v39  ;;  %1772 = vst [vmem:[#allocation3 + $0x78] sm:$0x1] %v4687_v39 }
 0x17c   : > { %v876_v4 = vadd.f32 %v3780_v61, %v710_v51  ;;  %v712_v27 = vpop.f32.mrb[19].mxu0  ;;  %1773 = vst [vmem:[#allocation3 + $0x90] sm:$0x1] %v4687_v39  ;;  %1774 = vst [vmem:[#allocation3 + $0xa8] sm:$0x1] %v4687_v39 }
 0x17d   : > { %v1000_v31 = vpop.f32.mrb[22].mxu1  ;;  %1775 = vst [vmem:[#allocation3 + $0xc0] sm:$0x1] %v4687_v39  ;;  %1776 = vst [vmem:[#allocation3 + $0xd8] sm:$0x1] %v4687_v39 }
 0x17e   : > { %v5670_v37 = vadd.f32 %v1000_v31, %v836_v26  ;;  %v1002_v40 = vpop.f32.mrb[23].mxu1  ;;  %1777 = vst [vmem:[#allocation3 + $0x11] sm:$0x1] %v4687_v39  ;;  %1778 = vst [vmem:[#allocation3 + $0x29] sm:$0x1] %v4687_v39 }
 0x17f   : > { %v715_v45 = vpop.f32.mrb[20].mxu0  ;;  %1779 = vst [vmem:[#allocation3 + $0x41] sm:$0x1] %v4687_v39  ;;  %1780 = vst [vmem:[#allocation3 + $0x59] sm:$0x1] %v4687_v39 }
 0x180   : > { %v5672_v48 = vadd.f32 %v880_v18, %v715_v45  ;;  %v717_v53 = vpop.f32.mrb[21].mxu0  ;;  %1781 = vst [vmem:[#allocation3 + $0x71] sm:$0x1] %v4687_v39  ;;  %1782 = vst [vmem:[#allocation3 + $0x89] sm:$0x1] %v4687_v39 }
 0x181   : > { %v1005_v56 = vpop.f32.mrb[24].mxu1  ;;  %1783 = vst [vmem:[#allocation3 + $0xa1] sm:$0x1] %v4687_v39  ;;  %1784 = vst [vmem:[#allocation3 + $0xb9] sm:$0x1] %v4687_v39 }
 0x182   : > { %v5674_v62 = vadd.f32 %v1005_v56, %v841_v0  ;;  %v1007_v1 = vpop.f32.mrb[25].mxu1  ;;  %1785 = vst [vmem:[#allocation3 + $0xd1] sm:$0x1] %v4687_v39  ;;  %1786 = vst [vmem:[#allocation3 + $0xe9] sm:$0x1] %v4687_v39 }
 0x183   : > { %v720_v6 = vpop.f32.mrb[22].mxu0 }
 0x184   : > { %v5676_v9 = vadd.f32 %v3783_v8, %v720_v6  ;;  %v722_v15 = vpop.f32.mrb[23].mxu0 }
 0x185   : > { %v1010_v20 = vpop.f32.mrb[26].mxu1 }
 0x186   : > { %v5678_v24 = vadd.f32 %v1010_v20, %v846_v16  ;;  %v1012_v30 = vpop.f32.mrb[27].mxu1 }
 0x187   : > { %v725_v38 = vpop.f32.mrb[24].mxu0 }
 0x188   : > { %v5680_v44 = vadd.f32 %v890_v29, %v725_v38  ;;  %v727_v47 = vpop.f32.mrb[25].mxu0 }
 0x189   : > { %v1015_v60 = vpop.f32.mrb[28].mxu1 }
 0x18a   : > { %v5682_v61 = vadd.f32 %v1015_v60, %v851_v49  ;;  %v1017_v7 = vpop.f32.mrb[29].mxu1 }
 0x18b   : > { %v730_v18 = vpop.f32.mrb[26].mxu0 }
 0x18c   : > { %v5685_v52 = vadd.f32 %v5654_v19, %v730_v18  ;;  %v732_v2 = vpop.f32.mrb[27].mxu0 }
 0x18d   : > { %v1020_v8 = vpop.f32.mrb[30].mxu1 }
 0x18e   : > { %v5687_v3 = vadd.f32 %v1020_v8, %v856_v5  ;;  %v1022_v25 = vpop.f32.mrb[31].mxu1 }
 0x18f   : > { %v735_v26 = vpop.f32.mrb[28].mxu0 }
 0x190   : > { %v5690_v42 = vadd.f32 %v5658_v50, %v735_v26  ;;  %v737_v29 = vpop.f32.mrb[29].mxu0 }
 0x191   : > { %v1025_v12 = vpop.f32.mrb[32].mxu1 }
 0x192   : > { %v5692_v0 = vadd.f32 %v1025_v12, %v861_v17  ;;  %v1027_v33 = vpop.f32.mrb[33].mxu1 }
 0x193   : > { %v740_v11 = vpop.f32.mrb[30].mxu0 }
 0x194   : > { %v5695_v16 = vadd.f32 %v5656_v34, %v740_v11  ;;  %v742_v19 = vpop.f32.mrb[31].mxu0 }
 0x195   : > { %v1030_v23 = vpop.f32.mrb[34].mxu1 }
 0x196   : > { %v5697_v28 = vadd.f32 %v1030_v23, %v866_v35  ;;  %v1032_v49 = vpop.f32.mrb[35].mxu1 }
 0x197   : > { %v745_v54 = vpop.f32.mrb[32].mxu0 }
 0x198   : > { %v5700_v32 = vadd.f32 %v5662_v14, %v745_v54  ;;  %v747_v50 = vpop.f32.mrb[33].mxu0 }
 0x199   : > { %v1035_v5 = vpop.f32.mrb[36].mxu1 }
 0x19a   : > { %v5702_v21 = vadd.f32 %v1035_v5, %v871_v41  ;;  %v1037_v22 = vpop.f32.mrb[37].mxu1 }
 0x19b   : > { %v750_v17 = vpop.f32.mrb[34].mxu0 }
 0x19c   : > { %v5705_v10 = vadd.f32 %v5660_v13, %v750_v17  ;;  %v752_v34 = vpop.f32.mrb[35].mxu0 }
 0x19d   : > { %v1040_v46 = vpop.f32.mrb[38].mxu1 }
 0x19e   : > { %v5707_v36 = vadd.f32 %v1040_v46, %v876_v4  ;;  %v1042_v35 = vpop.f32.mrb[39].mxu1 }
 0x19f   : > { %v755_v13 = vpop.f32.mrb[36].mxu0 }
 0x1a0   : > { %v921_v14 = vadd.f32 %v5666_v58, %v755_v13  ;;  %v757_v41 = vpop.f32.mrb[37].mxu0 }
 0x1a1   : > { %v1045_v55 = vpop.f32.mrb[40].mxu1 }
 0x1a2   : > { %v1046_v63 = vadd.f32 %v1045_v55, %v5672_v48  ;;  %v1047_v59 = vpop.f32.mrb[41].mxu1 }
 0x1a3   : > { %v760_v51 = vpop.f32.mrb[38].mxu0 }
 0x1a4   : > { %v926_v4 = vadd.f32 %v5664_v43, %v760_v51  ;;  %v762_v27 = vpop.f32.mrb[39].mxu0 }
 0x1a5   : > { %v1050_v31 = vpop.f32.mrb[42].mxu1 }
 0x1a6   : > { %v1051_v40 = vadd.f32 %v1050_v31, %v5676_v9  ;;  %v1052_v45 = vpop.f32.mrb[43].mxu1 }
 0x1a7   : > { %v3830_v53 = vpop.f32.mrb[40].mxu0 }
 0x1a8   : > { %v5714_v56 = vadd.f32 %v3830_v53, %v5670_v37  ;;  %v1160_v1 = vpop.f32.mrb[41].mxu0 }
 0x1a9   : > { %v1055_v6 = vpop.f32.mrb[44].mxu1  ;;  %v5717_v58 = vadd.f32 %v1160_v1, %v5668_v57 }
 0x1aa   : > { %v1056_v48 = vadd.f32 %v1055_v6, %v5680_v44  ;;  %v1057_v15 = vpop.f32.mrb[45].mxu1 }
 0x1ab   : > { %v3833_v20 = vpop.f32.mrb[42].mxu0 }
 0x1ac   : > { %v5721_v43 = vadd.f32 %v3833_v20, %v5678_v24  ;;  %v1170_v30 = vpop.f32.mrb[43].mxu0 }
 0x1ad   : > { %v1060_v38 = vpop.f32.mrb[46].mxu1  ;;  %v5724_v9 = vadd.f32 %v1170_v30, %v5674_v62 }
 0x1ae   : > { %v1061_v37 = vadd.f32 %v1060_v38, %v5685_v52  ;;  %v1062_v47 = vpop.f32.mrb[47].mxu1  ;;  %v5772_v38 = vld [vmem:[%s6676_s2] ss:$0 sm:$0xff] }
 0x1af   : > { %v3836_v60 = vpop.f32.mrb[44].mxu0 }
 0x1b0   : > { %v5728_v7 = vadd.f32 %v3836_v60, %v5687_v3  ;;  %v1180_v57 = vpop.f32.mrb[45].mxu0 }
 0x1b1   : > { %v1065_v18 = vpop.f32.mrb[48].mxu1  ;;  %v5731_v44 = vadd.f32 %v1180_v57, %v5682_v61 }
 0x1b2   : > { %v1066_v24 = vadd.f32 %v1065_v18, %v5690_v42  ;;  %v1067_v2 = vpop.f32.mrb[49].mxu1 }
 0x1b3   : > { %v3839_v8 = vpop.f32.mrb[46].mxu0 }
 0x1b4   : > { %v5735_v25 = vadd.f32 %v3839_v8, %v5697_v28  ;;  %v1190_v62 = vpop.f32.mrb[47].mxu0 }
 0x1b5   : > { %v1070_v26 = vpop.f32.mrb[50].mxu1  ;;  %v5738_v52 = vadd.f32 %v1190_v62, %v5692_v0 }
 0x1b6   : > { %v1071_v3 = vadd.f32 %v1070_v26, %v5695_v16  ;;  %v1072_v29 = vpop.f32.mrb[51].mxu1 }
 0x1b7   : > { %v3842_v12 = vpop.f32.mrb[48].mxu0 }
 0x1b8   : > { %v5742_v33 = vadd.f32 %v3842_v12, %v5707_v36  ;;  %v1200_v61 = vpop.f32.mrb[49].mxu0 }
 0x1b9   : > { %v1075_v11 = vpop.f32.mrb[52].mxu1  ;;  %v5745_v42 = vadd.f32 %v1200_v61, %v5702_v21 }
 0x1ba   : > { %v1076_v19 = vadd.f32 %v1075_v11, %v5700_v32  ;;  %v1077_v23 = vpop.f32.mrb[53].mxu1 }
 0x1bb   : > { %v3845_v28 = vpop.f32.mrb[50].mxu0 }
 0x1bc   : > { %v5748_v49 = vadd.f32 %v3845_v28, %v1051_v40  ;;  %v1210_v0 = vpop.f32.mrb[51].mxu0 }
 0x1bd   : > { %v1080_v54 = vpop.f32.mrb[54].mxu1  ;;  %v5750_v50 = vadd.f32 %v1210_v0, %v1046_v63 }
 0x1be   : > { %v1081_v16 = vadd.f32 %v1080_v54, %v5705_v10  ;;  %v1082_v5 = vpop.f32.mrb[55].mxu1 }
 0x1bf   : > { %v3848_v22 = vpop.f32.mrb[52].mxu0 }
 0x1c0   : > { %v5753_v17 = vadd.f32 %v3848_v22, %v1061_v37  ;;  %v1220_v34 = vpop.f32.mrb[53].mxu0 }
 0x1c1   : > { %v1085_v46 = vpop.f32.mrb[56].mxu1  ;;  %v5755_v21 = vadd.f32 %v1220_v34, %v1056_v48 }
 0x1c2   : > { %v1086_v36 = vadd.f32 %v1085_v46, %v921_v14  ;;  %v1087_v32 = vpop.f32.mrb[57].mxu1 }
 0x1c3   : > { %v3851_v35 = vpop.f32.mrb[54].mxu0 }
 0x1c4   : > { %v5757_v39 = vadd.f32 %v3851_v35, %v1071_v3  ;;  %v1230_v13 = vpop.f32.mrb[55].mxu0 }
 0x1c5   : > { %v1090_v41 = vpop.f32.mrb[58].mxu1  ;;  %v5759_v55 = vadd.f32 %v1230_v13, %v1066_v24 }
 0x1c6   : > { %v1091_v63 = vadd.f32 %v1090_v41, %v926_v4  ;;  %v1092_v59 = vpop.f32.mrb[59].mxu1 }
 0x1c7   : > { %v3854_v10 = vpop.f32.mrb[56].mxu0 }
 0x1c8   : > { %v5761_v51 = vadd.f32 %v3854_v10, %v1081_v16  ;;  %v1240_v27 = vpop.f32.mrb[57].mxu0 }
 0x1c9   : > { %v5763_v31 = vadd.f32 %v1240_v27, %v1076_v19  ;;  %v1436_v40 = vpop.f32.mrb[60].mxu1 }
 0x1ca   : > { %v1438_v45 = vpop.f32.mrb[61].mxu1 }
 0x1cb   : > { %v3857_v53 = vpop.f32.mrb[58].mxu0 }
 0x1cc   : > { %v5765_v14 = vadd.f32 %v3857_v53, %v1091_v63  ;;  %v1250_v1 = vpop.f32.mrb[59].mxu0 }
 0x1cd   : > { %v5767_v6 = vadd.f32 %v1250_v1, %v1086_v36  ;;  %v1441_v48 = vpop.f32.mrb[62].mxu1 }
 0x1ce   : > { %v1443_v15 = vpop.f32.mrb[63].mxu1 }
 0x1cf   : > { %v3892_v20 = vpop.f32.mrb[60].mxu0 }
 0x1d0   : > { %v1607_v30 = vadd.f32 %v3892_v20, %v1441_v48  ;;  %v1601_v4 = vpop.f32.mrb[61].mxu0 }
 0x1d1   : > { %v1446_v37 = vpop.f32.mrb[64].mxu1  ;;  %v1602_v47 = vadd.f32 %v1601_v4, %v1436_v40 }
 0x1d2   : > { %v1701_v60 = vadd.f32 %v1607_v30, %v5714_v56  ;;  %v1448_v57 = vpop.f32.mrb[65].mxu1 }
 0x1d3   : > { %v1700_v18 = vadd.f32 %v1602_v47, %v5717_v58  ;;  %v3895_v24 = vpop.f32.mrb[62].mxu0 }
 0x1d4   : > { %v1728_v2 = vadd.f32 %v5772_v38, %v1701_v60  ;;  %v1611_v8 = vpop.f32.mrb[63].mxu0 }
 0x1d5   : > { %v1727_v62 = vadd.f32 %v5772_v38, %v1700_v18  ;;  %v1451_v26 = vpop.f32.mrb[66].mxu1  ;;  %v1612_v3 = vadd.f32 %v1611_v8, %v1446_v37 }
 0x1d6   : > { %v1748_v29 = vmax.f32 %v1728_v2, 0.0  ;;  %v1617_v12 = vadd.f32 %v3895_v24, %v1451_v26  ;;  %v1453_v61 = vpop.f32.mrb[67].mxu1 }
 0x1d7   : > { %v1747_v11 = vmax.f32 %v1727_v62, 0.0  ;;  %v1702_v19 = vadd.f32 %v1612_v3, %v5724_v9  ;;  %v3898_v23 = vpop.f32.mrb[64].mxu0 }
 0x1d8   : > { %1788 = vst [vmem:[#allocation3 + $0x9] sm:$0xff] %v1748_v29  ;;  %v1703_v56 = vadd.f32 %v1617_v12, %v5721_v43  ;;  %v1621_v28 = vpop.f32.mrb[65].mxu0 }
 0x1d9   : > { %1787 = vst [vmem:[#allocation3 + $0x1] sm:$0xff] %v1747_v11  ;;  %v1729_v58 = vadd.f32 %v5772_v38, %v1702_v19  ;;  %v1456_v0 = vpop.f32.mrb[68].mxu1 }
 0x1da   : > { %v1730_v54 = vadd.f32 %v5772_v38, %v1703_v56  ;;  %v1622_v16 = vadd.f32 %v1621_v28, %v1456_v0  ;;  %v1458_v5 = vpop.f32.mrb[69].mxu1 }
 0x1db   : > { %v1749_v22 = vmax.f32 %v1729_v58, 0.0  ;;  %v3901_v34 = vpop.f32.mrb[66].mxu0 }
 0x1dc   : > { %v1750_v46 = vmax.f32 %v1730_v54, 0.0  ;;  %v1704_v36 = vadd.f32 %v1622_v16, %v5731_v44  ;;  %v1631_v32 = vpop.f32.mrb[67].mxu0 }
 0x1dd   : > { %1789 = vst [vmem:[#allocation3 + $0x19] sm:$0xff] %v1749_v22  ;;  %v1461_v9 = vpop.f32.mrb[70].mxu1 }
 0x1de   : > { %1790 = vst [vmem:[#allocation3 + $0x21] sm:$0xff] %v1750_v46  ;;  %v1731_v43 = vadd.f32 %v5772_v38, %v1704_v36  ;;  %v1627_v35 = vadd.f32 %v3898_v23, %v1461_v9  ;;  %v1463_v13 = vpop.f32.mrb[71].mxu1 }
 0x1df   : > { %v3904_v41 = vpop.f32.mrb[68].mxu0 }
 0x1e0   : > { %v1751_v63 = vmax.f32 %v1731_v43, 0.0  ;;  %v1705_v59 = vadd.f32 %v1627_v35, %v5728_v7  ;;  %v1641_v10 = vpop.f32.mrb[69].mxu0 }
 0x1e1   : > { %v1466_v27 = vpop.f32.mrb[72].mxu1 }
 0x1e2   : > { %1791 = vst [vmem:[#allocation3 + $0x31] sm:$0xff] %v1751_v63  ;;  %v1732_v40 = vadd.f32 %v5772_v38, %v1705_v59  ;;  %v1632_v45 = vadd.f32 %v1631_v32, %v1466_v27  ;;  %v1468_v53 = vpop.f32.mrb[73].mxu1 }
 0x1e3   : > { %v3907_v44 = vpop.f32.mrb[70].mxu0 }
 0x1e4   : > { %v1752_v1 = vmax.f32 %v1732_v40, 0.0  ;;  %v1706_v48 = vadd.f32 %v1632_v45, %v5738_v52  ;;  %v1651_v15 = vpop.f32.mrb[71].mxu0 }
 0x1e5   : > { %v1471_v20 = vpop.f32.mrb[74].mxu1 }
 0x1e6   : > { %1792 = vst [vmem:[#allocation3 + $0x39] sm:$0xff] %v1752_v1  ;;  %v1733_v30 = vadd.f32 %v5772_v38, %v1706_v48  ;;  %v1637_v4 = vadd.f32 %v3901_v34, %v1471_v20  ;;  %v1473_v37 = vpop.f32.mrb[75].mxu1 }
 0x1e7   : > { %v3910_v47 = vpop.f32.mrb[72].mxu0 }
 0x1e8   : > { %v1753_v7 = vmax.f32 %v1733_v30, 0.0  ;;  %v1707_v60 = vadd.f32 %v1637_v4, %v5735_v25  ;;  %v1661_v57 = vpop.f32.mrb[73].mxu0 }
 0x1e9   : > { %v1476_v18 = vpop.f32.mrb[76].mxu1 }
 0x1ea   : > { %1793 = vst [vmem:[#allocation3 + $0x49] sm:$0xff] %v1753_v7  ;;  %v1734_v24 = vadd.f32 %v5772_v38, %v1707_v60  ;;  %v1642_v2 = vadd.f32 %v1641_v10, %v1476_v18  ;;  %v1478_v8 = vpop.f32.mrb[77].mxu1 }
 0x1eb   : > { %v3913_v62 = vpop.f32.mrb[74].mxu0 }
 0x1ec   : > { %v1754_v52 = vmax.f32 %v1734_v24, 0.0  ;;  %v1708_v26 = vadd.f32 %v1642_v2, %v5745_v42  ;;  %v1671_v3 = vpop.f32.mrb[75].mxu0 }
 0x1ed   : > { %v1481_v29 = vpop.f32.mrb[78].mxu1 }
 0x1ee   : > { %1794 = vst [vmem:[#allocation3 + $0x51] sm:$0xff] %v1754_v52  ;;  %v1735_v12 = vadd.f32 %v5772_v38, %v1708_v26  ;;  %v1647_v61 = vadd.f32 %v3904_v41, %v1481_v29  ;;  %v1483_v11 = vpop.f32.mrb[79].mxu1 }
 0x1ef   : > { %v3916_v19 = vpop.f32.mrb[76].mxu0 }
 0x1f0   : > { %v1755_v25 = vmax.f32 %v1735_v12, 0.0  ;;  %v1709_v23 = vadd.f32 %v1647_v61, %v5742_v33  ;;  %v1681_v56 = vpop.f32.mrb[77].mxu0 }
 0x1f1   : > { %v1486_v28 = vpop.f32.mrb[80].mxu1 }
 0x1f2   : > { %1795 = vst [vmem:[#allocation3 + $0x61] sm:$0xff] %v1755_v25  ;;  %v1736_v58 = vadd.f32 %v5772_v38, %v1709_v23  ;;  %v1652_v0 = vadd.f32 %v1651_v15, %v1486_v28  ;;  %v1488_v54 = vpop.f32.mrb[81].mxu1 }
 0x1f3   : > { %v5794_v16 = vpop.f32.mrb[78].mxu0  ;;  %v4688_v54 = vmov (!%p3156_p7), 0.0  }
 0x1f4   : > { %v1756_v42 = vmax.f32 %v1736_v58, 0.0  ;;  %v1710_v5 = vadd.f32 %v1652_v0, %v5750_v50  ;;  %v1691_v22 = vpop.f32.mrb[79].mxu0  ;;  %1810 = vst [vmem:[#allocation3] sm:$0xff] (!%p3156_p7), %v4688_v54  ;;  %1811 = vst [vmem:[#allocation3 + $0x8] sm:$0xff] (!%p3156_p7), %v4688_v54 }
 0x1f5   : > { %v1491_v34 = vpop.f32.mrb[82].mxu1  ;;  %1812 = vst [vmem:[#allocation3 + $0x10] sm:$0x3] (!%p3156_p7), %v4688_v54 }
 0x1f6   : > { %1796 = vst [vmem:[#allocation3 + $0x69] sm:$0xff] %v1756_v42  ;;  %v1737_v46 = vadd.f32 %v5772_v38, %v1710_v5  ;;  %v1657_v36 = vadd.f32 %v3907_v44, %v1491_v34  ;;  %v1493_v32 = vpop.f32.mrb[83].mxu1 }
 0x1f8   : > { %v1757_v33 = vmax.f32 %v1737_v46, 0.0  ;;  %v1711_v9 = vadd.f32 %v1657_v36, %v5748_v49 }
 0x1f9   : > { %v1496_v43 = vpop.f32.mrb[84].mxu1 }
 0x1fa   : > { %1797 = vst [vmem:[#allocation3 + $0x79] sm:$0xff] %v1757_v33  ;;  %v1738_v35 = vadd.f32 %v5772_v38, %v1711_v9  ;;  %v1662_v13 = vadd.f32 %v1661_v57, %v1496_v43  ;;  %v1498_v41 = vpop.f32.mrb[85].mxu1 }
 0x1fc   : > { %v1758_v63 = vmax.f32 %v1738_v35, 0.0  ;;  %v1712_v59 = vadd.f32 %v1662_v13, %v5755_v21 }
 0x1fd   : > { %v1501_v50 = vpop.f32.mrb[86].mxu1 }
 0x1fe   : > { %1798 = vst [vmem:[#allocation3 + $0x81] sm:$0xff] %v1758_v63  ;;  %v1739_v10 = vadd.f32 %v5772_v38, %v1712_v59  ;;  %v1667_v27 = vadd.f32 %v3910_v47, %v1501_v50  ;;  %v1503_v40 = vpop.f32.mrb[87].mxu1 }
 0x200   : > { %v1759_v45 = vmax.f32 %v1739_v10, 0.0  ;;  %v1713_v53 = vadd.f32 %v1667_v27, %v5753_v17 }
 0x201   : > { %v1506_v44 = vpop.f32.mrb[88].mxu1 }
 0x202   : > { %1799 = vst [vmem:[#allocation3 + $0x91] sm:$0xff] %v1759_v45  ;;  %v1740_v49 = vadd.f32 %v5772_v38, %v1713_v53  ;;  %v1672_v1 = vadd.f32 %v1671_v3, %v1506_v44  ;;  %v1508_v48 = vpop.f32.mrb[89].mxu1 }
 0x204   : > { %v1760_v15 = vmax.f32 %v1740_v49, 0.0  ;;  %v1714_v20 = vadd.f32 %v1672_v1, %v5759_v55 }
 0x205   : > { %v1511_v30 = vpop.f32.mrb[90].mxu1 }
 0x206   : > { %1800 = vst [vmem:[#allocation3 + $0x99] sm:$0xff] %v1760_v15  ;;  %v1741_v21 = vadd.f32 %v5772_v38, %v1714_v20  ;;  %v1677_v4 = vadd.f32 %v3913_v62, %v1511_v30  ;;  %v1513_v37 = vpop.f32.mrb[91].mxu1 }
 0x208   : > { %v1761_v47 = vmax.f32 %v1741_v21, 0.0  ;;  %v1715_v7 = vadd.f32 %v1677_v4, %v5757_v39 }
 0x209   : > { %v1516_v60 = vpop.f32.mrb[92].mxu1 }
 0x20a   : > { %1801 = vst [vmem:[#allocation3 + $0xa9] sm:$0xff] %v1761_v47  ;;  %v1742_v17 = vadd.f32 %v5772_v38, %v1715_v7  ;;  %v1682_v57 = vadd.f32 %v1681_v56, %v1516_v60  ;;  %v1518_v18 = vpop.f32.mrb[93].mxu1 }
 0x20c   : > { %v1762_v24 = vmax.f32 %v1742_v17, 0.0  ;;  %v1716_v2 = vadd.f32 %v1682_v57, %v5763_v31 }
 0x20d   : > { %v1521_v8 = vpop.f32.mrb[94].mxu1 }
 0x20e   : > { %1802 = vst [vmem:[#allocation3 + $0xb1] sm:$0xff] %v1762_v24  ;;  %v1743_v55 = vadd.f32 %v5772_v38, %v1716_v2  ;;  %v1687_v52 = vadd.f32 %v3916_v19, %v1521_v8  ;;  %v1523_v26 = vpop.f32.mrb[95].mxu1 }
 0x210   : > { %v1763_v62 = vmax.f32 %v1743_v55, 0.0  ;;  %v1717_v3 = vadd.f32 %v1687_v52, %v5761_v51 }
 0x211   : > { %v1526_v29 = vpop.f32.mrb[96].mxu1 }
 0x212   : > { %1803 = vst [vmem:[#allocation3 + $0xc1] sm:$0xff] %v1763_v62  ;;  %v1744_v39 = vadd.f32 %v5772_v38, %v1717_v3  ;;  %v1692_v12 = vadd.f32 %v1691_v22, %v1526_v29  ;;  %v1528_v61 = vpop.f32.mrb[97].mxu1 }
 0x214   : > { %v1764_v11 = vmax.f32 %v1744_v39, 0.0  ;;  %v1718_v25 = vadd.f32 %v1692_v12, %v5767_v6 }
 0x215   : > { %v1531_v23 = vpop.f32.mrb[98].mxu1 }
 0x216   : > { %1804 = vst [vmem:[#allocation3 + $0xc9] sm:$0xff] %v1764_v11  ;;  %v1745_v31 = vadd.f32 %v5772_v38, %v1718_v25  ;;  %v1697_v56 = vadd.f32 %v5794_v16, %v1531_v23  ;;  %v1533_v19 = vpop.f32.mrb[99].mxu1 }
 0x218   : > { %v1765_v28 = vmax.f32 %v1745_v31, 0.0  ;;  %v1719_v58 = vadd.f32 %v1697_v56, %v5765_v14  ;;  %1809 = sbr.rel (%p3156_p7) target bundleno = 543 (0x21f), region = 48 }
 0x21a   : > { %1805 = vst [vmem:[#allocation3 + $0xd9] sm:$0xff] %v1765_v28  ;;  %v1746_v51 = vadd.f32 %v5772_v38, %v1719_v58 }
 0x21c   : > { %v1766_v0 = vmax.f32 %v1746_v51, 0.0 }
 0x21e   : > { %1806 = vst [vmem:[#allocation3 + $0xe1] sm:$0xff] %v1766_v0 }
 0x21f PF: > { %p3285_p8 = scmp.ne.s32.totalorder %s4667_s18, 1 }
 0x220   : > { %v4689_v6 = vmov (!%p3285_p8), 0.0  }
 0x221   : > { %1816 = sbr.rel (%p3285_p8) target bundleno = 552 (0x228), region = 52  ;;  %1818 = vst [vmem:[#allocation3 + $0xd8] sm:$0xff] (!%p3285_p8), %v4689_v6  ;;  %1819 = vst [vmem:[#allocation3 + $0xe0] sm:$0xff] (!%p3285_p8), %v4689_v6 }
 0x222   : > { %1820 = vst [vmem:[#allocation3 + $0xe8] sm:$0x3] (!%p3285_p8), %v4689_v6 }
 0x228 PF: > { %v1982_v14 = vld [vmem:[%s6677_s3 + $0x200] sm:$0xff]  ;;  %v1983_v38 = vld [vmem:[%s6677_s3 + $0x208] sm:$0xff]  ;;  %v1984_v32 = vld [vmem:[%s6677_s3 + $0x210] sm:$0xff] }
 0x229   : > { %v1901_v16 = vld [vmem:[%s6677_s3 + $0x100] sm:$0xff]  ;;  %v4328_v42 = vpack.c.bf16 %v1983_v38, %v1982_v14  ;;  %v1902_v5 = vld [vmem:[%s6677_s3 + $0x108] sm:$0xff]  ;;  %v1985_v33 = vld [vmem:[%s6677_s3 + $0x218] sm:$0xff] }
 0x22a   : > { %v1966_v22 = vld [vmem:[%s6677_s3 + $0x180] sm:$0xff]  ;;  %v1967_v34 = vld [vmem:[%s6677_s3 + $0x188] sm:$0xff]  ;;  %v4424_v46 = vpack.c.bf16 %v1902_v5, %v1901_v16  ;;  %v1903_v9 = vld [vmem:[%s6677_s3 + $0x110] sm:$0xff]  ;;  %v4332_v43 = vpack.c.bf16 %v1985_v33, %v1984_v32 }
 0x22b   : > { %v4330_v36 = vpack.c.bf16 %v1967_v34, %v1966_v22  ;;  %4329 = vmatprep.subr.bf16.mxu0 %v4328_v42  ;;  %v1904_v35 = vld [vmem:[%s6677_s3 + $0x118] sm:$0xff]  ;;  %v1968_v13 = vld [vmem:[%s6677_s3 + $0x190] sm:$0xff]  ;;  %v1986_v50 = vld [vmem:[%s6677_s3 + $0x220] sm:$0xff] }
 0x22c   : > { %v1969_v41 = vld [vmem:[%s6677_s3 + $0x198] sm:$0xff]  ;;  %4425 = vmatprep.subr.bf16.mxu1 %v4424_v46  ;;  %v4428_v63 = vpack.c.bf16 %v1904_v35, %v1903_v9  ;;  %v1987_v10 = vld [vmem:[%s6677_s3 + $0x228] sm:$0xff]  ;;  %v1905_v27 = vld [vmem:[%s6677_s3 + $0x120] sm:$0xff] }
 0x22d   : > { %4331 = vmatpush3.bf16.msra.mxu0 %v4330_v36  ;;  %v4334_v59 = vpack.c.bf16 %v1969_v41, %v1968_v13  ;;  %4427 = vmatpush3.bf16.msra.mxu1 %v4424_v46  ;;  %v4336_v40 = vpack.c.bf16 %v1987_v10, %v1986_v50  ;;  %v1906_v45 = vld [vmem:[%s6677_s3 + $0x128] sm:$0xff]  ;;  %v1970_v53 = vld [vmem:[%s6677_s3 + $0x1a0] sm:$0xff]  ;;  %v1988_v1 = vld [vmem:[%s6677_s3 + $0x230] sm:$0xff] }
 0x22e   : > { %4333 = vmatprep.subr.bf16.mxu0 %v4332_v43  ;;  %v1971_v44 = vld [vmem:[%s6677_s3 + $0x1a8] sm:$0xff]  ;;  %4429 = vmatprep.subr.bf16.mxu1 %v4428_v63  ;;  %v4432_v49 = vpack.c.bf16 %v1906_v45, %v1905_v27  ;;  %v1989_v48 = vld [vmem:[%s6677_s3 + $0x238] sm:$0xff]  ;;  %v1907_v15 = vld [vmem:[%s6677_s3 + $0x130] sm:$0xff] }
 0x22f   : > { %v1908_v20 = vld [vmem:[%s6677_s3 + $0x138] sm:$0xff]  ;;  %v4338_v30 = vpack.c.bf16 %v1971_v44, %v1970_v53  ;;  %v4340_v21 = vpack.c.bf16 %v1989_v48, %v1988_v1  ;;  %v1972_v4 = vld [vmem:[%s6677_s3 + $0x1b0] sm:$0xff]  ;;  %v1990_v7 = vld [vmem:[%s6677_s3 + $0x240] sm:$0xff] }
 0x230   : > { %v1973_v37 = vld [vmem:[%s6677_s3 + $0x1b8] sm:$0xff]  ;;  %v4436_v47 = vpack.c.bf16 %v1908_v20, %v1907_v15  ;;  %v1991_v60 = vld [vmem:[%s6677_s3 + $0x248] sm:$0xff]  ;;  %v1909_v17 = vld [vmem:[%s6677_s3 + $0x140] sm:$0xff] }
 0x231   : > { %4335 = vmatpush3.bf16.msra.mxu0 %v4334_v59  ;;  %4431 = vmatpush3.bf16.msra.mxu1 %v4428_v63  ;;  %v1910_v57 = vld [vmem:[%s6677_s3 + $0x148] sm:$0xff]  ;;  %v4342_v18 = vpack.c.bf16 %v1973_v37, %v1972_v4  ;;  %v4344_v24 = vpack.c.bf16 %v1991_v60, %v1990_v7  ;;  %v1974_v2 = vld [vmem:[%s6677_s3 + $0x1c0] sm:$0xff]  ;;  %v1992_v52 = vld [vmem:[%s6677_s3 + $0x250] sm:$0xff] }
 0x232   : > { %4337 = vmatprep.subr.bf16.mxu0 %v4336_v40  ;;  %4433 = vmatprep.subr.bf16.mxu1 %v4432_v49  ;;  %v1975_v8 = vld [vmem:[%s6677_s3 + $0x1c8] sm:$0xff]  ;;  %v4440_v55 = vpack.c.bf16 %v1910_v57, %v1909_v17  ;;  %v1993_v26 = vld [vmem:[%s6677_s3 + $0x258] sm:$0xff]  ;;  %v1911_v62 = vld [vmem:[%s6677_s3 + $0x150] sm:$0xff] }
 0x233   : > { %v1912_v3 = vld [vmem:[%s6677_s3 + $0x158] sm:$0xff]  ;;  %v4346_v29 = vpack.c.bf16 %v1975_v8, %v1974_v2  ;;  %v1853_v12 = vld [vmem:[#allocation3 + $0x2] sm:$0xff]  ;;  %v4348_v61 = vpack.c.bf16 %v1993_v26, %v1992_v52  ;;  %v1976_v11 = vld [vmem:[%s6677_s3 + $0x1d0] sm:$0xff] }
 0x234   : > { %v5922_v39 = vld [vmem:[#allocation3 + $0x19] sm:$0xff]  ;;  %v4444_v23 = vpack.c.bf16 %v1912_v3, %v1911_v62  ;;  %v1995_v56 = vld [vmem:[%s6677_s3 + $0x268] sm:$0xff]  ;;  %4008 = vmatprep.mubr.f32.mxu1 %v1853_v12  ;;  %v1996_v14 = vld [vmem:[%s6677_s3 + $0x270] sm:$0xff] }
 0x235   : > { %4339 = vmatpush3.bf16.msra.mxu0 %v4338_v30  ;;  %4435 = vmatpush3.bf16.msra.mxu1 %v4432_v49  ;;  %v1977_v25 = vld [vmem:[%s6677_s3 + $0x1d8] sm:$0xff]  ;;  %v1994_v31 = vld [vmem:[%s6677_s3 + $0x260] sm:$0xff]  ;;  %v1914_v28 = vld [vmem:[%s6677_s3 + $0x168] sm:$0xff] }
 0x236   : > { %4341 = vmatprep.subr.bf16.mxu0 %v4340_v21  ;;  %4437 = vmatprep.subr.bf16.mxu1 %v4436_v47  ;;  %v1913_v19 = vld [vmem:[%s6677_s3 + $0x160] sm:$0xff]  ;;  %v4350_v58 = vpack.c.bf16 %v1977_v25, %v1976_v11  ;;  %v4352_v51 = vpack.c.bf16 %v1995_v56, %v1994_v31  ;;  %v1979_v54 = vld [vmem:[%s6677_s3 + $0x1e8] sm:$0xff]  ;;  %v1997_v38 = vld [vmem:[%s6677_s3 + $0x278] sm:$0xff] }
 0x237   : > { %2078 = vmatprep.mubr.f32.mxu0 %v5922_v39  ;;  %v1978_v0 = vld [vmem:[%s6677_s3 + $0x1e0] sm:$0xff]  ;;  %v4448_v6 = vpack.c.bf16 %v1914_v28, %v1913_v19  ;;  %v1915_v16 = vld [vmem:[%s6677_s3 + $0x170] sm:$0xff]  ;;  %v1916_v42 = vld [vmem:[%s6677_s3 + $0x178] sm:$0xff]  ;;  %v4356_v22 = vpack.c.bf16 %v1997_v38, %v1996_v14 }
 0x238   : > { %v4354_v5 = vpack.c.bf16 %v1979_v54, %v1978_v0  ;;  %v1980_v34 = vld [vmem:[%s6677_s3 + $0x1f0] sm:$0xff]  ;;  %v1981_v46 = vld [vmem:[%s6677_s3 + $0x1f8] sm:$0xff]  ;;  %v4452_v36 = vpack.c.bf16 %v1916_v42, %v1915_v16  ;;  %v1998_v32 = vld [vmem:[%s6677_s3 + $0x280] sm:$0xff] }
 0x239   : > { %4343 = vmatpush3.bf16.msra.mxu0 %v4342_v18  ;;  %4439 = vmatpush3.bf16.msra.mxu1 %v4436_v47  ;;  %v1999_v33 = vld [vmem:[%s6677_s3 + $0x288] sm:$0xff]  ;;  %v2659_v9 = vld [vmem:[%s6677_s3 + $0x380] sm:$0xff]  ;;  %v4358_v35 = vpack.c.bf16 %v1981_v46, %v1980_v34  ;;  %v2661_v50 = vld [vmem:[%s6677_s3 + $0x390] sm:$0xff] }
 0x23a   : > { %4345 = vmatprep.subr.bf16.mxu0 %v4344_v24  ;;  %4441 = vmatprep.subr.bf16.mxu1 %v4440_v55  ;;  %v2660_v43 = vld [vmem:[%s6677_s3 + $0x388] sm:$0xff]  ;;  %v4360_v13 = vpack.c.bf16 %v1999_v33, %v1998_v32  ;;  %v2643_v63 = vld [vmem:[%s6677_s3 + $0x300] sm:$0xff]  ;;  %v2662_v10 = vld [vmem:[%s6677_s3 + $0x398] sm:$0xff] }
 0x23b   : > { %v4456_v41 = vpack.c.bf16 %v2660_v43, %v2659_v9  ;;  %v2644_v59 = vld [vmem:[%s6677_s3 + $0x308] sm:$0xff]  ;;  %v5991_v27 = vld [vmem:[#allocation3 + $0x18] sm:$0xff]  ;;  %v2000_v40 = vld [vmem:[%s6677_s3 + $0x290] sm:$0xff]  ;;  %v4460_v1 = vpack.c.bf16 %v2662_v10, %v2661_v50 }
 0x23c   : > { %v2001_v45 = vld [vmem:[%s6677_s3 + $0x298] sm:$0xff]  ;;  %v1854_v53 = vld [vmem:[#allocation3 + $0xa] sm:$0xff]  ;;  %v4458_v44 = vpack.c.bf16 %v2644_v59, %v2643_v63  ;;  %v5999_v49 = vld [vmem:[#allocation3 + $0x21] sm:$0xff] }
 0x23d   : > { %4347 = vmatpush3.bf16.msra.mxu0 %v4346_v29  ;;  %4443 = vmatpush3.bf16.msra.mxu1 %v4440_v55  ;;  %v2645_v48 = vld [vmem:[%s6677_s3 + $0x310] sm:$0xff]  ;;  %v2646_v15 = vld [vmem:[%s6677_s3 + $0x318] sm:$0xff]  ;;  %v4364_v30 = vpack.c.bf16 %v2001_v45, %v2000_v40  ;;  %v2663_v21 = vld [vmem:[%s6677_s3 + $0x3a0] sm:$0xff] }
 0x23e   : > { %4349 = vmatprep.subr.bf16.mxu0 %v4348_v61  ;;  %4445 = vmatprep.subr.bf16.mxu1 %v4444_v23  ;;  %v6008_v20 = vld [vmem:[#allocation3 + $0x1a] sm:$0xff]  ;;  %v2664_v4 = vld [vmem:[%s6677_s3 + $0x3a8] sm:$0xff]  ;;  %v4462_v17 = vpack.c.bf16 %v2646_v15, %v2645_v48  ;;  %v6027_v57 = vld [vmem:[#allocation3 + $0x31] sm:$0xff] }
 0x23f   : > { %v6016_v37 = vld [vmem:[#allocation3 + $0x20] sm:$0xff]  ;;  %v2003_v7 = vld [vmem:[%s6677_s3 + $0x2a8] sm:$0xff]  ;;  %v6030_v18 = vld [vmem:[#allocation3 + $0x32] sm:$0xff]  ;;  %v4464_v24 = vpack.c.bf16 %v2664_v4, %v2663_v21 }
 0x240   : > { %v2002_v47 = vld [vmem:[%s6677_s3 + $0x2a0] sm:$0xff]  ;;  %v2648_v8 = vld [vmem:[%s6677_s3 + $0x328] sm:$0xff]  ;;  %v2665_v55 = vld [vmem:[%s6677_s3 + $0x3b0] sm:$0xff] }
 0x241   : > { %4351 = vmatpush3.bf16.msra.mxu0 %v4350_v58  ;;  %4447 = vmatpush3.bf16.msra.mxu1 %v4444_v23  ;;  %v6025_v60 = vld [vmem:[#allocation3 + $0x22] sm:$0xff]  ;;  %v2666_v52 = vld [vmem:[%s6677_s3 + $0x3b8] sm:$0xff]  ;;  %v4368_v26 = vpack.c.bf16 %v2003_v7, %v2002_v47  ;;  %v6047_v62 = vld [vmem:[#allocation3 + $0x30] sm:$0xff] }
 0x242   : > { %4353 = vmatprep.subr.bf16.mxu0 %v4352_v51  ;;  %4449 = vmatprep.subr.bf16.mxu1 %v4448_v6  ;;  %v2647_v2 = vld [vmem:[%s6677_s3 + $0x320] sm:$0xff]  ;;  %v2004_v3 = vld [vmem:[%s6677_s3 + $0x2b0] sm:$0xff]  ;;  %v2005_v29 = vld [vmem:[%s6677_s3 + $0x2b8] sm:$0xff]  ;;  %v4468_v23 = vpack.c.bf16 %v2666_v52, %v2665_v55 }
 0x243   : > { %v6056_v12 = vld [vmem:[#allocation3 + $0x3a] sm:$0xff]  ;;  %v4466_v61 = vpack.c.bf16 %v2648_v8, %v2647_v2  ;;  %v6060_v25 = vld [vmem:[#allocation3 + $0x4a] sm:$0xff]  ;;  %v4372_v58 = vpack.c.bf16 %v2005_v29, %v2004_v3  ;;  %v6090_v16 = vld [vmem:[#allocation3 + $0x62] sm:$0xff] }
 0x244   : > { %v6058_v11 = vld [vmem:[#allocation3 + $0x39] sm:$0xff]  ;;  %v2649_v31 = vld [vmem:[%s6677_s3 + $0x330] sm:$0xff]  ;;  %v2668_v28 = vld [vmem:[%s6677_s3 + $0x3c8] sm:$0xff] }
 0x245   : > { %4355 = vmatpush3.bf16.msra.mxu0 %v4354_v5  ;;  %4451 = vmatpush3.bf16.msra.mxu1 %v4448_v6  ;;  %v2650_v56 = vld [vmem:[%s6677_s3 + $0x338] sm:$0xff]  ;;  %v2667_v19 = vld [vmem:[%s6677_s3 + $0x3c0] sm:$0xff]  ;;  %v2007_v54 = vld [vmem:[%s6677_s3 + $0x2c8] sm:$0xff] }
 0x246   : > { %4357 = vmatprep.subr.bf16.mxu0 %v4356_v22  ;;  %4453 = vmatprep.subr.bf16.mxu1 %v4452_v36  ;;  %v6077_v51 = vld [vmem:[#allocation3 + $0x38] sm:$0xff]  ;;  %v2006_v0 = vld [vmem:[%s6677_s3 + $0x2c0] sm:$0xff]  ;;  %v4470_v14 = vpack.c.bf16 %v2650_v56, %v2649_v31  ;;  %v6088_v38 = vld [vmem:[#allocation3 + $0x49] sm:$0xff]  ;;  %v4472_v42 = vpack.c.bf16 %v2668_v28, %v2667_v19 }
 0x247   : > { %v6086_v6 = vld [vmem:[#allocation3 + $0x52] sm:$0xff]  ;;  %v2651_v5 = vld [vmem:[%s6677_s3 + $0x340] sm:$0xff]  ;;  %v2652_v22 = vld [vmem:[%s6677_s3 + $0x348] sm:$0xff] }
 0x248   : > { %v2669_v34 = vld [vmem:[%s6677_s3 + $0x3d0] sm:$0xff]  ;;  %v2670_v46 = vld [vmem:[%s6677_s3 + $0x3d8] sm:$0xff]  ;;  %v6107_v32 = vld [vmem:[#allocation3 + $0x48] sm:$0xff] }
 0x249   : > { %4359 = vmatpush3.bf16.msra.mxu0 %v4358_v35  ;;  %4455 = vmatpush3.bf16.msra.mxu1 %v4452_v36  ;;  %v4376_v36 = vpack.c.bf16 %v2007_v54, %v2006_v0  ;;  %v2008_v33 = vld [vmem:[%s6677_s3 + $0x2d0] sm:$0xff]  ;;  %v2009_v9 = vld [vmem:[%s6677_s3 + $0x2d8] sm:$0xff]  ;;  %v4474_v35 = vpack.c.bf16 %v2652_v22, %v2651_v5  ;;  %v4476_v63 = vpack.c.bf16 %v2670_v46, %v2669_v34  ;;  %v2671_v10 = vld [vmem:[%s6677_s3 + $0x3e0] sm:$0xff] }
 0x24a   : > { %4361 = vmatprep.subr.bf16.mxu0 %v4360_v13  ;;  %4457 = vmatprep.subr.bf16.mxu1 %v4456_v41  ;;  %v6116_v43 = vld [vmem:[#allocation3 + $0x6a] sm:$0xff]  ;;  %v6120_v41 = vld [vmem:[#allocation3 + $0x7a] sm:$0xff]  ;;  %v4380_v45 = vpack.c.bf16 %v2009_v9, %v2008_v33  ;;  %v6146_v48 = vld [vmem:[#allocation3 + $0x82] sm:$0xff] }
 0x24b   : > { %v2653_v59 = vld [vmem:[%s6677_s3 + $0x350] sm:$0xff]  ;;  %v2654_v50 = vld [vmem:[%s6677_s3 + $0x358] sm:$0xff]  ;;  %v2672_v40 = vld [vmem:[%s6677_s3 + $0x3e8] sm:$0xff] }
 0x24c   : > { %2079 = vmatmul.mubr.f32.vlgmr.msra.gmra.mrb[80].mxu0 %v5991_v27  ;;  %4009 = vmatmul.mubr.f32.vlgmr.msra.gmra.mrb[100].mxu1 %v1854_v53  ;;  %v6137_v53 = vld [vmem:[#allocation3 + $0x50] sm:$0xff]  ;;  %v4478_v15 = vpack.c.bf16 %v2654_v50, %v2653_v59  ;;  %v4480_v4 = vpack.c.bf16 %v2672_v40, %v2671_v10  ;;  %v2655_v47 = vld [vmem:[%s6677_s3 + $0x360] sm:$0xff]  ;;  %v2656_v7 = vld [vmem:[%s6677_s3 + $0x368] sm:$0xff] }
 0x24d   : > { %4363 = vmatpush3.bf16.msra.mxu0 %v4360_v13  ;;  %4459 = vmatpush3.bf16.msra.mxu1 %v4458_v44  ;;  %v6118_v13 = vld [vmem:[#allocation3 + $0x51] sm:$0xff]  ;;  %v2010_v44 = vld [vmem:[%s6677_s3 + $0x2e0] sm:$0xff]  ;;  %v4482_v3 = vpack.c.bf16 %v2656_v7, %v2655_v47  ;;  %v6178_v29 = vld [vmem:[#allocation3 + $0x69] sm:$0xff] }
 0x24e   : > { %2083 = vmatprep.mubr.f32.mxu0 %v5999_v49  ;;  %4011 = vmatprep.mubr.f32.mxu1 %v6008_v20  ;;  %v6150_v21 = vld [vmem:[#allocation3 + $0x92] sm:$0xff]  ;;  %v6167_v8 = vld [vmem:[#allocation3 + $0x60] sm:$0xff]  ;;  %v6197_v0 = vld [vmem:[#allocation3 + $0x68] sm:$0xff] }
 0x24f   : > { %4461 = vmatprep.subr.bf16.mxu1 %v4460_v1  ;;  %4365 = vmatprep.subr.bf16.mxu0 %v4364_v30  ;;  %v2011_v1 = vld [vmem:[%s6677_s3 + $0x2e8] sm:$0xff]  ;;  %v2012_v55 = vld [vmem:[%s6677_s3 + $0x2f0] sm:$0xff]  ;;  %v2013_v52 = vld [vmem:[%s6677_s3 + $0x2f8] sm:$0xff] }
 0x250   : > { %2084 = vmatmul.mubr.f32.gmra.mrb[82].mxu0 %v6016_v37  ;;  %4012 = vmatmul.mubr.f32.gmra.mrb[102].mxu1 %v6025_v60  ;;  %v4384_v2 = vpack.c.bf16 %v2011_v1, %v2010_v44  ;;  %v2657_v31 = vld [vmem:[%s6677_s3 + $0x370] sm:$0xff]  ;;  %v2658_v56 = vld [vmem:[%s6677_s3 + $0x378] sm:$0xff]  ;;  %v4388_v19 = vpack.c.bf16 %v2013_v52, %v2012_v55  ;;  %v2675_v28 = vld [vmem:[%s6677_s3 + $0x400] sm:$0xff] }
 0x251   : > { %2088 = vmatprep.mubr.f32.mxu0 %v6027_v57  ;;  %4463 = vmatpush3.bf16.msra.mxu1 %v4462_v17  ;;  %v2673_v17 = vld [vmem:[%s6677_s3 + $0x3f0] sm:$0xff]  ;;  %v1885_v54 = vld [vmem:[%s6677_s3 + $0x80] sm:$0xff]  ;;  %v4486_v5 = vpack.c.bf16 %v2658_v56, %v2657_v31  ;;  %v2678_v33 = vld [vmem:[%s6677_s3 + $0x418] sm:$0xff] }
 0x252   : > { %4014 = vmatprep.mubr.f32.mxu1 %v6030_v18  ;;  %4465 = vmatprep.subr.bf16.mxu1 %v4464_v24  ;;  %v2674_v24 = vld [vmem:[%s6677_s3 + $0x3f8] sm:$0xff]  ;;  %v2679_v59 = vld [vmem:[%s6677_s3 + $0x420] sm:$0xff]  ;;  %v2680_v50 = vld [vmem:[%s6677_s3 + $0x428] sm:$0xff] }
 0x253   : > { %4367 = vmatpush3.bf16.msra.mxu0 %v4364_v30  ;;  %v6148_v30 = vld [vmem:[#allocation3 + $0x61] sm:$0xff]  ;;  %v6208_v22 = vld [vmem:[#allocation3 + $0x79] sm:$0xff]  ;;  %v6236_v40 = vld [vmem:[#allocation3 + $0x91] sm:$0xff] }
 0x254   : > { %2089 = vmatmul.mubr.f32.gmra.mrb[84].mxu0 %v6047_v62  ;;  %4369 = vmatprep.subr.bf16.mxu0 %v4368_v26  ;;  %v6219_v9 = vld [vmem:[#allocation3 + $0x78] sm:$0xff]  ;;  %v6233_v10 = vld [vmem:[#allocation3 + $0x80] sm:$0xff]  ;;  %v2681_v44 = vld [vmem:[%s6677_s3 + $0x430] sm:$0xff] }
 0x255   : > { %4015 = vmatmul.mubr.f32.gmra.mrb[104].mxu1 %v6056_v12  ;;  %2093 = vmatprep.mubr.f32.mxu0 %v6058_v11  ;;  %v2682_v1 = vld [vmem:[%s6677_s3 + $0x438] sm:$0xff]  ;;  %v2683_v7 = vld [vmem:[%s6677_s3 + $0x440] sm:$0xff]  ;;  %v2685_v52 = vld [vmem:[%s6677_s3 + $0x450] sm:$0xff] }
 0x256   : > { %4467 = vmatpush3.bf16.msra.mxu1 %v4466_v61  ;;  %4017 = vmatprep.mubr.f32.mxu1 %v6060_v25  ;;  %v6180_v61 = vld [vmem:[#allocation3 + $0xaa] sm:$0xff]  ;;  %v4500_v47 = vpack.c.bf16 %v2682_v1, %v2681_v44  ;;  %v1888_v44 = vld [vmem:[%s6677_s3 + $0x98] sm:$0xff] }
 0x257   : > { %4469 = vmatprep.subr.bf16.mxu1 %v4468_v23  ;;  %4371 = vmatpush3.bf16.msra.mxu0 %v4368_v26  ;;  %v6176_v26 = vld [vmem:[#allocation3 + $0x9a] sm:$0xff]  ;;  %v4484_v23 = vpack.c.bf16 %v2674_v24, %v2673_v17  ;;  %v2684_v17 = vld [vmem:[%s6677_s3 + $0x448] sm:$0xff]  ;;  %v6278_v31 = vld [vmem:[#allocation3 + $0xb1] sm:$0xff] }
 0x258   : > { %2094 = vmatmul.mubr.f32.gmra.mrb[86].mxu0 %v6077_v51  ;;  %4373 = vmatprep.subr.bf16.mxu0 %v4372_v58  ;;  %v6261_v24 = vld [vmem:[#allocation3 + $0x98] sm:$0xff]  ;;  %v4504_v55 = vpack.c.bf16 %v2684_v17, %v2683_v7 }
 0x259   : > { %4018 = vmatmul.mubr.f32.gmra.mrb[106].mxu1 %v6086_v6  ;;  %2098 = vmatprep.mubr.f32.mxu0 %v6088_v38  ;;  %v1872_v7 = vld [vmem:[%s6677_s3 + $0x18] sm:$0xff] }
 0x25a   : > { %4471 = vmatpush3.bf16.msra.mxu1 %v4470_v14  ;;  %4020 = vmatprep.mubr.f32.mxu1 %v6090_v16  ;;  %v1886_v14 = vld [vmem:[%s6677_s3 + $0x88] sm:$0xff] }
 0x25b   : > { %4473 = vmatprep.subr.bf16.mxu1 %v4472_v42  ;;  %4375 = vmatpush3.bf16.msra.mxu0 %v4372_v58  ;;  %v2676_v58 = vld [vmem:[%s6677_s3 + $0x408] sm:$0xff]  ;;  %v6206_v42 = vld [vmem:[#allocation3 + $0xb2] sm:$0xff]  ;;  %v4392_v46 = vpack.c.bf16 %v1886_v14, %v1885_v54 }
 0x25c   : > { %2099 = vmatmul.mubr.f32.gmra.mrb[88].mxu0 %v6107_v32  ;;  %4377 = vmatprep.subr.bf16.mxu0 %v4376_v36  ;;  %v4488_v34 = vpack.c.bf16 %v2676_v58, %v2675_v28  ;;  %v2688_v28 = vld [vmem:[%s6677_s3 + $0x468] sm:$0xff]  ;;  %v6289_v58 = vld [vmem:[#allocation3 + $0xb0] sm:$0xff] }
 0x25d   : > { %4021 = vmatmul.mubr.f32.gmra.mrb[108].mxu1 %v6116_v43  ;;  %2103 = vmatprep.mubr.f32.mxu0 %v6118_v13  ;;  %v6292_v54 = vld [vmem:[#allocation3 + $0xc1] sm:$0xff] }
 0x25e   : > { %4475 = vmatpush3.bf16.msra.mxu1 %v4474_v35  ;;  %4023 = vmatprep.mubr.f32.mxu1 %v6120_v41  ;;  %v6222_v35 = vld [vmem:[#allocation3 + $0x81] sm:$0xff] }
 0x25f   : > { %4477 = vmatprep.subr.bf16.mxu1 %v4476_v63  ;;  %4379 = vmatpush3.bf16.msra.mxu0 %v4376_v36  ;;  %v2677_v36 = vld [vmem:[%s6677_s3 + $0x410] sm:$0xff] }
 0x260   : > { %2104 = vmatmul.mubr.f32.gmra.mrb[90].mxu0 %v6137_v53  ;;  %4381 = vmatprep.subr.bf16.mxu0 %v4380_v45  ;;  %v4492_v63 = vpack.c.bf16 %v2678_v33, %v2677_v36  ;;  %v6306_v36 = vld [vmem:[#allocation3 + $0xc9] sm:$0xff] }
 0x261   : > { %4024 = vmatmul.mubr.f32.gmra.mrb[110].mxu1 %v6146_v48  ;;  %2108 = vmatprep.mubr.f32.mxu0 %v6148_v30 }
 0x262   : > { %4479 = vmatpush3.bf16.msra.mxu1 %v4478_v15  ;;  %4026 = vmatprep.mubr.f32.mxu1 %v6150_v21  ;;  %v6247_v15 = vld [vmem:[#allocation3 + $0x90] sm:$0xff] }
 0x263   : > { %4481 = vmatprep.subr.bf16.mxu1 %v4480_v4  ;;  %4383 = vmatpush3.bf16.msra.mxu0 %v4380_v45  ;;  %v4496_v45 = vpack.c.bf16 %v2680_v50, %v2679_v59  ;;  %v6250_v4 = vld [vmem:[#allocation3 + $0x99] sm:$0xff]  ;;  %v1870_v50 = vld [vmem:[%s6677_s3 + $0x8] sm:$0xff] }
 0x264   : > { %2109 = vmatmul.mubr.f32.gmra.mrb[92].mxu0 %v6167_v8  ;;  %4385 = vmatprep.subr.bf16.mxu0 %v4384_v2  ;;  %v1869_v59 = vld [vmem:[%s6677_s3] sm:$0xff] }
 0x265   : > { %4027 = vmatmul.mubr.f32.gmra.mrb[112].mxu1 %v6176_v26  ;;  %2113 = vmatprep.mubr.f32.mxu0 %v6178_v29  ;;  %v4394_v1 = vpack.c.bf16 %v1870_v50, %v1869_v59  ;;  %v1893_v59 = vld [vmem:[%s6677_s3 + $0xc0] sm:$0xff]  ;;  %v1894_v50 = vld [vmem:[%s6677_s3 + $0xc8] sm:$0xff] }
 0x266   : > { %4483 = vmatpush3.bf16.msra.mxu1 %v4482_v3  ;;  %4029 = vmatprep.mubr.f32.mxu1 %v6180_v61  ;;  %v2686_v3 = vld [vmem:[%s6677_s3 + $0x458] sm:$0xff] }
 0x267   : > { %4485 = vmatprep.subr.bf16.mxu1 %v4484_v23  ;;  %4387 = vmatpush3.bf16.msra.mxu0 %v4384_v2  ;;  %v6264_v2 = vld [vmem:[#allocation3 + $0xa9] sm:$0xff]  ;;  %v4508_v56 = vpack.c.bf16 %v2686_v3, %v2685_v52 }
 0x268   : > { %2114 = vmatmul.mubr.f32.gmra.mrb[94].mxu0 %v6197_v0  ;;  %4389 = vmatprep.subr.bf16.mxu0 %v4388_v19  ;;  %v6275_v23 = vld [vmem:[#allocation3 + $0xa8] sm:$0xff] }
 0x269   : > { %4030 = vmatmul.mubr.f32.gmra.mrb[114].mxu1 %v6206_v42  ;;  %2118 = vmatprep.mubr.f32.mxu0 %v6208_v22  ;;  %v1874_v3 = vld [vmem:[%s6677_s3 + $0x28] sm:$0xff] }
 0x26a   : > { %4487 = vmatpush3.bf16.msra.mxu1 %v4486_v5  ;;  %2755 = vmatprep.mubr.f32.mxu1 %v6027_v57  ;;  %v2689_v5 = vld [vmem:[%s6677_s3 + $0x470] sm:$0xff] }
 0x26b   : > { %4391 = vmatpush3.bf16.msra.mxu0 %v4388_v19  ;;  %4489 = vmatprep.subr.bf16.mxu1 %v4488_v34  ;;  %v2687_v19 = vld [vmem:[%s6677_s3 + $0x460] sm:$0xff] }
 0x26c   : > { %2119 = vmatmul.mubr.f32.gmra.mrb[96].mxu0 %v6219_v9  ;;  %4393 = vmatprep.subr.bf16.mxu0 %v4392_v46  ;;  %v4512_v14 = vpack.c.bf16 %v2688_v28, %v2687_v19  ;;  %v6303_v46 = vld [vmem:[#allocation3 + $0xc0] sm:$0xff]  ;;  %v1891_v19 = vld [vmem:[%s6677_s3 + $0xb0] sm:$0xff]  ;;  %v1892_v28 = vld [vmem:[%s6677_s3 + $0xb8] sm:$0xff] }
 0x26d   : > { %2756 = vmatmul.mubr.f32.vlgmr.msra.gmra.mrb[116].mxu1 %v6047_v62  ;;  %2123 = vmatprep.mubr.f32.mxu0 %v6222_v35 }
 0x26e   : > { %2760 = vmatprep.mubr.f32.mxu1 %v6058_v11  ;;  %4491 = vmatpush3.bf16.msra.mxu1 %v4488_v34  ;;  %v2690_v34 = vld [vmem:[%s6677_s3 + $0x478] sm:$0xff] }
 0x26f   : > { %4493 = vmatprep.subr.bf16.mxu1 %v4492_v63  ;;  %v4516_v33 = vpack.c.bf16 %v2690_v34, %v2689_v5  ;;  %v1875_v5 = vld [vmem:[%s6677_s3 + $0x30] sm:$0xff]  ;;  %v1876_v34 = vld [vmem:[%s6677_s3 + $0x38] sm:$0xff] }
 0x270   : > { %2124 = vmatmul.mubr.f32.gmra.mrb[98].mxu0 %v6233_v10 }
 0x271   : > { %2761 = vmatmul.mubr.f32.gmra.mrb[118].mxu1 %v6077_v51  ;;  %2128 = vmatprep.mubr.f32.mxu0 %v6236_v40 }
 0x272   : > { %2765 = vmatprep.mubr.f32.mxu1 %v6088_v38  ;;  %4495 = vmatpush3.bf16.msra.mxu1 %v4492_v63  ;;  %v6311_v63 = vld [vmem:[#allocation3 + $0xc8] sm:$0xff] }
 0x273   : > { %4497 = vmatprep.subr.bf16.mxu1 %v4496_v45 }
 0x274   : > { %2129 = vmatmul.mubr.f32.gmra.mrb[100].mxu0 %v6247_v15 }
 0x275   : > { %2766 = vmatmul.mubr.f32.gmra.mrb[120].mxu1 %v6107_v32  ;;  %2133 = vmatprep.mubr.f32.mxu0 %v6250_v4 }
 0x276   : > { %2770 = vmatprep.mubr.f32.mxu1 %v6118_v13  ;;  %4499 = vmatpush3.bf16.msra.mxu1 %v4496_v45  ;;  %v1887_v45 = vld [vmem:[%s6677_s3 + $0x90] sm:$0xff] }
 0x277   : > { %4501 = vmatprep.subr.bf16.mxu1 %v4500_v47  ;;  %v4396_v17 = vpack.c.bf16 %v1888_v44, %v1887_v45  ;;  %v4406_v45 = vpack.c.bf16 %v1876_v34, %v1875_v5  ;;  %v1877_v44 = vld [vmem:[%s6677_s3 + $0x40] sm:$0xff] }
 0x278   : > { %2134 = vmatmul.mubr.f32.gmra.mrb[102].mxu0 %v6261_v24 }
 0x279   : > { %2771 = vmatmul.mubr.f32.gmra.mrb[122].mxu1 %v6137_v53  ;;  %2138 = vmatprep.mubr.f32.mxu0 %v6264_v2 }
 0x27a   : > { %2775 = vmatprep.mubr.f32.mxu1 %v6148_v30  ;;  %4503 = vmatpush3.bf16.msra.mxu1 %v4500_v47  ;;  %v1871_v47 = vld [vmem:[%s6677_s3 + $0x10] sm:$0xff] }
 0x27b   : > { %4505 = vmatprep.subr.bf16.mxu1 %v4504_v55  ;;  %v4398_v52 = vpack.c.bf16 %v1872_v7, %v1871_v47  ;;  %v4408_v47 = vpack.c.bf16 %v1894_v50, %v1893_v59  ;;  %v1895_v7 = vld [vmem:[%s6677_s3 + $0xd0] sm:$0xff]  ;;  %v1884_v50 = vld [vmem:[%s6677_s3 + $0x78] sm:$0xff] }
 0x27c   : > { %2139 = vmatmul.mubr.f32.gmra.mrb[104].mxu0 %v6275_v23  ;;  %v1883_v59 = vld [vmem:[%s6677_s3 + $0x70] sm:$0xff] }
 0x27d   : > { %2776 = vmatmul.mubr.f32.gmra.mrb[124].mxu1 %v6167_v8  ;;  %2143 = vmatprep.mubr.f32.mxu0 %v6278_v31 }
 0x27e   : > { %2780 = vmatprep.mubr.f32.mxu1 %v6178_v29  ;;  %4507 = vmatpush3.bf16.msra.mxu1 %v4504_v55  ;;  %v1889_v55 = vld [vmem:[%s6677_s3 + $0xa0] sm:$0xff] }
 0x27f   : > { %4509 = vmatprep.subr.bf16.mxu1 %v4508_v56 }
 0x280   : > { %2144 = vmatmul.mubr.f32.gmra.mrb[106].mxu0 %v6289_v58 }
 0x281   : > { %2781 = vmatmul.mubr.f32.gmra.mrb[126].mxu1 %v6197_v0  ;;  %2148 = vmatprep.mubr.f32.mxu0 %v6292_v54 }
 0x282   : > { %2785 = vmatprep.mubr.f32.mxu1 %v6208_v22  ;;  %4511 = vmatpush3.bf16.msra.mxu1 %v4508_v56 }
 0x283   : > { %4513 = vmatprep.subr.bf16.mxu1 %v4512_v14 }
 0x284   : > { %2149 = vmatmul.mubr.f32.gmra.mrb[108].mxu0 %v6303_v46 }
 0x285   : > { %2786 = vmatmul.mubr.f32.gmra.mrb[128].mxu1 %v6219_v9  ;;  %2153 = vmatprep.mubr.f32.mxu0 %v6306_v36 }
 0x286   : > { %2790 = vmatprep.mubr.f32.mxu1 %v6222_v35  ;;  %4515 = vmatpush3.bf16.msra.mxu1 %v4512_v14 }
 0x287   : > { %4517 = vmatprep.subr.bf16.mxu1 %v4516_v33 }
 0x288   : > { %2154 = vmatmul.mubr.f32.gmra.mrb[110].mxu0 %v6311_v63 }
 0x289   : > { %2791 = vmatmul.mubr.f32.gmra.mrb[130].mxu1 %v6233_v10  ;;  %3952 = vmatprep.mubr.f32.mxu0 %v6008_v20  ;;  %v1890_v20 = vld [vmem:[%s6677_s3 + $0xa8] sm:$0xff] }
 0x28a   : > { %2795 = vmatprep.mubr.f32.mxu1 %v6236_v40  ;;  %4519 = vmatpush3.bf16.msra.mxu1 %v4516_v33  ;;  %v4400_v56 = vpack.c.bf16 %v1890_v20, %v1889_v55  ;;  %v4404_v33 = vpack.c.bf16 %v1892_v28, %v1891_v19  ;;  %v1879_v20 = vld [vmem:[%s6677_s3 + $0x50] sm:$0xff]  ;;  %v1881_v19 = vld [vmem:[%s6677_s3 + $0x60] sm:$0xff]  ;;  %v1882_v28 = vld [vmem:[%s6677_s3 + $0x68] sm:$0xff] }
 0x28b   : > { %v4418_v34 = vpack.c.bf16 %v1882_v28, %v1881_v19 }
 0x28c   : > { %3953 = vmatmul.mubr.f32.vlgmr.msra.gmra.mrb[112].mxu0 %v6025_v60  ;;  %v1873_v60 = vld [vmem:[%s6677_s3 + $0x20] sm:$0xff] }
 0x28d   : > { %2796 = vmatmul.mubr.f32.gmra.mrb[132].mxu1 %v6247_v15  ;;  %4395 = vmatpush3.bf16.msra.mxu0 %v4394_v1  ;;  %v4402_v14 = vpack.c.bf16 %v1874_v3, %v1873_v60  ;;  %v1878_v1 = vld [vmem:[%s6677_s3 + $0x48] sm:$0xff]  ;;  %v1897_v3 = vld [vmem:[%s6677_s3 + $0xe0] sm:$0xff] }
 0x28e   : > { %3955 = vmatprep.mubr.f32.mxu0 %v6030_v18  ;;  %2800 = vmatprep.mubr.f32.mxu1 %v6250_v4  ;;  %v4410_v55 = vpack.c.bf16 %v1878_v1, %v1877_v44  ;;  %v2626_v44 = vld [vmem:[#allocation3 + $0xe1] sm:$0xff] }
 0x28f   : > { %4397 = vmatprep.subr.bf16.mxu0 %v4396_v17  ;;  %v1896_v17 = vld [vmem:[%s6677_s3 + $0xd8] sm:$0xff] }
 0x290   : > { %3956 = vmatmul.mubr.f32.gmra.mrb[114].mxu0 %v6056_v12  ;;  %v4412_v60 = vpack.c.bf16 %v1896_v17, %v1895_v7  ;;  %v2610_v7 = vld [vmem:[#allocation3 + $0xe0] sm:$0xff] }
 0x291   : > { %2801 = vmatmul.mubr.f32.gmra.mrb[134].mxu1 %v6261_v24  ;;  %4399 = vmatpush3.bf16.msra.mxu0 %v4398_v52  ;;  %v1880_v52 = vld [vmem:[%s6677_s3 + $0x58] sm:$0xff]  ;;  %v1837_v17 = vld [vmem:[#allocation3 + $0x1] sm:$0xff] }
 0x292   : > { %3958 = vmatprep.mubr.f32.mxu0 %v6060_v25  ;;  %2805 = vmatprep.mubr.f32.mxu1 %v6264_v2 }
 0x293   : > { %4401 = vmatprep.subr.bf16.mxu0 %v4400_v56  ;;  %v4414_v56 = vpack.c.bf16 %v1880_v52, %v1879_v20  ;;  %v1838_v20 = vld [vmem:[#allocation3 + $0x9] sm:$0xff] }
 0x294   : > { %3959 = vmatmul.mubr.f32.gmra.mrb[116].mxu0 %v6086_v6  ;;  %v1822_v52 = vld [vmem:[#allocation3 + $0x8] sm:$0xff] }
 0x295   : > { %2806 = vmatmul.mubr.f32.gmra.mrb[136].mxu1 %v6275_v23  ;;  %4403 = vmatpush3.bf16.msra.mxu0 %v4402_v14  ;;  %v2625_v14 = vld [vmem:[#allocation3 + $0xd9] sm:$0xff] }
 0x296   : > { %3961 = vmatprep.mubr.f32.mxu0 %v6090_v16  ;;  %2810 = vmatprep.mubr.f32.mxu1 %v6278_v31 }
 0x297   : > { %4405 = vmatprep.subr.bf16.mxu0 %v4404_v33  ;;  %v2609_v33 = vld [vmem:[#allocation3 + $0xd8] sm:$0xff] }
 0x298   : > { %3962 = vmatmul.mubr.f32.gmra.mrb[118].mxu0 %v6116_v43 }
 0x299   : > { %2811 = vmatmul.mubr.f32.gmra.mrb[138].mxu1 %v6289_v58  ;;  %4407 = vmatpush3.bf16.msra.mxu0 %v4406_v45  ;;  %v1964_v45 = vld [vmem:[#allocation3 + $0xc2] sm:$0xff] }
 0x29a   : > { %3964 = vmatprep.mubr.f32.mxu0 %v6120_v41  ;;  %2815 = vmatprep.mubr.f32.mxu1 %v6292_v54  ;;  %v1898_v54 = vld [vmem:[%s6677_s3 + $0xe8] sm:$0xff] }
 0x29b   : > { %4409 = vmatprep.subr.bf16.mxu0 %v4408_v47  ;;  %v4416_v5 = vpack.c.bf16 %v1898_v54, %v1897_v3  ;;  %v4422_v47 = vpack.c.bf16 %v1884_v50, %v1883_v59 }
 0x29c   : > { %3965 = vmatmul.mubr.f32.gmra.mrb[120].mxu0 %v6146_v48 }
 0x29d   : > { %2816 = vmatmul.mubr.f32.gmra.mrb[140].mxu1 %v6303_v46  ;;  %4411 = vmatpush3.bf16.msra.mxu0 %v4410_v55  ;;  %v1899_v46 = vld [vmem:[%s6677_s3 + $0xf0] sm:$0xff]  ;;  %v1821_v55 = vld [vmem:[#allocation3] sm:$0xff] }
 0x29e   : > { %3967 = vmatprep.mubr.f32.mxu0 %v6150_v21  ;;  %2820 = vmatprep.mubr.f32.mxu1 %v6306_v36  ;;  %v1900_v36 = vld [vmem:[%s6677_s3 + $0xf8] sm:$0xff] }
 0x29f   : > { %4413 = vmatprep.subr.bf16.mxu0 %v4412_v60  ;;  %v4420_v1 = vpack.c.bf16 %v1900_v36, %v1899_v46 }
 0x2a0   : > { %3968 = vmatmul.mubr.f32.gmra.mrb[122].mxu0 %v6176_v26 }
 0x2a1   : > { %2821 = vmatmul.mubr.f32.gmra.mrb[142].mxu1 %v6311_v63  ;;  %4415 = vmatpush3.bf16.msra.mxu0 %v4414_v56  ;;  %v1965_v63 = vld [vmem:[#allocation3 + $0xca] sm:$0xff] }
 0x2a2   : > { %3970 = vmatprep.mubr.f32.mxu0 %v6180_v61  ;;  %2825 = vmatprep.mubr.f32.mxu1 %v2625_v14 }
 0x2a3   : > { %4417 = vmatprep.subr.bf16.mxu0 %v4416_v5 }
 0x2a4   : > { %3971 = vmatmul.mubr.f32.gmra.mrb[124].mxu0 %v6206_v42 }
 0x2a5   : > { %2826 = vmatmul.mubr.f32.gmra.mrb[144].mxu1 %v2609_v33  ;;  %4419 = vmatpush3.bf16.msra.mxu0 %v4418_v34 }
 0x2a6   : > { %3973 = vmatprep.mubr.f32.mxu0 %v1964_v45  ;;  %2830 = vmatprep.mubr.f32.mxu1 %v2626_v44 }
 0x2a7   : > { %4421 = vmatprep.subr.bf16.mxu0 %v4420_v1 }
 0x2a8   : > { %3974 = vmatmul.mubr.f32.gmra.mrb[126].mxu0 %v1965_v63 }
 0x2a9   : > { %2831 = vmatmul.mubr.f32.gmra.mrb[146].mxu1 %v2610_v7  ;;  %4423 = vmatpush3.bf16.msra.mxu0 %v4422_v47 }
 0x2aa   : > { %2368 = vmatprep.mubr.f32.mxu0 %v1837_v17  ;;  %4064 = vmatprep.mubr.f32.mxu1 %v6030_v18 }
 0x2ac   : > { %2369 = vmatmul.mubr.f32.vlgmr.msra.gmra.mrb[128].mxu0 %v1821_v55 }
 0x2ad   : > { %4065 = vmatmul.mubr.f32.vlgmr.msra.gmra.mrb[100].mxu1 %v6056_v12  ;;  %2373 = vmatprep.mubr.f32.mxu0 %v1838_v20 }
 0x2ae   : > { %4067 = vmatprep.mubr.f32.mxu1 %v6060_v25 }
 0x2b0   : > { %2374 = vmatmul.mubr.f32.gmra.mrb[130].mxu0 %v1822_v52 }
 0x2b1   : > { %4068 = vmatmul.mubr.f32.gmra.mrb[102].mxu1 %v6086_v6  ;;  %2378 = vmatprep.mubr.f32.mxu0 %v5922_v39  ;;  %v2641_v39 = vld [vmem:[#allocation3 + $0xda] sm:$0xff] }
 0x2b2   : > { %4070 = vmatprep.mubr.f32.mxu1 %v6090_v16 }
 0x2b4   : > { %2379 = vmatmul.mubr.f32.gmra.mrb[132].mxu0 %v5991_v27  ;;  %v2642_v27 = vld [vmem:[#allocation3 + $0xe2] sm:$0xff] }
 0x2b5   : > { %4071 = vmatmul.mubr.f32.gmra.mrb[104].mxu1 %v6116_v43  ;;  %2383 = vmatprep.mubr.f32.mxu0 %v5999_v49 }
 0x2b6   : > { %4073 = vmatprep.mubr.f32.mxu1 %v6120_v41 }
 0x2b8   : > { %2384 = vmatmul.mubr.f32.gmra.mrb[134].mxu0 %v6016_v37 }
 0x2b9   : > { %4074 = vmatmul.mubr.f32.gmra.mrb[106].mxu1 %v6146_v48  ;;  %2388 = vmatprep.mubr.f32.mxu0 %v6027_v57 }
 0x2ba   : > { %4076 = vmatprep.mubr.f32.mxu1 %v6150_v21 }
 0x2bc   : > { %2389 = vmatmul.mubr.f32.gmra.mrb[136].mxu0 %v6047_v62 }
 0x2bd   : > { %4077 = vmatmul.mubr.f32.gmra.mrb[108].mxu1 %v6176_v26  ;;  %2393 = vmatprep.mubr.f32.mxu0 %v6058_v11 }
 0x2be   : > { %4079 = vmatprep.mubr.f32.mxu1 %v6180_v61 }
 0x2c0   : > { %2394 = vmatmul.mubr.f32.gmra.mrb[138].mxu0 %v6077_v51 }
 0x2c1   : > { %4080 = vmatmul.mubr.f32.gmra.mrb[110].mxu1 %v6206_v42  ;;  %2398 = vmatprep.mubr.f32.mxu0 %v6088_v38 }
 0x2c2   : > { %4082 = vmatprep.mubr.f32.mxu1 %v1964_v45 }
 0x2c4   : > { %2399 = vmatmul.mubr.f32.gmra.mrb[140].mxu0 %v6107_v32 }
 0x2c5   : > { %4083 = vmatmul.mubr.f32.gmra.mrb[112].mxu1 %v1965_v63  ;;  %2403 = vmatprep.mubr.f32.mxu0 %v6118_v13 }
 0x2c6   : > { %4085 = vmatprep.mubr.f32.mxu1 %v2641_v39 }
 0x2c8   : > { %2404 = vmatmul.mubr.f32.gmra.mrb[142].mxu0 %v6137_v53 }
 0x2c9   : > { %4086 = vmatmul.mubr.f32.gmra.mrb[114].mxu1 %v2642_v27  ;;  %2408 = vmatprep.mubr.f32.mxu0 %v6148_v30 }
 0x2cc   : > { %2409 = vmatmul.mubr.f32.gmra.mrb[144].mxu0 %v6167_v8 }
 0x2cd   : > { %2413 = vmatprep.mubr.f32.mxu0 %v6178_v29 }
 0x2d0   : > { %2414 = vmatmul.mubr.f32.gmra.mrb[146].mxu0 %v6197_v0 }
 0x2d1   : > { %2418 = vmatprep.mubr.f32.mxu0 %v6208_v22 }
 0x2d4   : > { %2419 = vmatmul.mubr.f32.gmra.mrb[148].mxu0 %v6219_v9 }
 0x2d5   : > { %2423 = vmatprep.mubr.f32.mxu0 %v6222_v35 }
 0x2d8   : > { %2424 = vmatmul.mubr.f32.gmra.mrb[150].mxu0 %v6233_v10 }
 0x2d9   : > { %2428 = vmatprep.mubr.f32.mxu0 %v6236_v40 }
 0x2dc   : > { %2429 = vmatmul.mubr.f32.gmra.mrb[152].mxu0 %v6247_v15 }
 0x2dd   : > { %2433 = vmatprep.mubr.f32.mxu0 %v6250_v4 }
 0x2e0   : > { %2434 = vmatmul.mubr.f32.gmra.mrb[154].mxu0 %v6261_v24 }
 0x2e1   : > { %2438 = vmatprep.mubr.f32.mxu0 %v6264_v2 }
 0x2e4   : > { %2439 = vmatmul.mubr.f32.gmra.mrb[156].mxu0 %v6275_v23 }
 0x2e5   : > { %2443 = vmatprep.mubr.f32.mxu0 %v6278_v31 }
 0x2e8   : > { %2444 = vmatmul.mubr.f32.gmra.mrb[158].mxu0 %v6289_v58 }
 0x31f   : > { %v3430_v49 = vpop.f32.mrb[80].mxu0 }
 0x320   : > { %v3431_v37 = vpop.f32.mrb[81].mxu0 }
 0x321   : > { %v6472_v57 = vadd.f32 %v3431_v37, %v3430_v49 }
 0x323   : > { %v3433_v18 = vpop.f32.mrb[82].mxu0 }
 0x324   : > { %v3434_v62 = vpop.f32.mrb[83].mxu0 }
 0x325   : > { %v6474_v12 = vadd.f32 %v3434_v62, %v3433_v18 }
 0x327   : > { %v3436_v11 = vpop.f32.mrb[84].mxu0 }
 0x328   : > { %v3437_v25 = vpop.f32.mrb[85].mxu0 }
 0x329   : > { %v6476_v51 = vadd.f32 %v3437_v25, %v3436_v11 }
 0x32b   : > { %v3439_v6 = vpop.f32.mrb[86].mxu0 }
 0x32c   : > { %v3440_v38 = vpop.f32.mrb[87].mxu0 }
 0x32d   : > { %v6478_v16 = vadd.f32 %v3440_v38, %v3439_v6 }
 0x32f   : > { %v3442_v32 = vpop.f32.mrb[88].mxu0 }
 0x330   : > { %v3443_v43 = vpop.f32.mrb[89].mxu0 }
 0x331   : > { %v6480_v13 = vadd.f32 %v3443_v43, %v3442_v32 }
 0x333   : > { %v3445_v41 = vpop.f32.mrb[90].mxu0 }
 0x334   : > { %v3446_v53 = vpop.f32.mrb[91].mxu0 }
 0x335   : > { %v6482_v48 = vadd.f32 %v3446_v53, %v3445_v41 }
 0x337   : > { %v3448_v30 = vpop.f32.mrb[92].mxu0 }
 0x338   : > { %v3449_v21 = vpop.f32.mrb[93].mxu0 }
 0x339   : > { %v6484_v8 = vadd.f32 %v3449_v21, %v3448_v30 }
 0x33b   : > { %v3451_v26 = vpop.f32.mrb[94].mxu0 }
 0x33c   : > { %v3452_v29 = vpop.f32.mrb[95].mxu0 }
 0x33d   : > { %v6486_v61 = vadd.f32 %v3452_v29, %v3451_v26 }
 0x33f   : > { %v3454_v0 = vpop.f32.mrb[96].mxu0 }
 0x340   : > { %v3455_v42 = vpop.f32.mrb[97].mxu0  ;;  %v3654_v22 = vpop.f32.mrb[116].mxu1 }
 0x341   : > { %v6488_v9 = vadd.f32 %v3455_v42, %v3454_v0  ;;  %v3655_v35 = vpop.f32.mrb[117].mxu1 }
 0x342   : > { %v6490_v10 = vadd.f32 %v3655_v35, %v3654_v22 }
 0x343   : > { %v3457_v40 = vpop.f32.mrb[98].mxu0 }
 0x344   : > { %v3458_v15 = vpop.f32.mrb[99].mxu0  ;;  %v3657_v4 = vpop.f32.mrb[118].mxu1 }
 0x345   : > { %v6492_v24 = vadd.f32 %v3458_v15, %v3457_v40  ;;  %v3658_v2 = vpop.f32.mrb[119].mxu1 }
 0x346   : > { %v6494_v23 = vadd.f32 %v3658_v2, %v3657_v4 }
 0x347   : > { %v3460_v31 = vpop.f32.mrb[100].mxu0 }
 0x348   : > { %v3461_v58 = vpop.f32.mrb[101].mxu0  ;;  %v3660_v60 = vpop.f32.mrb[120].mxu1 }
 0x349   : > { %v6496_v3 = vadd.f32 %v3461_v58, %v3460_v31  ;;  %v3661_v54 = vpop.f32.mrb[121].mxu1 }
 0x34a   : > { %v6498_v56 = vadd.f32 %v3661_v54, %v3660_v60 }
 0x34b   : > { %v3463_v19 = vpop.f32.mrb[102].mxu0 }
 0x34c   : > { %v3464_v28 = vpop.f32.mrb[103].mxu0  ;;  %v3663_v14 = vpop.f32.mrb[122].mxu1 }
 0x34d   : > { %v6500_v5 = vadd.f32 %v3464_v28, %v3463_v19  ;;  %v3664_v46 = vpop.f32.mrb[123].mxu1 }
 0x34e   : > { %v6502_v36 = vadd.f32 %v3664_v46, %v3663_v14 }
 0x34f   : > { %v3466_v34 = vpop.f32.mrb[104].mxu0 }
 0x350   : > { %v3467_v33 = vpop.f32.mrb[105].mxu0  ;;  %v3666_v59 = vpop.f32.mrb[124].mxu1 }
 0x351   : > { %v6504_v50 = vadd.f32 %v3467_v33, %v3466_v34  ;;  %v3667_v45 = vpop.f32.mrb[125].mxu1 }
 0x352   : > { %v6506_v44 = vadd.f32 %v3667_v45, %v3666_v59 }
 0x353   : > { %v3469_v1 = vpop.f32.mrb[106].mxu0 }
 0x354   : > { %v3470_v63 = vpop.f32.mrb[107].mxu0  ;;  %v3669_v47 = vpop.f32.mrb[126].mxu1 }
 0x355   : > { %v3471_v7 = vadd.f32 %v3470_v63, %v3469_v1  ;;  %v3670_v17 = vpop.f32.mrb[127].mxu1 }
 0x356   : > { %v6508_v55 = vadd.f32 %v3670_v17, %v3669_v47 }
 0x357   : > { %v3472_v20 = vpop.f32.mrb[108].mxu0 }
 0x358   : > { %v3473_v52 = vpop.f32.mrb[109].mxu0  ;;  %v3672_v39 = vpop.f32.mrb[128].mxu1 }
 0x359   : > { %v3474_v27 = vadd.f32 %v3473_v52, %v3472_v20  ;;  %v3673_v49 = vpop.f32.mrb[129].mxu1 }
 0x35a   : > { %v6510_v37 = vadd.f32 %v3673_v49, %v3672_v39 }
 0x35b   : > { %v3475_v18 = vpop.f32.mrb[110].mxu0 }
 0x35c   : > { %v3476_v62 = vpop.f32.mrb[111].mxu0  ;;  %v3675_v11 = vpop.f32.mrb[130].mxu1 }
 0x35d   : > { %v3477_v25 = vadd.f32 %v3476_v62, %v3475_v18  ;;  %v3676_v6 = vpop.f32.mrb[131].mxu1 }
 0x35e   : > { %v6512_v38 = vadd.f32 %v3676_v6, %v3675_v11 }
 0x35f   : > { %v3954_v32 = vpop.f32.mrb[112].mxu0 }
 0x360   : > { %v6515_v43 = vadd.f32 %v3954_v32, %v6474_v12  ;;  %v2225_v41 = vpop.f32.mrb[113].mxu0  ;;  %v3678_v53 = vpop.f32.mrb[132].mxu1 }
 0x361   : > { %v2226_v30 = vadd.f32 %v6472_v57, %v2225_v41  ;;  %v3679_v21 = vpop.f32.mrb[133].mxu1 }
 0x362   : > { %v6518_v26 = vadd.f32 %v3679_v21, %v3678_v53 }
 0x363   : > { %v3957_v29 = vpop.f32.mrb[114].mxu0 }
 0x364   : > { %v6521_v0 = vadd.f32 %v3957_v29, %v6478_v16  ;;  %v2235_v42 = vpop.f32.mrb[115].mxu0  ;;  %v3681_v22 = vpop.f32.mrb[134].mxu1 }
 0x365   : > { %v6524_v35 = vadd.f32 %v6476_v51, %v2235_v42  ;;  %v3682_v40 = vpop.f32.mrb[135].mxu1 }
 0x366   : > { %v6526_v15 = vadd.f32 %v3682_v40, %v3681_v22 }
 0x367   : > { %v3960_v12 = vpop.f32.mrb[116].mxu0 }
 0x368   : > { %v6529_v4 = vadd.f32 %v3960_v12, %v6482_v48  ;;  %v2245_v57 = vpop.f32.mrb[117].mxu0  ;;  %v3684_v2 = vpop.f32.mrb[136].mxu1 }
 0x369   : > { %v6532_v31 = vadd.f32 %v6480_v13, %v2245_v57  ;;  %v3685_v58 = vpop.f32.mrb[137].mxu1 }
 0x36a   : > { %v6534_v16 = vadd.f32 %v3685_v58, %v3684_v2 }
 0x36b   : > { %v3963_v60 = vpop.f32.mrb[118].mxu0 }
 0x36c   : > { %v6537_v54 = vadd.f32 %v3963_v60, %v6486_v61  ;;  %v2255_v51 = vpop.f32.mrb[119].mxu0  ;;  %v3687_v19 = vpop.f32.mrb[138].mxu1 }
 0x36d   : > { %v6540_v28 = vadd.f32 %v6484_v8, %v2255_v51  ;;  %v3688_v14 = vpop.f32.mrb[139].mxu1 }
 0x36e   : > { %v6542_v48 = vadd.f32 %v3688_v14, %v3687_v19 }
 0x36f   : > { %v3966_v46 = vpop.f32.mrb[120].mxu0 }
 0x370   : > { %v6545_v34 = vadd.f32 %v3966_v46, %v6492_v24  ;;  %v2265_v13 = vpop.f32.mrb[121].mxu0  ;;  %v3690_v33 = vpop.f32.mrb[140].mxu1 }
 0x371   : > { %v6548_v59 = vadd.f32 %v6488_v9, %v2265_v13  ;;  %v3691_v45 = vpop.f32.mrb[141].mxu1 }
 0x372   : > { %v6550_v61 = vadd.f32 %v3691_v45, %v3690_v33 }
 0x373   : > { %v3969_v1 = vpop.f32.mrb[122].mxu0 }
 0x374   : > { %v6553_v63 = vadd.f32 %v3969_v1, %v6500_v5  ;;  %v2275_v8 = vpop.f32.mrb[123].mxu0  ;;  %v3693_v47 = vpop.f32.mrb[142].mxu1 }
 0x375   : > { %v6556_v17 = vadd.f32 %v6496_v3, %v2275_v8  ;;  %v3694_v20 = vpop.f32.mrb[143].mxu1 }
 0x376   : > { %v6558_v24 = vadd.f32 %v3694_v20, %v3693_v47 }
 0x377   : > { %v3972_v52 = vpop.f32.mrb[124].mxu0 }
 0x378   : > { %v6560_v39 = vadd.f32 %v3972_v52, %v3471_v7  ;;  %v2285_v9 = vpop.f32.mrb[125].mxu0  ;;  %v3696_v49 = vpop.f32.mrb[144].mxu1 }
 0x379   : > { %v6563_v18 = vadd.f32 %v6504_v50, %v2285_v9  ;;  %v3697_v62 = vpop.f32.mrb[145].mxu1 }
 0x37a   : > { %v6565_v11 = vadd.f32 %v3697_v62, %v3696_v49 }
 0x37b   : > { %v3975_v5 = vpop.f32.mrb[126].mxu0 }
 0x37c   : > { %v6567_v6 = vadd.f32 %v3975_v5, %v3477_v25  ;;  %v2295_v32 = vpop.f32.mrb[127].mxu0  ;;  %v3699_v3 = vpop.f32.mrb[146].mxu1 }
 0x37d   : > { %v6569_v41 = vadd.f32 %v3474_v27, %v2295_v32  ;;  %v3700_v53 = vpop.f32.mrb[147].mxu1  ;;  %v6577_v27 = vld [vmem:[%s6678_s4] ss:$0 sm:$0xff] }
 0x37e   : > { %v6571_v21 = vadd.f32 %v3700_v53, %v3699_v3 }
 0x37f   : > { %v3542_v7 = vpop.f32.mrb[128].mxu0 }
 0x380   : > { %v4066_v29 = vpop.f32.mrb[100].mxu1  ;;  %v3543_v42 = vpop.f32.mrb[129].mxu0 }
 0x381   : > { %v3544_v22 = vadd.f32 %v3543_v42, %v3542_v7  ;;  %v2902_v40 = vpop.f32.mrb[101].mxu1 }
 0x383   : > { %v2371_v50 = vadd.f32 %v3544_v22, %v2226_v30  ;;  %v3545_v12 = vpop.f32.mrb[130].mxu0 }
 0x384   : > { %v4069_v57 = vpop.f32.mrb[102].mxu1  ;;  %v3546_v2 = vpop.f32.mrb[131].mxu0 }
 0x385   : > { %v4526_v58 = vadd.f32 %v6490_v10, %v2371_v50  ;;  %v3547_v25 = vadd.f32 %v3546_v2, %v3545_v12  ;;  %v2912_v60 = vpop.f32.mrb[103].mxu1 }
 0x387   : > { %v4527_v51 = vadd.f32 %v4526_v58, %v2902_v40  ;;  %v2376_v19 = vadd.f32 %v3547_v25, %v6515_v43  ;;  %v3548_v14 = vpop.f32.mrb[132].mxu0 }
 0x388   : > { %v4072_v46 = vpop.f32.mrb[104].mxu1  ;;  %v3549_v13 = vpop.f32.mrb[133].mxu0 }
 0x389   : > { %v3004_v30 = vadd.f32 %v4527_v51, %v6577_v27  ;;  %v4522_v33 = vadd.f32 %v6494_v23, %v2376_v19  ;;  %v3550_v45 = vadd.f32 %v3549_v13, %v3548_v14  ;;  %v2922_v10 = vpop.f32.mrb[105].mxu1 }
 0x38b   : > { %v3020_v1 = vmax.f32 %v3004_v30, 0.0  ;;  %v4523_v8 = vadd.f32 %v4522_v33, %v4066_v29  ;;  %v2381_v47 = vadd.f32 %v3550_v45, %v6524_v35  ;;  %v3551_v20 = vpop.f32.mrb[134].mxu0 }
 0x38c   : > { %v4075_v52 = vpop.f32.mrb[106].mxu1  ;;  %v3552_v9 = vpop.f32.mrb[135].mxu0 }
 0x38d   : > { %3036 = vst [vmem:[%s4761_s10] sm:$0xff] %v3020_v1  ;;  %v3005_v43 = vadd.f32 %v4523_v8, %v6577_v27  ;;  %v4534_v49 = vadd.f32 %v6498_v56, %v2381_v47  ;;  %v3553_v62 = vadd.f32 %v3552_v9, %v3551_v20  ;;  %v2932_v5 = vpop.f32.mrb[107].mxu1 }
 0x38f   : > { %v3021_v32 = vmax.f32 %v3005_v43, 0.0  ;;  %v4535_v3 = vadd.f32 %v4534_v49, %v2912_v60  ;;  %v2386_v23 = vadd.f32 %v3553_v62, %v6521_v0  ;;  %v3554_v53 = vpop.f32.mrb[136].mxu0 }
 0x390   : > { %v6587_v7 = vpop.f32.mrb[108].mxu1  ;;  %v3555_v29 = vpop.f32.mrb[137].mxu0 }
 0x391   : > { %3037 = vst [vmem:[%s4761_s10 + $0x8] sm:$0xff] %v3021_v32  ;;  %v3006_v35 = vadd.f32 %v4535_v3, %v6577_v27  ;;  %v4530_v42 = vadd.f32 %v6502_v36, %v2386_v23  ;;  %v3556_v22 = vadd.f32 %v3555_v29, %v3554_v53  ;;  %v2942_v40 = vpop.f32.mrb[109].mxu1 }
 0x393   : > { %v3022_v50 = vmax.f32 %v3006_v35, 0.0  ;;  %v4531_v56 = vadd.f32 %v4530_v42, %v4069_v57  ;;  %v2391_v12 = vadd.f32 %v3556_v22, %v6532_v31  ;;  %v3557_v2 = vpop.f32.mrb[138].mxu0 }
 0x394   : > { %v6593_v58 = vpop.f32.mrb[110].mxu1  ;;  %v3558_v0 = vpop.f32.mrb[139].mxu0 }
 0x395   : > { %3038 = vst [vmem:[%s4761_s10 + $0x10] sm:$0xff] %v3022_v50  ;;  %v3007_v25 = vadd.f32 %v4531_v56, %v6577_v27  ;;  %v4542_v60 = vadd.f32 %v6506_v44, %v2391_v12  ;;  %v3559_v51 = vadd.f32 %v3558_v0, %v3557_v2  ;;  %v2952_v19 = vpop.f32.mrb[111].mxu1 }
 0x397   : > { %v3023_v14 = vmax.f32 %v3007_v25, 0.0  ;;  %v4543_v36 = vadd.f32 %v4542_v60, %v2922_v10  ;;  %v2396_v13 = vadd.f32 %v3559_v51, %v6529_v4  ;;  %v3560_v57 = vpop.f32.mrb[140].mxu0 }
 0x398   : > { %v6599_v30 = vpop.f32.mrb[112].mxu1  ;;  %v3561_v31 = vpop.f32.mrb[141].mxu0 }
 0x399   : > { %3039 = vst [vmem:[%s4761_s10 + $0x18] sm:$0xff] %v3023_v14  ;;  %v3008_v33 = vadd.f32 %v4543_v36, %v6577_v27  ;;  %v4538_v45 = vadd.f32 %v6508_v55, %v2396_v13  ;;  %v3562_v1 = vadd.f32 %v3561_v31, %v3560_v57  ;;  %v6604_v8 = vpop.f32.mrb[113].mxu1 }
 0x39b   : > { %v3024_v44 = vmax.f32 %v3008_v33, 0.0  ;;  %v4539_v47 = vadd.f32 %v4538_v45, %v4072_v46  ;;  %v2401_v10 = vadd.f32 %v3562_v1, %v6540_v28  ;;  %v3563_v20 = vpop.f32.mrb[142].mxu0 }
 0x39c   : > { %v6607_v9 = vpop.f32.mrb[114].mxu1  ;;  %v3564_v4 = vpop.f32.mrb[143].mxu0 }
 0x39d   : > { %3040 = vst [vmem:[%s4761_s10 + $0x20] sm:$0xff] %v3024_v44  ;;  %v3009_v43 = vadd.f32 %v4539_v47, %v6577_v27  ;;  %v4550_v49 = vadd.f32 %v6510_v37, %v2401_v10  ;;  %v3565_v62 = vadd.f32 %v3564_v4, %v3563_v20  ;;  %v6612_v55 = vpop.f32.mrb[115].mxu1 }
 0x39f   : > { %v3025_v32 = vmax.f32 %v3009_v43, 0.0  ;;  %v4551_v3 = vadd.f32 %v4550_v49, %v2932_v5  ;;  %v2406_v23 = vadd.f32 %v3565_v62, %v6537_v54  ;;  %v3566_v46 = vpop.f32.mrb[144].mxu0 }
 0x3a0   : > { %v3567_v53 = vpop.f32.mrb[145].mxu0 }
 0x3a1   : > { %3041 = vst [vmem:[%s4761_s10 + $0x28] sm:$0xff] %v3025_v32  ;;  %v3010_v28 = vadd.f32 %v4551_v3, %v6577_v27  ;;  %v4546_v29 = vadd.f32 %v6512_v38, %v2406_v23  ;;  %v3568_v35 = vadd.f32 %v3567_v53, %v3566_v46 }
 0x3a3   : > { %v3026_v42 = vmax.f32 %v3010_v28, 0.0  ;;  %v4547_v22 = vadd.f32 %v4546_v29, %v4075_v52  ;;  %v2411_v37 = vadd.f32 %v3568_v35, %v6548_v59  ;;  %v3569_v50 = vpop.f32.mrb[146].mxu0 }
 0x3a4   : > { %v3570_v56 = vpop.f32.mrb[147].mxu0 }
 0x3a5   : > { %3042 = vst [vmem:[%s4761_s10 + $0x30] sm:$0xff] %v3026_v42  ;;  %v3011_v5 = vadd.f32 %v4547_v22, %v6577_v27  ;;  %v4558_v54 = vadd.f32 %v6518_v26, %v2411_v37  ;;  %v3571_v12 = vadd.f32 %v3570_v56, %v3569_v50 }
 0x3a7   : > { %v3027_v2 = vmax.f32 %v3011_v5, 0.0  ;;  %v4559_v0 = vadd.f32 %v4558_v54, %v2942_v40  ;;  %v2416_v25 = vadd.f32 %v3571_v12, %v6545_v34  ;;  %v3572_v38 = vpop.f32.mrb[148].mxu0 }
 0x3a8   : > { %v3573_v60 = vpop.f32.mrb[149].mxu0 }
 0x3a9   : > { %3043 = vst [vmem:[%s4761_s10 + $0x38] sm:$0xff] %v3027_v2  ;;  %v3012_v52 = vadd.f32 %v4559_v0, %v6577_v27  ;;  %v4554_v59 = vadd.f32 %v6526_v15, %v2416_v25  ;;  %v3574_v51 = vadd.f32 %v3573_v60, %v3572_v38 }
 0x3ab   : > { %v3028_v14 = vmax.f32 %v3012_v52, 0.0  ;;  %v4555_v36 = vadd.f32 %v4554_v59, %v6587_v7  ;;  %v2421_v26 = vadd.f32 %v3574_v51, %v6556_v17  ;;  %v3575_v13 = vpop.f32.mrb[150].mxu0 }
 0x3ac   : > { %v3576_v57 = vpop.f32.mrb[151].mxu0 }
 0x3ad   : > { %3044 = vst [vmem:[%s4761_s10 + $0x40] sm:$0xff] %v3028_v14  ;;  %v3013_v40 = vadd.f32 %v4555_v36, %v6577_v27  ;;  %v4566_v34 = vadd.f32 %v6534_v16, %v2421_v26  ;;  %v3577_v31 = vadd.f32 %v3576_v57, %v3575_v13 }
 0x3af   : > { %v3029_v33 = vmax.f32 %v3013_v40, 0.0  ;;  %v4567_v45 = vadd.f32 %v4566_v34, %v2952_v19  ;;  %v2426_v15 = vadd.f32 %v3577_v31, %v6553_v63  ;;  %v3578_v1 = vpop.f32.mrb[152].mxu0 }
 0x3b0   : > { %v3579_v44 = vpop.f32.mrb[153].mxu0 }
 0x3b1   : > { %3045 = vst [vmem:[%s4761_s10 + $0x48] sm:$0xff] %v3029_v33  ;;  %v3014_v7 = vadd.f32 %v4567_v45, %v6577_v27  ;;  %v4562_v17 = vadd.f32 %v6542_v48, %v2426_v15  ;;  %v3580_v47 = vadd.f32 %v3579_v44, %v3578_v1 }
 0x3b3   : > { %v3030_v10 = vmax.f32 %v3014_v7, 0.0  ;;  %v4563_v20 = vadd.f32 %v4562_v17, %v6593_v58  ;;  %v2431_v16 = vadd.f32 %v3580_v47, %v6563_v18  ;;  %v3581_v4 = vpop.f32.mrb[154].mxu0 }
 0x3b4   : > { %v3582_v43 = vpop.f32.mrb[155].mxu0 }
 0x3b5   : > { %3046 = vst [vmem:[%s4761_s10 + $0x50] sm:$0xff] %v3030_v10  ;;  %v3015_v19 = vadd.f32 %v4563_v20, %v6577_v27  ;;  %v4574_v63 = vadd.f32 %v6550_v61, %v2431_v16  ;;  %v3583_v49 = vadd.f32 %v3582_v43, %v3581_v4 }
 0x3b7   : > { %v3031_v62 = vmax.f32 %v3015_v19, 0.0  ;;  %v4575_v32 = vadd.f32 %v4574_v63, %v6604_v8  ;;  %v2436_v48 = vadd.f32 %v3583_v49, %v6560_v39  ;;  %v3584_v3 = vpop.f32.mrb[156].mxu0 }
 0x3b8   : > { %v3585_v23 = vpop.f32.mrb[157].mxu0 }
 0x3b9   : > { %3047 = vst [vmem:[%s4761_s10 + $0x58] sm:$0xff] %v3031_v62  ;;  %v3016_v18 = vadd.f32 %v4575_v32, %v6577_v27  ;;  %v4570_v58 = vadd.f32 %v6558_v24, %v2436_v48  ;;  %v3586_v46 = vadd.f32 %v3585_v23, %v3584_v3 }
 0x3bb   : > { %v3032_v53 = vmax.f32 %v3016_v18, 0.0  ;;  %v4571_v28 = vadd.f32 %v4570_v58, %v6599_v30  ;;  %v2441_v61 = vadd.f32 %v3586_v46, %v6569_v41  ;;  %v3587_v29 = vpop.f32.mrb[158].mxu0 }
 0x3bc   : > { %v3588_v35 = vpop.f32.mrb[159].mxu0 }
 0x3bd   : > { %3048 = vst [vmem:[%s4761_s10 + $0x60] sm:$0xff] %v3032_v53  ;;  %v3017_v39 = vadd.f32 %v4571_v28, %v6577_v27  ;;  %v4582_v8 = vadd.f32 %v6565_v11, %v2441_v61  ;;  %v3589_v42 = vadd.f32 %v3588_v35, %v3587_v29 }
 0x3bf   : > { %v3033_v22 = vmax.f32 %v3017_v39, 0.0  ;;  %v4583_v37 = vadd.f32 %v4582_v8, %v6612_v55  ;;  %v2446_v24 = vadd.f32 %v3589_v42, %v6567_v6 }
 0x3c1   : > { %3049 = vst [vmem:[%s4761_s10 + $0x68] sm:$0xff] %v3033_v22  ;;  %v3018_v30 = vadd.f32 %v4583_v37, %v6577_v27  ;;  %v4578_v50 = vadd.f32 %v6571_v21, %v2446_v24 }
 0x3c3   : > { %v3034_v41 = vmax.f32 %v3018_v30, 0.0  ;;  %v4579_v56 = vadd.f32 %v4578_v50, %v6607_v9 }
 0x3c5   : > { %3050 = vst [vmem:[%s4761_s10 + $0x70] sm:$0xff] %v3034_v41  ;;  %v3019_v5 = vadd.f32 %v4579_v56, %v6577_v27 }
 0x3c7   : > { %v3035_v54 = vmax.f32 %v3019_v5, 0.0 }
 0x3c9   : > { %3051 = vst [vmem:[%s4761_s10 + $0x78] sm:$0xff] %v3035_v54 }
 0x3ca PF: > { %s15_s22 = sadd.s32 1, %s4683_s22   ;;  %s6698_s18 = smov %s4675_s20 }
 0x3cb   : > { %p12_p9 = scmp.ge.s32.totalorder %s15_s22, 6   ;;  %s6699_s19 = smov %s4679_s21 }
 0x3cc   : > { %s6700_s20 = smov %s6703_s23  ;;  %s6701_s21 = smov %s6707_s24 }
 0x3cd   :  { %14 = sbr.rel (!%p12_p9) target bundleno = 3 (0x3), region = 89 }

</bundles_post_ra>
